<compile_context>
chip_gen: v7x
topology: tpu7x:2x2x1
jax: 0.10.0
libtpu: 0.0.40
codegen_flags: <defaults>
</compile_context>

<pallas_src>
import math

import jax
import jax.numpy as jnp
from jax import lax
from jax.experimental import pallas as pl
from jax.experimental.pallas import tpu as pltpu


PARAM_ORDER = (
    'dense_a_w', 'dense_a_b', 'dense_b_w', 'dense_b_b',
    'gA_wih', 'gA_whh', 'gA_bih', 'gA_bhh',
    'gB_wih', 'gB_whh', 'gB_bih', 'gB_bhh',
    'pA_wih', 'pA_whh', 'pA_bih', 'pA_bhh',
    'pB_wih', 'pB_whh', 'pB_bih', 'pB_bhh',
    'eA_wih', 'eA_whh', 'eA_bih', 'eA_bhh',
    'eB_wih', 'eB_whh', 'eB_bih', 'eB_bhh',
    'att_wa', 'att_wb',
    'sa1_w', 'sa1_b', 'sa2_w', 'sa2_b',
    'd1_w', 'd1_b', 'd2_w', 'd2_b',
)


# ------------------------------- fused kernel --------------------------------

def _make_kernel(dims, B, P, T):
    D_m, D_g, D_p, D_e = dims
    n_params = len(PARAM_ORDER)
    f32 = jnp.float32

    def _gru(x_parts, h, wih_ref, whh_ref, bih_ref, bhh_ref, hd):
        # PyTorch nn.GRUCell with fused gate matmuls. Gate order (r, z, n) stacked on
        # the lane axis: wih (d_in, 3*hd), whh (hd, 3*hd), biases (1, 3*hd).
        gi = bih_ref[...]
        off = 0
        for xp in x_parts:
            k = xp.shape[-1]
            gi = gi + jnp.dot(xp, wih_ref[off:off + k, :], preferred_element_type=f32)
            off += k
        gh = jnp.dot(h, whh_ref[...], preferred_element_type=f32) + bhh_ref[...]
        r = jax.nn.sigmoid(gi[:, 0:hd] + gh[:, 0:hd])
        z = jax.nn.sigmoid(gi[:, hd:2 * hd] + gh[:, hd:2 * hd])
        n = jnp.tanh(gi[:, 2 * hd:3 * hd] + r * gh[:, 2 * hd:3 * hd])
        return (1.0 - z) * n + z * h

    def kernel(*refs):
        ua_ref, ub_ref, qmask_ref, pe_ref = refs[:4]
        pr = dict(zip(PARAM_ORDER, refs[4:4 + n_params]))
        ea_out_ref, eb_out_ref, alpha_out_ref = refs[4 + n_params:4 + n_params + 3]
        (gha_s, ghb_s, ga_prev_s, gb_prev_s,
         qa_s, qb_s, ea_s, eb_s) = refs[4 + n_params + 3:]

        # ---- zero the VMEM-resident recurrent state once (scratch is stale VMEM) ----
        for s in (gha_s, ghb_s, ga_prev_s, gb_prev_s, qa_s, qb_s, ea_s, eb_s):
            s[...] = jnp.zeros(s.shape, s.dtype)

        @pl.loop(0, T)
        def _step(t):
            ua = ua_ref[t]            # (B, D_m_A)
            ub = ub_ref[t]            # (B, D_m_B)
            qm_pb = qmask_ref[t]      # (P, B) party-major one-hot
            pe_t = pe_ref[t]          # (1, D_g)

            # dense_a / dense_b (dropout layers are identity at inference)
            u_a = (jnp.dot(ua, pr['dense_a_w'][...], preferred_element_type=f32)
                   + pr['dense_a_b'][...])
            u_b = (jnp.dot(ub, pr['dense_b_w'][...], preferred_element_type=f32)
                   + pr['dense_b_b'][...])

            # qm_idx = argmax(qmask, party) with first-max tie semantics, kept as a
            # one-hot (P, B) selector so _select_parties is a masked sum.
            mx = jnp.max(qm_pb, axis=0, keepdims=True)                   # (1, B)
            pos = lax.broadcasted_iota(jnp.int32, (P, B), 0)
            first = jnp.min(jnp.where(qm_pb == mx, pos, P), axis=0, keepdims=True)
            sel_pb = (pos == first).astype(f32)                          # (P, B)

            def select_party(q3):                                        # (P,B,D)->(B,D)
                return jnp.sum(sel_pb[:, :, None] * q3, axis=0)

            q0_sel_a = select_party(qa_s[...])
            q0_sel_b = select_party(qb_s[...])

            # ---- global-state GRUs (hidden = previous g; zeros at t == 0) ----
            g_a = _gru([u_a, q0_sel_a], ga_prev_s[...],
                       pr['gA_wih'], pr['gA_whh'], pr['gA_bih'], pr['gA_bhh'], D_g)
            g_b = _gru([u_b, q0_sel_b], gb_prev_s[...],
                       pr['gB_wih'], pr['gB_whh'], pr['gB_bih'], pr['gB_bhh'], D_g)

            # ---- SimpleAttention over the PE-augmented histories (rows < t) ----
            valid = lax.broadcasted_iota(jnp.int32, (T, 1, 1), 0) < t    # (T,1,1)
            validf = valid.astype(f32)

            def fused_att(gh_ref, w2_ref):
                # two SimpleAttentions on one history via a single (T*B,D_g)@(D_g,2) dot
                gh = gh_ref[...]                                         # (T, B, D_g)
                s = jnp.dot(gh.reshape(T * B, D_g), w2_ref[...],
                            preferred_element_type=f32).reshape(T, B, 2)
                s = jnp.where(valid, s, -1e30)
                m = jnp.max(s, axis=0, keepdims=True)
                ee = jnp.exp(s - m) * validf
                den = jnp.sum(ee, axis=0, keepdims=True)
                inv = pl.reciprocal(jnp.where(den > 0.0, den, 1.0), approx=True)
                alpha = ee * inv                                         # (T, B, 2)
                c0 = jnp.sum(alpha[:, :, 0:1] * gh, axis=0)              # (B, D_g)
                c1 = jnp.sum(alpha[:, :, 1:2] * gh, axis=0)
                return c0, c1, alpha[:, :, 0] + alpha[:, :, 1]           # (T, B)

            c_aa, c_ba, asum_a = fused_att(gha_s, pr['att_wa'])  # attention1/2 on hist A
            c_ab, c_bb, asum_b = fused_att(ghb_s, pr['att_wb'])  # attention3/4 on hist B
            # PyTorch records alpha_aa + alpha_ab + alpha_ba + alpha_bb per step.
            alpha_sum = asum_a + asum_b                                  # (T, B)

            # ---- 'general2' self-attention on the 2 contexts + dense (pure VPU) ----
            def self_att_dense(c0, c1, w_ref, b_ref, dw_ref, db_ref):
                w = w_ref[...]
                b = b_ref[...]
                wm0 = jnp.dot(c0, w, preferred_element_type=f32) + b
                wm1 = jnp.dot(c1, w, preferred_element_type=f32) + b
                s00 = jnp.sum(wm0 * c0, axis=-1, keepdims=True)
                s01 = jnp.sum(wm0 * c1, axis=-1, keepdims=True)
                s10 = jnp.sum(wm1 * c0, axis=-1, keepdims=True)
                s11 = jnp.sum(wm1 * c1, axis=-1, keepdims=True)

                def srow(sa, sb):
                    mm = jnp.maximum(sa, sb)
                    ea_ = jnp.exp(sa - mm)
                    eb_ = jnp.exp(sb - mm)
                    inv = pl.reciprocal(ea_ + eb_, approx=True)
                    return ea_ * inv, eb_ * inv

                a00, a01 = srow(s00, s01)
                a10, a11 = srow(s10, s11)
                o0 = a00 * c0 + a01 * c1                                 # (B, D_g)
                o1 = a10 * c0 + a11 * c1
                # dense on the flattened (B, 2*D_g) context via split matmuls
                return (jnp.dot(o0, dw_ref[0:D_g, :], preferred_element_type=f32)
                        + jnp.dot(o1, dw_ref[D_g:2 * D_g, :], preferred_element_type=f32)
                        + db_ref[...])

            # first timestep: empty history -> c_a = c_b = 0 (alpha None) in PyTorch
            gate = (t > 0).astype(f32)
            c_a = gate * self_att_dense(c_aa, c_ab, pr['sa1_w'], pr['sa1_b'],
                                        pr['d1_w'], pr['d1_b'])
            c_b = gate * self_att_dense(c_bb, c_ba, pr['sa2_w'], pr['sa2_b'],
                                        pr['d2_w'], pr['d2_b'])

            # ---- party + emotion GRUs (listener_state=False; dropout = identity) ----
            def rnn_party(u, c_, q_s, e_s, wp, whp, bip, bhp, we, whe, bie, bhe):
                # one batched GRU over all P parties: rows are (party, batch)-major
                u_pb = jnp.concatenate([u] * P, axis=0)                  # (P*B, D_m)
                c_pb = jnp.concatenate([c_] * P, axis=0)                 # (P*B, D_g)
                q0_3 = q_s[...]                                          # (P, B, D_p)
                qs_ = _gru([u_pb, c_pb], q0_3.reshape(P * B, D_p),
                           wp, whp, bip, bhp, D_p)
                qs_3 = qs_.reshape(P, B, D_p)
                qm_3 = qm_pb[:, :, None]                                 # (P, B, 1)
                q_new = q0_3 * (1.0 - qm_3) + qs_3 * qm_3
                q_sel = jnp.sum(sel_pb[:, :, None] * q_new, axis=0)      # (B, D_p)
                e_new = _gru([q_sel], e_s[...], we, whe, bie, bhe, D_e)
                q_s[...] = q_new
                e_s[...] = e_new
                return e_new

            e_a = rnn_party(u_a, c_a, qa_s, ea_s,
                            pr['pA_wih'], pr['pA_whh'], pr['pA_bih'], pr['pA_bhh'],
                            pr['eA_wih'], pr['eA_whh'], pr['eA_bih'], pr['eA_bhh'])
            e_b = rnn_party(u_b, c_b, qb_s, eb_s,
                            pr['pB_wih'], pr['pB_whh'], pr['pB_bih'], pr['pB_bhh'],
                            pr['eB_wih'], pr['eB_whh'], pr['eB_bih'], pr['eB_bhh'])

            # ---- append PE-augmented g to the histories; keep raw g as GRU hidden ----
            gha_s[t] = g_a + pe_t
            ghb_s[t] = g_b + pe_t
            ga_prev_s[...] = g_a
            gb_prev_s[...] = g_b

            # ---- per-step outputs (VMEM-resident; flushed to HBM once at the end) ----
            # Epilogue softmax over a size-1 axis is identically 1.0, so
            # e == cat([e_a, e_b], -1) exactly; the identity scaling is elided.
            ea_out_ref[t] = e_a
            eb_out_ref[t] = e_b
            # TODO(synk): PyTorch returns a ragged Python list of per-step alphas (and
            # skips t==0); here it is a dense zero-padded (T, T_hist, B) slab, permuted
            # to (T, B, T_hist) in the wrapper.
            alpha_out_ref[t] = alpha_sum

    return kernel


# --------------------------------- wrapper -----------------------------------

def dialogue_rnn_forward(params, Ua, Ub, qmask, dims):
    T, B, _ = Ua.shape
    P = qmask.shape[-1]
    D_m, D_g, D_p, D_e = dims
    f32 = jnp.float32

    pe = params['pe'][:T].astype(f32)                          # (T, 1, D_g)
    qmask_pb = jnp.transpose(qmask, (0, 2, 1)).astype(f32)     # (T, P, B) party-major
    flat = [params[k] for k in PARAM_ORDER]

    def vmem():
        return pl.BlockSpec(memory_space=pltpu.MemorySpace.VMEM)

    n_in = 4 + len(flat)

    out_shape = (jax.ShapeDtypeStruct((T, B, D_e), f32),       # e_a per step
                 jax.ShapeDtypeStruct((T, B, D_e), f32),       # e_b per step
                 jax.ShapeDtypeStruct((T, T, B), f32))         # alpha (step, hist, batch)

    scratch = [
        pltpu.VMEM((T, B, D_g), f32),   # g_hist_a (+PE), resident for the sequence
        pltpu.VMEM((T, B, D_g), f32),   # g_hist_b (+PE)
        pltpu.VMEM((B, D_g), f32),      # previous g_a (raw)
        pltpu.VMEM((B, D_g), f32),      # previous g_b (raw)
        pltpu.VMEM((P, B, D_p), f32),   # q_a party states
        pltpu.VMEM((P, B, D_p), f32),   # q_b party states
        pltpu.VMEM((B, D_e), f32),      # e_a state
        pltpu.VMEM((B, D_e), f32),      # e_b state
    ]

    # NOTE: at production T/B the resident histories and dense (T,T,B) alpha grow as
    # O(T^2 B); on v7x (64 MiB VMEM) switch alpha back to a t-blocked grid or raise
    # vmem_limit_bytes via pltpu.CompilerParams. At these sizes everything is < 100 KiB.
    kernel = _make_kernel(dims, B, P, T)
    ea, eb, alpha_tb = pl.pallas_call(
        kernel,
        out_shape=out_shape,
        in_specs=[vmem() for _ in range(n_in)],
        out_specs=tuple(vmem() for _ in range(3)),
        scratch_shapes=scratch,
    )(Ua, Ub, qmask_pb, pe, *flat)

    e = jnp.concatenate([ea, eb], axis=-1)                     # (T, B, 2*D_e)
    alpha = jnp.transpose(alpha_tb, (0, 2, 1))                 # (T, B, T)
    return e, alpha


# ----------------------------- parameter creation ----------------------------

def _uniform(key, shape, bound):
    return jax.random.uniform(key, shape, jnp.float32, -bound, bound)


def _init_linear(key, d_in, d_out):
    k1, k2 = jax.random.split(key)
    b = 1.0 / math.sqrt(d_in)
    return _uniform(k1, (d_in, d_out), b), _uniform(k2, (1, d_out), b)


def _init_gru(key, d_in, d_hid):
    # fused gate layout, gate order (r, z, n) on the last axis (PyTorch nn.GRUCell)
    ks = jax.random.split(key, 4)
    b = 1.0 / math.sqrt(d_hid)
    return (_uniform(ks[0], (d_in, 3 * d_hid), b),
            _uniform(ks[1], (d_hid, 3 * d_hid), b),
            _uniform(ks[2], (1, 3 * d_hid), b),
            _uniform(ks[3], (1, 3 * d_hid), b))


def make_positional_encoding(max_len, d_model):
    pos = jnp.arange(max_len, dtype=jnp.float32)[:, None]
    div = jnp.exp(jnp.arange(0, d_model, 2, dtype=jnp.float32)
                  * (-math.log(10000.0) / d_model))
    pe = jnp.zeros((max_len, d_model), jnp.float32)
    pe = pe.at[:, 0::2].set(jnp.sin(pos * div))
    pe = pe.at[:, 1::2].set(jnp.cos(pos * div))
    return pe[:, None, :]                                      # (max_len, 1, d_model)


def init_dialogue_rnn_params(key, D_m_A, D_m_B, D_m, D_g, D_p, D_e, max_len=512):
    ks = jax.random.split(key, 14)
    p = {}
    p['dense_a_w'], p['dense_a_b'] = _init_linear(ks[0], D_m_A, D_m)
    p['dense_b_w'], p['dense_b_b'] = _init_linear(ks[1], D_m_B, D_m)
    gru_shapes = [('gA', D_m + D_p, D_g), ('gB', D_m + D_p, D_g),
                  ('pA', D_m + D_g, D_p), ('pB', D_m + D_g, D_p),
                  ('eA', D_p, D_e), ('eB', D_p, D_e)]
    for i, (name, din, dh) in enumerate(gru_shapes):
        (p[f'{name}_wih'], p[f'{name}_whh'],
         p[f'{name}_bih'], p[f'{name}_bhh']) = _init_gru(ks[2 + i], din, dh)
    # SimpleAttention scalar weights: columns [attention1, attention2] score history A,
    # [attention3, attention4] score history B.
    p['att_wa'] = _uniform(ks[8], (D_g, 2), 1.0 / math.sqrt(D_g))
    p['att_wb'] = _uniform(ks[9], (D_g, 2), 1.0 / math.sqrt(D_g))
    p['sa1_w'], p['sa1_b'] = _init_linear(ks[10], D_g, D_g)
    p['sa2_w'], p['sa2_b'] = _init_linear(ks[11], D_g, D_g)
    p['d1_w'], p['d1_b'] = _init_linear(ks[12], 2 * D_g, D_g)
    p['d2_w'], p['d2_b'] = _init_linear(ks[13], 2 * D_g, D_g)
    # self_Attention(Linear(D_e,1)) feeds a softmax over a size-1 axis (== 1.0), an
    # exact identity, so its weights are not needed by the kernel.
    p['pe'] = make_positional_encoding(max_len, D_g)
    return p


# ----------------------------------- main -------------------------------------

if __name__ == "__main__":
    D_m_A, D_m_B = 24, 20
    D_m = D_g = D_p = D_e = 32
    T, B, P = 8, 2, 2
    dims = (D_m, D_g, D_p, D_e)

    root = jax.random.PRNGKey(0)
    pkey, dkey = jax.random.split(root)
    params = init_dialogue_rnn_params(pkey, D_m_A, D_m_B, D_m, D_g, D_p, D_e)

    ks = jax.random.split(dkey, 3)
    Ua = jax.random.normal(ks[0], (T, B, D_m_A), jnp.float32)
    Ub = jax.random.normal(ks[1], (T, B, D_m_B), jnp.float32)
    speakers = jax.random.randint(ks[2], (T, B), 0, P)
    qmask = jax.nn.one_hot(speakers, P, dtype=jnp.float32)     # (T, B, P) one-hot

    e, alpha = dialogue_rnn_forward(params, Ua, Ub, qmask, dims)
    jax.block_until_ready((e, alpha))

    assert e.shape == (T, B, 2 * D_e)
    assert alpha.shape == (T, B, T)
    assert bool(jnp.all(jnp.isfinite(e)))
    assert bool(jnp.all(jnp.isfinite(alpha)))
    print("KERNEL_OK")
</pallas_src>

<mosaic_0001>
module attributes {stable_mosaic.version = 11 : i64} {
  func.func @kernel(%arg0: memref<8x2x24xf32, #tpu.memory_space<vmem>>, %arg1: memref<8x2x20xf32, #tpu.memory_space<vmem>>, %arg2: memref<8x2x2xf32, #tpu.memory_space<vmem>>, %arg3: memref<8x1x32xf32, #tpu.memory_space<vmem>>, %arg4: memref<24x32xf32, #tpu.memory_space<vmem>>, %arg5: memref<1x32xf32, #tpu.memory_space<vmem>>, %arg6: memref<20x32xf32, #tpu.memory_space<vmem>>, %arg7: memref<1x32xf32, #tpu.memory_space<vmem>>, %arg8: memref<64x96xf32, #tpu.memory_space<vmem>>, %arg9: memref<32x96xf32, #tpu.memory_space<vmem>>, %arg10: memref<1x96xf32, #tpu.memory_space<vmem>>, %arg11: memref<1x96xf32, #tpu.memory_space<vmem>>, %arg12: memref<64x96xf32, #tpu.memory_space<vmem>>, %arg13: memref<32x96xf32, #tpu.memory_space<vmem>>, %arg14: memref<1x96xf32, #tpu.memory_space<vmem>>, %arg15: memref<1x96xf32, #tpu.memory_space<vmem>>, %arg16: memref<64x96xf32, #tpu.memory_space<vmem>>, %arg17: memref<32x96xf32, #tpu.memory_space<vmem>>, %arg18: memref<1x96xf32, #tpu.memory_space<vmem>>, %arg19: memref<1x96xf32, #tpu.memory_space<vmem>>, %arg20: memref<64x96xf32, #tpu.memory_space<vmem>>, %arg21: memref<32x96xf32, #tpu.memory_space<vmem>>, %arg22: memref<1x96xf32, #tpu.memory_space<vmem>>, %arg23: memref<1x96xf32, #tpu.memory_space<vmem>>, %arg24: memref<32x96xf32, #tpu.memory_space<vmem>>, %arg25: memref<32x96xf32, #tpu.memory_space<vmem>>, %arg26: memref<1x96xf32, #tpu.memory_space<vmem>>, %arg27: memref<1x96xf32, #tpu.memory_space<vmem>>, %arg28: memref<32x96xf32, #tpu.memory_space<vmem>>, %arg29: memref<32x96xf32, #tpu.memory_space<vmem>>, %arg30: memref<1x96xf32, #tpu.memory_space<vmem>>, %arg31: memref<1x96xf32, #tpu.memory_space<vmem>>, %arg32: memref<32x2xf32, #tpu.memory_space<vmem>>, %arg33: memref<32x2xf32, #tpu.memory_space<vmem>>, %arg34: memref<32x32xf32, #tpu.memory_space<vmem>>, %arg35: memref<1x32xf32, #tpu.memory_space<vmem>>, %arg36: memref<32x32xf32, #tpu.memory_space<vmem>>, %arg37: memref<1x32xf32, #tpu.memory_space<vmem>>, %arg38: memref<64x32xf32, #tpu.memory_space<vmem>>, %arg39: memref<1x32xf32, #tpu.memory_space<vmem>>, %arg40: memref<64x32xf32, #tpu.memory_space<vmem>>, %arg41: memref<1x32xf32, #tpu.memory_space<vmem>>, %arg42: memref<8x2x32xf32, #tpu.memory_space<vmem>>, %arg43: memref<8x2x32xf32, #tpu.memory_space<vmem>>, %arg44: memref<8x8x2xf32, #tpu.memory_space<vmem>>, %arg45: memref<8x2x32xf32, #tpu.memory_space<vmem>>, %arg46: memref<8x2x32xf32, #tpu.memory_space<vmem>>, %arg47: memref<2x32xf32, #tpu.memory_space<vmem>>, %arg48: memref<2x32xf32, #tpu.memory_space<vmem>>, %arg49: memref<2x2x32xf32, #tpu.memory_space<vmem>>, %arg50: memref<2x2x32xf32, #tpu.memory_space<vmem>>, %arg51: memref<2x32xf32, #tpu.memory_space<vmem>>, %arg52: memref<2x32xf32, #tpu.memory_space<vmem>>) attributes {dimension_semantics = [], scalar_prefetch = 0 : i64, scratch_operands = 8 : i64, tpu.core_type = #tpu.core_type<tc>} {
    %cst = arith.constant 0.000000e+00 : f32
    %0 = vector.broadcast %cst : f32 to vector<8x2x32xf32>
    %c0 = arith.constant 0 : index
    %c0_0 = arith.constant 0 : index
    %c0_1 = arith.constant 0 : index
    %1 = vector.load %arg45[%c0, %c0_0, %c0_1] : memref<8x2x32xf32, #tpu.memory_space<vmem>>, vector<8x2x32xf32>
    tpu.vector_store %arg45[%c0, %c0_0, %c0_1], %0 {strides = array<i32>} : memref<8x2x32xf32, #tpu.memory_space<vmem>>, vector<8x2x32xf32>,
    %cst_2 = arith.constant 0.000000e+00 : f32
    %2 = vector.broadcast %cst_2 : f32 to vector<8x2x32xf32>
    %c0_3 = arith.constant 0 : index
    %c0_4 = arith.constant 0 : index
    %c0_5 = arith.constant 0 : index
    %3 = vector.load %arg46[%c0_3, %c0_4, %c0_5] : memref<8x2x32xf32, #tpu.memory_space<vmem>>, vector<8x2x32xf32>
    tpu.vector_store %arg46[%c0_3, %c0_4, %c0_5], %2 {strides = array<i32>} : memref<8x2x32xf32, #tpu.memory_space<vmem>>, vector<8x2x32xf32>,
    %cst_6 = arith.constant 0.000000e+00 : f32
    %4 = vector.broadcast %cst_6 : f32 to vector<2x32xf32>
    %c0_7 = arith.constant 0 : index
    %c0_8 = arith.constant 0 : index
    %5 = vector.load %arg47[%c0_7, %c0_8] : memref<2x32xf32, #tpu.memory_space<vmem>>, vector<2x32xf32>
    tpu.vector_store %arg47[%c0_7, %c0_8], %4 {strides = array<i32>} : memref<2x32xf32, #tpu.memory_space<vmem>>, vector<2x32xf32>,
    %cst_9 = arith.constant 0.000000e+00 : f32
    %6 = vector.broadcast %cst_9 : f32 to vector<2x32xf32>
    %c0_10 = arith.constant 0 : index
    %c0_11 = arith.constant 0 : index
    %7 = vector.load %arg48[%c0_10, %c0_11] : memref<2x32xf32, #tpu.memory_space<vmem>>, vector<2x32xf32>
    tpu.vector_store %arg48[%c0_10, %c0_11], %6 {strides = array<i32>} : memref<2x32xf32, #tpu.memory_space<vmem>>, vector<2x32xf32>,
    %cst_12 = arith.constant 0.000000e+00 : f32
    %8 = vector.broadcast %cst_12 : f32 to vector<2x2x32xf32>
    %c0_13 = arith.constant 0 : index
    %c0_14 = arith.constant 0 : index
    %c0_15 = arith.constant 0 : index
    %9 = vector.load %arg49[%c0_13, %c0_14, %c0_15] : memref<2x2x32xf32, #tpu.memory_space<vmem>>, vector<2x2x32xf32>
    tpu.vector_store %arg49[%c0_13, %c0_14, %c0_15], %8 {strides = array<i32>} : memref<2x2x32xf32, #tpu.memory_space<vmem>>, vector<2x2x32xf32>,
    %cst_16 = arith.constant 0.000000e+00 : f32
    %10 = vector.broadcast %cst_16 : f32 to vector<2x2x32xf32>
    %c0_17 = arith.constant 0 : index
    %c0_18 = arith.constant 0 : index
    %c0_19 = arith.constant 0 : index
    %11 = vector.load %arg50[%c0_17, %c0_18, %c0_19] : memref<2x2x32xf32, #tpu.memory_space<vmem>>, vector<2x2x32xf32>
    tpu.vector_store %arg50[%c0_17, %c0_18, %c0_19], %10 {strides = array<i32>} : memref<2x2x32xf32, #tpu.memory_space<vmem>>, vector<2x2x32xf32>,
    %cst_20 = arith.constant 0.000000e+00 : f32
    %12 = vector.broadcast %cst_20 : f32 to vector<2x32xf32>
    %c0_21 = arith.constant 0 : index
    %c0_22 = arith.constant 0 : index
    %13 = vector.load %arg51[%c0_21, %c0_22] : memref<2x32xf32, #tpu.memory_space<vmem>>, vector<2x32xf32>
    tpu.vector_store %arg51[%c0_21, %c0_22], %12 {strides = array<i32>} : memref<2x32xf32, #tpu.memory_space<vmem>>, vector<2x32xf32>,
    %cst_23 = arith.constant 0.000000e+00 : f32
    %14 = vector.broadcast %cst_23 : f32 to vector<2x32xf32>
    %c0_24 = arith.constant 0 : index
    %c0_25 = arith.constant 0 : index
    %15 = vector.load %arg52[%c0_24, %c0_25] : memref<2x32xf32, #tpu.memory_space<vmem>>, vector<2x32xf32>
    tpu.vector_store %arg52[%c0_24, %c0_25], %14 {strides = array<i32>} : memref<2x32xf32, #tpu.memory_space<vmem>>, vector<2x32xf32>,
    %c0_i32 = arith.constant 0 : i32
    %c8_i32 = arith.constant 8 : i32
    %16 = arith.addi %c0_i32, %c8_i32 : i32
    %c1_i32 = arith.constant 1 : i32
    scf.for %arg53 = %c0_i32 to %16 step %c1_i32  : i32 {
      %c1_i32_27 = arith.constant 1 : i32
      %17 = arith.muli %arg53, %c1_i32_27 : i32
      %c0_i32_28 = arith.constant 0 : i32
      %18 = arith.addi %c0_i32_28, %17 : i32
      %19 = arith.index_cast %18 : i32 to index
      %c0_29 = arith.constant 0 : index
      %c0_30 = arith.constant 0 : index
      %20 = vector.load %arg0[%19, %c0_29, %c0_30] : memref<8x2x24xf32, #tpu.memory_space<vmem>>, vector<1x2x24xf32>
      %21 = vector.shape_cast %20 : vector<1x2x24xf32> to vector<2x24xf32>
      %22 = arith.index_cast %18 : i32 to index
      %c0_31 = arith.constant 0 : index
      %c0_32 = arith.constant 0 : index
      %23 = vector.load %arg1[%22, %c0_31, %c0_32] : memref<8x2x20xf32, #tpu.memory_space<vmem>>, vector<1x2x20xf32>
      %24 = vector.shape_cast %23 : vector<1x2x20xf32> to vector<2x20xf32>
      %25 = arith.index_cast %18 : i32 to index
      %c0_33 = arith.constant 0 : index
      %c0_34 = arith.constant 0 : index
      %26 = vector.load %arg2[%25, %c0_33, %c0_34] : memref<8x2x2xf32, #tpu.memory_space<vmem>>, vector<1x2x2xf32>
      %27 = vector.shape_cast %26 : vector<1x2x2xf32> to vector<2x2xf32>
      %28 = arith.index_cast %18 : i32 to index
      %c0_35 = arith.constant 0 : index
      %c0_36 = arith.constant 0 : index
      %29 = vector.load %arg3[%28, %c0_35, %c0_36] : memref<8x1x32xf32, #tpu.memory_space<vmem>>, vector<1x1x32xf32>
      %30 = vector.shape_cast %29 : vector<1x1x32xf32> to vector<1x32xf32>
      %c0_37 = arith.constant 0 : index
      %c0_38 = arith.constant 0 : index
      %31 = vector.load %arg4[%c0_37, %c0_38] : memref<24x32xf32, #tpu.memory_space<vmem>>, vector<24x32xf32>
      %cst_39 = arith.constant dense<0.000000e+00> : vector<2x32xf32>
      %32 = tpu.matmul %21, %31, %cst_39 {dimension_numbers = #tpu.dot_dimension_numbers<[1], [0], [0], [1], [0, 0, 1, 1], [], []>} : vector<2x24xf32>, vector<24x32xf32>, vector<2x32xf32> -> vector<2x32xf32>
      %c0_40 = arith.constant 0 : index
      %c0_41 = arith.constant 0 : index
      %33 = vector.load %arg5[%c0_40, %c0_41] : memref<1x32xf32, #tpu.memory_space<vmem>>, vector<1x32xf32>
      %34 = vector.broadcast %33 : vector<1x32xf32> to vector<2x32xf32>
      %35 = arith.addf %32, %34 : vector<2x32xf32>
      %c0_42 = arith.constant 0 : index
      %c0_43 = arith.constant 0 : index
      %36 = vector.load %arg6[%c0_42, %c0_43] : memref<20x32xf32, #tpu.memory_space<vmem>>, vector<20x32xf32>
      %cst_44 = arith.constant dense<0.000000e+00> : vector<2x32xf32>
      %37 = tpu.matmul %24, %36, %cst_44 {dimension_numbers = #tpu.dot_dimension_numbers<[1], [0], [0], [1], [0, 0, 1, 1], [], []>} : vector<2x20xf32>, vector<20x32xf32>, vector<2x32xf32> -> vector<2x32xf32>
      %c0_45 = arith.constant 0 : index
      %c0_46 = arith.constant 0 : index
      %38 = vector.load %arg7[%c0_45, %c0_46] : memref<1x32xf32, #tpu.memory_space<vmem>>, vector<1x32xf32>
      %39 = vector.broadcast %38 : vector<1x32xf32> to vector<2x32xf32>
      %40 = arith.addf %37, %39 : vector<2x32xf32>
      %cst_47 = arith.constant dense<0xFF800000> : vector<2xf32>
      %41 = vector.multi_reduction <maximumf>, %27, %cst_47 [0] : vector<2x2xf32> to vector<2xf32>
      %42 = vector.shape_cast %41 : vector<2xf32> to vector<1x2xf32>
      %43 = tpu.iota {dimensions = array<i32: 0>} : vector<2x2xi32>
      %44 = vector.broadcast %42 : vector<1x2xf32> to vector<2x2xf32>
      %45 = arith.cmpf oeq, %27, %44 : vector<2x2xf32>
      %c2_i32 = arith.constant 2 : i32
      %46 = vector.broadcast %c2_i32 : i32 to vector<2x2xi32>
      %47 = arith.select %45, %43, %46 : vector<2x2xi1>, vector<2x2xi32>
      %cst_48 = arith.constant dense<2147483647> : vector<2xi32>
      %48 = vector.multi_reduction <minsi>, %47, %cst_48 [0] : vector<2x2xi32> to vector<2xi32>
      %49 = vector.shape_cast %48 : vector<2xi32> to vector<1x2xi32>
      %50 = vector.broadcast %49 : vector<1x2xi32> to vector<2x2xi32>
      %51 = arith.cmpi eq, %43, %50 : vector<2x2xi32>
      %52 = arith.extui %51 : vector<2x2xi1> to vector<2x2xi32>
      %53 = arith.sitofp %52 : vector<2x2xi32> to vector<2x2xf32>
      %c0_49 = arith.constant 0 : index
      %c0_50 = arith.constant 0 : index
      %c0_51 = arith.constant 0 : index
      %54 = vector.load %arg49[%c0_49, %c0_50, %c0_51] : memref<2x2x32xf32, #tpu.memory_space<vmem>>, vector<2x2x32xf32>
      %55 = vector.shape_cast %53 : vector<2x2xf32> to vector<2x2x1xf32>
      %56 = vector.broadcast %55 : vector<2x2x1xf32> to vector<2x2x32xf32>
      %57 = arith.mulf %56, %54 : vector<2x2x32xf32>
      %cst_52 = arith.constant dense<0.000000e+00> : vector<2x32xf32>
      %58 = vector.multi_reduction <add>, %57, %cst_52 [0] : vector<2x2x32xf32> to vector<2x32xf32>
      %c0_53 = arith.constant 0 : index
      %c0_54 = arith.constant 0 : index
      %c0_55 = arith.constant 0 : index
      %59 = vector.load %arg50[%c0_53, %c0_54, %c0_55] : memref<2x2x32xf32, #tpu.memory_space<vmem>>, vector<2x2x32xf32>
      %60 = vector.shape_cast %53 : vector<2x2xf32> to vector<2x2x1xf32>
      %61 = vector.broadcast %60 : vector<2x2x1xf32> to vector<2x2x32xf32>
      %62 = arith.mulf %61, %59 : vector<2x2x32xf32>
      %cst_56 = arith.constant dense<0.000000e+00> : vector<2x32xf32>
      %63 = vector.multi_reduction <add>, %62, %cst_56 [0] : vector<2x2x32xf32> to vector<2x32xf32>
      %c0_57 = arith.constant 0 : index
      %c0_58 = arith.constant 0 : index
      %64 = vector.load %arg47[%c0_57, %c0_58] : memref<2x32xf32, #tpu.memory_space<vmem>>, vector<2x32xf32>
      %c0_59 = arith.constant 0 : index
      %c0_60 = arith.constant 0 : index
      %65 = vector.load %arg10[%c0_59, %c0_60] : memref<1x96xf32, #tpu.memory_space<vmem>>, vector<1x96xf32>
      %c0_61 = arith.constant 0 : index
      %c0_62 = arith.constant 0 : index
      %66 = vector.load %arg8[%c0_61, %c0_62] : memref<64x96xf32, #tpu.memory_space<vmem>>, vector<32x96xf32>
      %cst_63 = arith.constant dense<0.000000e+00> : vector<2x96xf32>
      %67 = tpu.matmul %35, %66, %cst_63 {dimension_numbers = #tpu.dot_dimension_numbers<[1], [0], [0], [1], [0, 0, 1, 1], [], []>} : vector<2x32xf32>, vector<32x96xf32>, vector<2x96xf32> -> vector<2x96xf32>
      %68 = vector.broadcast %65 : vector<1x96xf32> to vector<2x96xf32>
      %69 = arith.addf %68, %67 : vector<2x96xf32>
      %c32 = arith.constant 32 : index
      %c0_64 = arith.constant 0 : index
      %70 = vector.load %arg8[%c32, %c0_64] : memref<64x96xf32, #tpu.memory_space<vmem>>, vector<32x96xf32>
      %cst_65 = arith.constant dense<0.000000e+00> : vector<2x96xf32>
      %71 = tpu.matmul %58, %70, %cst_65 {dimension_numbers = #tpu.dot_dimension_numbers<[1], [0], [0], [1], [0, 0, 1, 1], [], []>} : vector<2x32xf32>, vector<32x96xf32>, vector<2x96xf32> -> vector<2x96xf32>
      %72 = arith.addf %69, %71 : vector<2x96xf32>
      %c0_66 = arith.constant 0 : index
      %c0_67 = arith.constant 0 : index
      %73 = vector.load %arg9[%c0_66, %c0_67] : memref<32x96xf32, #tpu.memory_space<vmem>>, vector<32x96xf32>
      %cst_68 = arith.constant dense<0.000000e+00> : vector<2x96xf32>
      %74 = tpu.matmul %64, %73, %cst_68 {dimension_numbers = #tpu.dot_dimension_numbers<[1], [0], [0], [1], [0, 0, 1, 1], [], []>} : vector<2x32xf32>, vector<32x96xf32>, vector<2x96xf32> -> vector<2x96xf32>
      %c0_69 = arith.constant 0 : index
      %c0_70 = arith.constant 0 : index
      %75 = vector.load %arg11[%c0_69, %c0_70] : memref<1x96xf32, #tpu.memory_space<vmem>>, vector<1x96xf32>
      %76 = vector.broadcast %75 : vector<1x96xf32> to vector<2x96xf32>
      %77 = arith.addf %74, %76 : vector<2x96xf32>
      %78 = vector.extract_strided_slice %72 {offsets = [0, 0], sizes = [2, 32], strides = [1, 1]} : vector<2x96xf32> to vector<2x32xf32>
      %79 = vector.extract_strided_slice %77 {offsets = [0, 0], sizes = [2, 32], strides = [1, 1]} : vector<2x96xf32> to vector<2x32xf32>
      %80 = arith.addf %78, %79 : vector<2x32xf32>
      %81 = arith.negf %80 : vector<2x32xf32>
      %82 = math.exp %81 : vector<2x32xf32>
      %cst_71 = arith.constant 1.000000e+00 : f32
      %83 = vector.broadcast %cst_71 : f32 to vector<2x32xf32>
      %84 = arith.addf %83, %82 : vector<2x32xf32>
      %85 = arith.divf %83, %84 : vector<2x32xf32>
      %86 = vector.extract_strided_slice %72 {offsets = [0, 32], sizes = [2, 32], strides = [1, 1]} : vector<2x96xf32> to vector<2x32xf32>
      %87 = vector.extract_strided_slice %77 {offsets = [0, 32], sizes = [2, 32], strides = [1, 1]} : vector<2x96xf32> to vector<2x32xf32>
      %88 = arith.addf %86, %87 : vector<2x32xf32>
      %89 = arith.negf %88 : vector<2x32xf32>
      %90 = math.exp %89 : vector<2x32xf32>
      %cst_72 = arith.constant 1.000000e+00 : f32
      %91 = vector.broadcast %cst_72 : f32 to vector<2x32xf32>
      %92 = arith.addf %91, %90 : vector<2x32xf32>
      %93 = arith.divf %91, %92 : vector<2x32xf32>
      %94 = vector.extract_strided_slice %72 {offsets = [0, 64], sizes = [2, 32], strides = [1, 1]} : vector<2x96xf32> to vector<2x32xf32>
      %95 = vector.extract_strided_slice %77 {offsets = [0, 64], sizes = [2, 32], strides = [1, 1]} : vector<2x96xf32> to vector<2x32xf32>
      %96 = arith.mulf %85, %95 : vector<2x32xf32>
      %97 = arith.addf %94, %96 : vector<2x32xf32>
      %98 = math.tanh %97 : vector<2x32xf32>
      %cst_73 = arith.constant 1.000000e+00 : f32
      %99 = vector.broadcast %cst_73 : f32 to vector<2x32xf32>
      %100 = arith.subf %99, %93 : vector<2x32xf32>
      %101 = arith.mulf %100, %98 : vector<2x32xf32>
      %102 = arith.mulf %93, %64 : vector<2x32xf32>
      %103 = arith.addf %101, %102 : vector<2x32xf32>
      %c0_74 = arith.constant 0 : index
      %c0_75 = arith.constant 0 : index
      %104 = vector.load %arg48[%c0_74, %c0_75] : memref<2x32xf32, #tpu.memory_space<vmem>>, vector<2x32xf32>
      %c0_76 = arith.constant 0 : index
      %c0_77 = arith.constant 0 : index
      %105 = vector.load %arg14[%c0_76, %c0_77] : memref<1x96xf32, #tpu.memory_space<vmem>>, vector<1x96xf32>
      %c0_78 = arith.constant 0 : index
      %c0_79 = arith.constant 0 : index
      %106 = vector.load %arg12[%c0_78, %c0_79] : memref<64x96xf32, #tpu.memory_space<vmem>>, vector<32x96xf32>
      %cst_80 = arith.constant dense<0.000000e+00> : vector<2x96xf32>
      %107 = tpu.matmul %40, %106, %cst_80 {dimension_numbers = #tpu.dot_dimension_numbers<[1], [0], [0], [1], [0, 0, 1, 1], [], []>} : vector<2x32xf32>, vector<32x96xf32>, vector<2x96xf32> -> vector<2x96xf32>
      %108 = vector.broadcast %105 : vector<1x96xf32> to vector<2x96xf32>
      %109 = arith.addf %108, %107 : vector<2x96xf32>
      %c32_81 = arith.constant 32 : index
      %c0_82 = arith.constant 0 : index
      %110 = vector.load %arg12[%c32_81, %c0_82] : memref<64x96xf32, #tpu.memory_space<vmem>>, vector<32x96xf32>
      %cst_83 = arith.constant dense<0.000000e+00> : vector<2x96xf32>
      %111 = tpu.matmul %63, %110, %cst_83 {dimension_numbers = #tpu.dot_dimension_numbers<[1], [0], [0], [1], [0, 0, 1, 1], [], []>} : vector<2x32xf32>, vector<32x96xf32>, vector<2x96xf32> -> vector<2x96xf32>
      %112 = arith.addf %109, %111 : vector<2x96xf32>
      %c0_84 = arith.constant 0 : index
      %c0_85 = arith.constant 0 : index
      %113 = vector.load %arg13[%c0_84, %c0_85] : memref<32x96xf32, #tpu.memory_space<vmem>>, vector<32x96xf32>
      %cst_86 = arith.constant dense<0.000000e+00> : vector<2x96xf32>
      %114 = tpu.matmul %104, %113, %cst_86 {dimension_numbers = #tpu.dot_dimension_numbers<[1], [0], [0], [1], [0, 0, 1, 1], [], []>} : vector<2x32xf32>, vector<32x96xf32>, vector<2x96xf32> -> vector<2x96xf32>
      %c0_87 = arith.constant 0 : index
      %c0_88 = arith.constant 0 : index
      %115 = vector.load %arg15[%c0_87, %c0_88] : memref<1x96xf32, #tpu.memory_space<vmem>>, vector<1x96xf32>
      %116 = vector.broadcast %115 : vector<1x96xf32> to vector<2x96xf32>
      %117 = arith.addf %114, %116 : vector<2x96xf32>
      %118 = vector.extract_strided_slice %112 {offsets = [0, 0], sizes = [2, 32], strides = [1, 1]} : vector<2x96xf32> to vector<2x32xf32>
      %119 = vector.extract_strided_slice %117 {offsets = [0, 0], sizes = [2, 32], strides = [1, 1]} : vector<2x96xf32> to vector<2x32xf32>
      %120 = arith.addf %118, %119 : vector<2x32xf32>
      %121 = arith.negf %120 : vector<2x32xf32>
      %122 = math.exp %121 : vector<2x32xf32>
      %cst_89 = arith.constant 1.000000e+00 : f32
      %123 = vector.broadcast %cst_89 : f32 to vector<2x32xf32>
      %124 = arith.addf %123, %122 : vector<2x32xf32>
      %125 = arith.divf %123, %124 : vector<2x32xf32>
      %126 = vector.extract_strided_slice %112 {offsets = [0, 32], sizes = [2, 32], strides = [1, 1]} : vector<2x96xf32> to vector<2x32xf32>
      %127 = vector.extract_strided_slice %117 {offsets = [0, 32], sizes = [2, 32], strides = [1, 1]} : vector<2x96xf32> to vector<2x32xf32>
      %128 = arith.addf %126, %127 : vector<2x32xf32>
      %129 = arith.negf %128 : vector<2x32xf32>
      %130 = math.exp %129 : vector<2x32xf32>
      %cst_90 = arith.constant 1.000000e+00 : f32
      %131 = vector.broadcast %cst_90 : f32 to vector<2x32xf32>
      %132 = arith.addf %131, %130 : vector<2x32xf32>
      %133 = arith.divf %131, %132 : vector<2x32xf32>
      %134 = vector.extract_strided_slice %112 {offsets = [0, 64], sizes = [2, 32], strides = [1, 1]} : vector<2x96xf32> to vector<2x32xf32>
      %135 = vector.extract_strided_slice %117 {offsets = [0, 64], sizes = [2, 32], strides = [1, 1]} : vector<2x96xf32> to vector<2x32xf32>
      %136 = arith.mulf %125, %135 : vector<2x32xf32>
      %137 = arith.addf %134, %136 : vector<2x32xf32>
      %138 = math.tanh %137 : vector<2x32xf32>
      %cst_91 = arith.constant 1.000000e+00 : f32
      %139 = vector.broadcast %cst_91 : f32 to vector<2x32xf32>
      %140 = arith.subf %139, %133 : vector<2x32xf32>
      %141 = arith.mulf %140, %138 : vector<2x32xf32>
      %142 = arith.mulf %133, %104 : vector<2x32xf32>
      %143 = arith.addf %141, %142 : vector<2x32xf32>
      %144 = tpu.iota {dimensions = array<i32: 0>} : vector<8x1x1xi32>
      %145 = vector.broadcast %18 : i32 to vector<8x1x1xi32>
      %146 = arith.cmpi slt, %144, %145 : vector<8x1x1xi32>
      %147 = arith.extui %146 : vector<8x1x1xi1> to vector<8x1x1xi32>
      %148 = arith.sitofp %147 : vector<8x1x1xi32> to vector<8x1x1xf32>
      %c0_92 = arith.constant 0 : index
      %c0_93 = arith.constant 0 : index
      %c0_94 = arith.constant 0 : index
      %149 = vector.load %arg45[%c0_92, %c0_93, %c0_94] : memref<8x2x32xf32, #tpu.memory_space<vmem>>, vector<8x2x32xf32>
      %150 = vector.shape_cast %149 : vector<8x2x32xf32> to vector<16x32xf32>
      %c0_95 = arith.constant 0 : index
      %c0_96 = arith.constant 0 : index
      %151 = vector.load %arg32[%c0_95, %c0_96] : memref<32x2xf32, #tpu.memory_space<vmem>>, vector<32x2xf32>
      %cst_97 = arith.constant dense<0.000000e+00> : vector<16x2xf32>
      %152 = tpu.matmul %150, %151, %cst_97 {dimension_numbers = #tpu.dot_dimension_numbers<[1], [0], [0], [1], [0, 0, 1, 1], [], []>} : vector<16x32xf32>, vector<32x2xf32>, vector<16x2xf32> -> vector<16x2xf32>
      %153 = vector.shape_cast %152 : vector<16x2xf32> to vector<8x2x2xf32>
      %cst_98 = arith.constant -1.000000e+30 : f32
      %154 = vector.shape_cast %146 : vector<8x1x1xi1> to vector<8x1x1xi1>
      %155 = vector.broadcast %154 : vector<8x1x1xi1> to vector<8x2x2xi1>
      %156 = vector.broadcast %cst_98 : f32 to vector<8x2x2xf32>
      %157 = arith.select %155, %153, %156 : vector<8x2x2xi1>, vector<8x2x2xf32>
      %cst_99 = arith.constant dense<0xFF800000> : vector<2x2xf32>
      %158 = vector.multi_reduction <maximumf>, %157, %cst_99 [0] : vector<8x2x2xf32> to vector<2x2xf32>
      %159 = vector.shape_cast %158 : vector<2x2xf32> to vector<1x2x2xf32>
      %160 = vector.broadcast %159 : vector<1x2x2xf32> to vector<8x2x2xf32>
      %161 = arith.subf %157, %160 : vector<8x2x2xf32>
      %162 = math.exp %161 : vector<8x2x2xf32>
      %163 = vector.broadcast %148 : vector<8x1x1xf32> to vector<8x2x2xf32>
      %164 = arith.mulf %162, %163 : vector<8x2x2xf32>
      %cst_100 = arith.constant dense<0.000000e+00> : vector<2x2xf32>
      %165 = vector.multi_reduction <add>, %164, %cst_100 [0] : vector<8x2x2xf32> to vector<2x2xf32>
      %166 = vector.shape_cast %165 : vector<2x2xf32> to vector<1x2x2xf32>
      %cst_101 = arith.constant 0.000000e+00 : f32
      %167 = vector.broadcast %cst_101 : f32 to vector<1x2x2xf32>
      %168 = arith.cmpf ogt, %166, %167 : vector<1x2x2xf32>
      %cst_102 = arith.constant 1.000000e+00 : f32
      %169 = vector.broadcast %cst_102 : f32 to vector<1x2x2xf32>
      %170 = arith.select %168, %166, %169 : vector<1x2x2xi1>, vector<1x2x2xf32>
      %171 = tpu.reciprocal %170 {approx = true} : vector<1x2x2xf32> -> vector<1x2x2xf32>
      %172 = vector.broadcast %171 : vector<1x2x2xf32> to vector<8x2x2xf32>
      %173 = arith.mulf %164, %172 : vector<8x2x2xf32>
      %174 = vector.extract_strided_slice %173 {offsets = [0, 0, 0], sizes = [8, 2, 1], strides = [1, 1, 1]} : vector<8x2x2xf32> to vector<8x2x1xf32>
      %175 = vector.broadcast %174 : vector<8x2x1xf32> to vector<8x2x32xf32>
      %176 = arith.mulf %175, %149 : vector<8x2x32xf32>
      %cst_103 = arith.constant dense<0.000000e+00> : vector<2x32xf32>
      %177 = vector.multi_reduction <add>, %176, %cst_103 [0] : vector<8x2x32xf32> to vector<2x32xf32>
      %178 = vector.extract_strided_slice %173 {offsets = [0, 0, 1], sizes = [8, 2, 1], strides = [1, 1, 1]} : vector<8x2x2xf32> to vector<8x2x1xf32>
      %179 = vector.broadcast %178 : vector<8x2x1xf32> to vector<8x2x32xf32>
      %180 = arith.mulf %179, %149 : vector<8x2x32xf32>
      %cst_104 = arith.constant dense<0.000000e+00> : vector<2x32xf32>
      %181 = vector.multi_reduction <add>, %180, %cst_104 [0] : vector<8x2x32xf32> to vector<2x32xf32>
      %182 = vector.extract_strided_slice %173 {offsets = [0, 0, 0], sizes = [8, 2, 1], strides = [1, 1, 1]} : vector<8x2x2xf32> to vector<8x2x1xf32>
      %183 = vector.shape_cast %182 : vector<8x2x1xf32> to vector<8x2xf32>
      %184 = vector.extract_strided_slice %173 {offsets = [0, 0, 1], sizes = [8, 2, 1], strides = [1, 1, 1]} : vector<8x2x2xf32> to vector<8x2x1xf32>
      %185 = vector.shape_cast %184 : vector<8x2x1xf32> to vector<8x2xf32>
      %186 = arith.addf %183, %185 : vector<8x2xf32>
      %c0_105 = arith.constant 0 : index
      %c0_106 = arith.constant 0 : index
      %c0_107 = arith.constant 0 : index
      %187 = vector.load %arg46[%c0_105, %c0_106, %c0_107] : memref<8x2x32xf32, #tpu.memory_space<vmem>>, vector<8x2x32xf32>
      %188 = vector.shape_cast %187 : vector<8x2x32xf32> to vector<16x32xf32>
      %c0_108 = arith.constant 0 : index
      %c0_109 = arith.constant 0 : index
      %189 = vector.load %arg33[%c0_108, %c0_109] : memref<32x2xf32, #tpu.memory_space<vmem>>, vector<32x2xf32>
      %cst_110 = arith.constant dense<0.000000e+00> : vector<16x2xf32>
      %190 = tpu.matmul %188, %189, %cst_110 {dimension_numbers = #tpu.dot_dimension_numbers<[1], [0], [0], [1], [0, 0, 1, 1], [], []>} : vector<16x32xf32>, vector<32x2xf32>, vector<16x2xf32> -> vector<16x2xf32>
      %191 = vector.shape_cast %190 : vector<16x2xf32> to vector<8x2x2xf32>
      %cst_111 = arith.constant -1.000000e+30 : f32
      %192 = vector.shape_cast %146 : vector<8x1x1xi1> to vector<8x1x1xi1>
      %193 = vector.broadcast %192 : vector<8x1x1xi1> to vector<8x2x2xi1>
      %194 = vector.broadcast %cst_111 : f32 to vector<8x2x2xf32>
      %195 = arith.select %193, %191, %194 : vector<8x2x2xi1>, vector<8x2x2xf32>
      %cst_112 = arith.constant dense<0xFF800000> : vector<2x2xf32>
      %196 = vector.multi_reduction <maximumf>, %195, %cst_112 [0] : vector<8x2x2xf32> to vector<2x2xf32>
      %197 = vector.shape_cast %196 : vector<2x2xf32> to vector<1x2x2xf32>
      %198 = vector.broadcast %197 : vector<1x2x2xf32> to vector<8x2x2xf32>
      %199 = arith.subf %195, %198 : vector<8x2x2xf32>
      %200 = math.exp %199 : vector<8x2x2xf32>
      %201 = vector.broadcast %148 : vector<8x1x1xf32> to vector<8x2x2xf32>
      %202 = arith.mulf %200, %201 : vector<8x2x2xf32>
      %cst_113 = arith.constant dense<0.000000e+00> : vector<2x2xf32>
      %203 = vector.multi_reduction <add>, %202, %cst_113 [0] : vector<8x2x2xf32> to vector<2x2xf32>
      %204 = vector.shape_cast %203 : vector<2x2xf32> to vector<1x2x2xf32>
      %cst_114 = arith.constant 0.000000e+00 : f32
      %205 = vector.broadcast %cst_114 : f32 to vector<1x2x2xf32>
      %206 = arith.cmpf ogt, %204, %205 : vector<1x2x2xf32>
      %cst_115 = arith.constant 1.000000e+00 : f32
      %207 = vector.broadcast %cst_115 : f32 to vector<1x2x2xf32>
      %208 = arith.select %206, %204, %207 : vector<1x2x2xi1>, vector<1x2x2xf32>
      %209 = tpu.reciprocal %208 {approx = true} : vector<1x2x2xf32> -> vector<1x2x2xf32>
      %210 = vector.broadcast %209 : vector<1x2x2xf32> to vector<8x2x2xf32>
      %211 = arith.mulf %202, %210 : vector<8x2x2xf32>
      %212 = vector.extract_strided_slice %211 {offsets = [0, 0, 0], sizes = [8, 2, 1], strides = [1, 1, 1]} : vector<8x2x2xf32> to vector<8x2x1xf32>
      %213 = vector.broadcast %212 : vector<8x2x1xf32> to vector<8x2x32xf32>
      %214 = arith.mulf %213, %187 : vector<8x2x32xf32>
      %cst_116 = arith.constant dense<0.000000e+00> : vector<2x32xf32>
      %215 = vector.multi_reduction <add>, %214, %cst_116 [0] : vector<8x2x32xf32> to vector<2x32xf32>
      %216 = vector.extract_strided_slice %211 {offsets = [0, 0, 1], sizes = [8, 2, 1], strides = [1, 1, 1]} : vector<8x2x2xf32> to vector<8x2x1xf32>
      %217 = vector.broadcast %216 : vector<8x2x1xf32> to vector<8x2x32xf32>
      %218 = arith.mulf %217, %187 : vector<8x2x32xf32>
      %cst_117 = arith.constant dense<0.000000e+00> : vector<2x32xf32>
      %219 = vector.multi_reduction <add>, %218, %cst_117 [0] : vector<8x2x32xf32> to vector<2x32xf32>
      %220 = vector.extract_strided_slice %211 {offsets = [0, 0, 0], sizes = [8, 2, 1], strides = [1, 1, 1]} : vector<8x2x2xf32> to vector<8x2x1xf32>
      %221 = vector.shape_cast %220 : vector<8x2x1xf32> to vector<8x2xf32>
      %222 = vector.extract_strided_slice %211 {offsets = [0, 0, 1], sizes = [8, 2, 1], strides = [1, 1, 1]} : vector<8x2x2xf32> to vector<8x2x1xf32>
      %223 = vector.shape_cast %222 : vector<8x2x1xf32> to vector<8x2xf32>
      %224 = arith.addf %221, %223 : vector<8x2xf32>
      %225 = arith.addf %186, %224 : vector<8x2xf32>
      %c0_i32_118 = arith.constant 0 : i32
      %226 = arith.cmpi sgt, %18, %c0_i32_118 : i32
      %227 = arith.extui %226 : i1 to i32
      %228 = arith.sitofp %227 : i32 to f32
      %c0_119 = arith.constant 0 : index
      %c0_120 = arith.constant 0 : index
      %229 = vector.load %arg34[%c0_119, %c0_120] : memref<32x32xf32, #tpu.memory_space<vmem>>, vector<32x32xf32>
      %c0_121 = arith.constant 0 : index
      %c0_122 = arith.constant 0 : index
      %230 = vector.load %arg35[%c0_121, %c0_122] : memref<1x32xf32, #tpu.memory_space<vmem>>, vector<1x32xf32>
      %cst_123 = arith.constant dense<0.000000e+00> : vector<2x32xf32>
      %231 = tpu.matmul %177, %229, %cst_123 {dimension_numbers = #tpu.dot_dimension_numbers<[1], [0], [0], [1], [0, 0, 1, 1], [], []>} : vector<2x32xf32>, vector<32x32xf32>, vector<2x32xf32> -> vector<2x32xf32>
      %232 = vector.broadcast %230 : vector<1x32xf32> to vector<2x32xf32>
      %233 = arith.addf %231, %232 : vector<2x32xf32>
      %cst_124 = arith.constant dense<0.000000e+00> : vector<2x32xf32>
      %234 = tpu.matmul %215, %229, %cst_124 {dimension_numbers = #tpu.dot_dimension_numbers<[1], [0], [0], [1], [0, 0, 1, 1], [], []>} : vector<2x32xf32>, vector<32x32xf32>, vector<2x32xf32> -> vector<2x32xf32>
      %235 = vector.broadcast %230 : vector<1x32xf32> to vector<2x32xf32>
      %236 = arith.addf %234, %235 : vector<2x32xf32>
      %237 = arith.mulf %233, %177 : vector<2x32xf32>
      %cst_125 = arith.constant dense<0.000000e+00> : vector<2xf32>
      %238 = vector.multi_reduction <add>, %237, %cst_125 [1] : vector<2x32xf32> to vector<2xf32>
      %239 = vector.shape_cast %238 : vector<2xf32> to vector<2x1xf32>
      %240 = arith.mulf %233, %215 : vector<2x32xf32>
      %cst_126 = arith.constant dense<0.000000e+00> : vector<2xf32>
      %241 = vector.multi_reduction <add>, %240, %cst_126 [1] : vector<2x32xf32> to vector<2xf32>
      %242 = vector.shape_cast %241 : vector<2xf32> to vector<2x1xf32>
      %243 = arith.mulf %236, %177 : vector<2x32xf32>
      %cst_127 = arith.constant dense<0.000000e+00> : vector<2xf32>
      %244 = vector.multi_reduction <add>, %243, %cst_127 [1] : vector<2x32xf32> to vector<2xf32>
      %245 = vector.shape_cast %244 : vector<2xf32> to vector<2x1xf32>
      %246 = arith.mulf %236, %215 : vector<2x32xf32>
      %cst_128 = arith.constant dense<0.000000e+00> : vector<2xf32>
      %247 = vector.multi_reduction <add>, %246, %cst_128 [1] : vector<2x32xf32> to vector<2xf32>
      %248 = vector.shape_cast %247 : vector<2xf32> to vector<2x1xf32>
      %249 = arith.maximumf %239, %242 : vector<2x1xf32>
      %250 = arith.subf %239, %249 : vector<2x1xf32>
      %251 = math.exp %250 : vector<2x1xf32>
      %252 = arith.subf %242, %249 : vector<2x1xf32>
      %253 = math.exp %252 : vector<2x1xf32>
      %254 = arith.addf %251, %253 : vector<2x1xf32>
      %255 = tpu.reciprocal %254 {approx = true} : vector<2x1xf32> -> vector<2x1xf32>
      %256 = arith.mulf %251, %255 : vector<2x1xf32>
      %257 = arith.mulf %253, %255 : vector<2x1xf32>
      %258 = arith.maximumf %245, %248 : vector<2x1xf32>
      %259 = arith.subf %245, %258 : vector<2x1xf32>
      %260 = math.exp %259 : vector<2x1xf32>
      %261 = arith.subf %248, %258 : vector<2x1xf32>
      %262 = math.exp %261 : vector<2x1xf32>
      %263 = arith.addf %260, %262 : vector<2x1xf32>
      %264 = tpu.reciprocal %263 {approx = true} : vector<2x1xf32> -> vector<2x1xf32>
      %265 = arith.mulf %260, %264 : vector<2x1xf32>
      %266 = arith.mulf %262, %264 : vector<2x1xf32>
      %267 = vector.broadcast %256 : vector<2x1xf32> to vector<2x32xf32>
      %268 = arith.mulf %267, %177 : vector<2x32xf32>
      %269 = vector.broadcast %257 : vector<2x1xf32> to vector<2x32xf32>
      %270 = arith.mulf %269, %215 : vector<2x32xf32>
      %271 = arith.addf %268, %270 : vector<2x32xf32>
      %272 = vector.broadcast %265 : vector<2x1xf32> to vector<2x32xf32>
      %273 = arith.mulf %272, %177 : vector<2x32xf32>
      %274 = vector.broadcast %266 : vector<2x1xf32> to vector<2x32xf32>
      %275 = arith.mulf %274, %215 : vector<2x32xf32>
      %276 = arith.addf %273, %275 : vector<2x32xf32>
      %c0_129 = arith.constant 0 : index
      %c0_130 = arith.constant 0 : index
      %277 = vector.load %arg38[%c0_129, %c0_130] : memref<64x32xf32, #tpu.memory_space<vmem>>, vector<32x32xf32>
      %cst_131 = arith.constant dense<0.000000e+00> : vector<2x32xf32>
      %278 = tpu.matmul %271, %277, %cst_131 {dimension_numbers = #tpu.dot_dimension_numbers<[1], [0], [0], [1], [0, 0, 1, 1], [], []>} : vector<2x32xf32>, vector<32x32xf32>, vector<2x32xf32> -> vector<2x32xf32>
      %c32_132 = arith.constant 32 : index
      %c0_133 = arith.constant 0 : index
      %279 = vector.load %arg38[%c32_132, %c0_133] : memref<64x32xf32, #tpu.memory_space<vmem>>, vector<32x32xf32>
      %cst_134 = arith.constant dense<0.000000e+00> : vector<2x32xf32>
      %280 = tpu.matmul %276, %279, %cst_134 {dimension_numbers = #tpu.dot_dimension_numbers<[1], [0], [0], [1], [0, 0, 1, 1], [], []>} : vector<2x32xf32>, vector<32x32xf32>, vector<2x32xf32> -> vector<2x32xf32>
      %281 = arith.addf %278, %280 : vector<2x32xf32>
      %c0_135 = arith.constant 0 : index
      %c0_136 = arith.constant 0 : index
      %282 = vector.load %arg39[%c0_135, %c0_136] : memref<1x32xf32, #tpu.memory_space<vmem>>, vector<1x32xf32>
      %283 = vector.broadcast %282 : vector<1x32xf32> to vector<2x32xf32>
      %284 = arith.addf %281, %283 : vector<2x32xf32>
      %285 = vector.broadcast %228 : f32 to vector<2x32xf32>
      %286 = arith.mulf %285, %284 : vector<2x32xf32>
      %c0_137 = arith.constant 0 : index
      %c0_138 = arith.constant 0 : index
      %287 = vector.load %arg36[%c0_137, %c0_138] : memref<32x32xf32, #tpu.memory_space<vmem>>, vector<32x32xf32>
      %c0_139 = arith.constant 0 : index
      %c0_140 = arith.constant 0 : index
      %288 = vector.load %arg37[%c0_139, %c0_140] : memref<1x32xf32, #tpu.memory_space<vmem>>, vector<1x32xf32>
      %cst_141 = arith.constant dense<0.000000e+00> : vector<2x32xf32>
      %289 = tpu.matmul %219, %287, %cst_141 {dimension_numbers = #tpu.dot_dimension_numbers<[1], [0], [0], [1], [0, 0, 1, 1], [], []>} : vector<2x32xf32>, vector<32x32xf32>, vector<2x32xf32> -> vector<2x32xf32>
      %290 = vector.broadcast %288 : vector<1x32xf32> to vector<2x32xf32>
      %291 = arith.addf %289, %290 : vector<2x32xf32>
      %cst_142 = arith.constant dense<0.000000e+00> : vector<2x32xf32>
      %292 = tpu.matmul %181, %287, %cst_142 {dimension_numbers = #tpu.dot_dimension_numbers<[1], [0], [0], [1], [0, 0, 1, 1], [], []>} : vector<2x32xf32>, vector<32x32xf32>, vector<2x32xf32> -> vector<2x32xf32>
      %293 = vector.broadcast %288 : vector<1x32xf32> to vector<2x32xf32>
      %294 = arith.addf %292, %293 : vector<2x32xf32>
      %295 = arith.mulf %291, %219 : vector<2x32xf32>
      %cst_143 = arith.constant dense<0.000000e+00> : vector<2xf32>
      %296 = vector.multi_reduction <add>, %295, %cst_143 [1] : vector<2x32xf32> to vector<2xf32>
      %297 = vector.shape_cast %296 : vector<2xf32> to vector<2x1xf32>
      %298 = arith.mulf %291, %181 : vector<2x32xf32>
      %cst_144 = arith.constant dense<0.000000e+00> : vector<2xf32>
      %299 = vector.multi_reduction <add>, %298, %cst_144 [1] : vector<2x32xf32> to vector<2xf32>
      %300 = vector.shape_cast %299 : vector<2xf32> to vector<2x1xf32>
      %301 = arith.mulf %294, %219 : vector<2x32xf32>
      %cst_145 = arith.constant dense<0.000000e+00> : vector<2xf32>
      %302 = vector.multi_reduction <add>, %301, %cst_145 [1] : vector<2x32xf32> to vector<2xf32>
      %303 = vector.shape_cast %302 : vector<2xf32> to vector<2x1xf32>
      %304 = arith.mulf %294, %181 : vector<2x32xf32>
      %cst_146 = arith.constant dense<0.000000e+00> : vector<2xf32>
      %305 = vector.multi_reduction <add>, %304, %cst_146 [1] : vector<2x32xf32> to vector<2xf32>
      %306 = vector.shape_cast %305 : vector<2xf32> to vector<2x1xf32>
      %307 = arith.maximumf %297, %300 : vector<2x1xf32>
      %308 = arith.subf %297, %307 : vector<2x1xf32>
      %309 = math.exp %308 : vector<2x1xf32>
      %310 = arith.subf %300, %307 : vector<2x1xf32>
      %311 = math.exp %310 : vector<2x1xf32>
      %312 = arith.addf %309, %311 : vector<2x1xf32>
      %313 = tpu.reciprocal %312 {approx = true} : vector<2x1xf32> -> vector<2x1xf32>
      %314 = arith.mulf %309, %313 : vector<2x1xf32>
      %315 = arith.mulf %311, %313 : vector<2x1xf32>
      %316 = arith.maximumf %303, %306 : vector<2x1xf32>
      %317 = arith.subf %303, %316 : vector<2x1xf32>
      %318 = math.exp %317 : vector<2x1xf32>
      %319 = arith.subf %306, %316 : vector<2x1xf32>
      %320 = math.exp %319 : vector<2x1xf32>
      %321 = arith.addf %318, %320 : vector<2x1xf32>
      %322 = tpu.reciprocal %321 {approx = true} : vector<2x1xf32> -> vector<2x1xf32>
      %323 = arith.mulf %318, %322 : vector<2x1xf32>
      %324 = arith.mulf %320, %322 : vector<2x1xf32>
      %325 = vector.broadcast %314 : vector<2x1xf32> to vector<2x32xf32>
      %326 = arith.mulf %325, %219 : vector<2x32xf32>
      %327 = vector.broadcast %315 : vector<2x1xf32> to vector<2x32xf32>
      %328 = arith.mulf %327, %181 : vector<2x32xf32>
      %329 = arith.addf %326, %328 : vector<2x32xf32>
      %330 = vector.broadcast %323 : vector<2x1xf32> to vector<2x32xf32>
      %331 = arith.mulf %330, %219 : vector<2x32xf32>
      %332 = vector.broadcast %324 : vector<2x1xf32> to vector<2x32xf32>
      %333 = arith.mulf %332, %181 : vector<2x32xf32>
      %334 = arith.addf %331, %333 : vector<2x32xf32>
      %c0_147 = arith.constant 0 : index
      %c0_148 = arith.constant 0 : index
      %335 = vector.load %arg40[%c0_147, %c0_148] : memref<64x32xf32, #tpu.memory_space<vmem>>, vector<32x32xf32>
      %cst_149 = arith.constant dense<0.000000e+00> : vector<2x32xf32>
      %336 = tpu.matmul %329, %335, %cst_149 {dimension_numbers = #tpu.dot_dimension_numbers<[1], [0], [0], [1], [0, 0, 1, 1], [], []>} : vector<2x32xf32>, vector<32x32xf32>, vector<2x32xf32> -> vector<2x32xf32>
      %c32_150 = arith.constant 32 : index
      %c0_151 = arith.constant 0 : index
      %337 = vector.load %arg40[%c32_150, %c0_151] : memref<64x32xf32, #tpu.memory_space<vmem>>, vector<32x32xf32>
      %cst_152 = arith.constant dense<0.000000e+00> : vector<2x32xf32>
      %338 = tpu.matmul %334, %337, %cst_152 {dimension_numbers = #tpu.dot_dimension_numbers<[1], [0], [0], [1], [0, 0, 1, 1], [], []>} : vector<2x32xf32>, vector<32x32xf32>, vector<2x32xf32> -> vector<2x32xf32>
      %339 = arith.addf %336, %338 : vector<2x32xf32>
      %c0_153 = arith.constant 0 : index
      %c0_154 = arith.constant 0 : index
      %340 = vector.load %arg41[%c0_153, %c0_154] : memref<1x32xf32, #tpu.memory_space<vmem>>, vector<1x32xf32>
      %341 = vector.broadcast %340 : vector<1x32xf32> to vector<2x32xf32>
      %342 = arith.addf %339, %341 : vector<2x32xf32>
      %343 = vector.broadcast %228 : f32 to vector<2x32xf32>
      %344 = arith.mulf %343, %342 : vector<2x32xf32>
      %345 = tpu.concatenate %35, %35 in 0 : vector<2x32xf32>, vector<2x32xf32> -> vector<4x32xf32>
      %346 = tpu.concatenate %286, %286 in 0 : vector<2x32xf32>, vector<2x32xf32> -> vector<4x32xf32>
      %c0_155 = arith.constant 0 : index
      %c0_156 = arith.constant 0 : index
      %c0_157 = arith.constant 0 : index
      %347 = vector.load %arg49[%c0_155, %c0_156, %c0_157] : memref<2x2x32xf32, #tpu.memory_space<vmem>>, vector<2x2x32xf32>
      %348 = vector.shape_cast %347 : vector<2x2x32xf32> to vector<4x32xf32>
      %c0_158 = arith.constant 0 : index
      %c0_159 = arith.constant 0 : index
      %349 = vector.load %arg18[%c0_158, %c0_159] : memref<1x96xf32, #tpu.memory_space<vmem>>, vector<1x96xf32>
      %c0_160 = arith.constant 0 : index
      %c0_161 = arith.constant 0 : index
      %350 = vector.load %arg16[%c0_160, %c0_161] : memref<64x96xf32, #tpu.memory_space<vmem>>, vector<32x96xf32>
      %cst_162 = arith.constant dense<0.000000e+00> : vector<4x96xf32>
      %351 = tpu.matmul %345, %350, %cst_162 {dimension_numbers = #tpu.dot_dimension_numbers<[1], [0], [0], [1], [0, 0, 1, 1], [], []>} : vector<4x32xf32>, vector<32x96xf32>, vector<4x96xf32> -> vector<4x96xf32>
      %352 = vector.broadcast %349 : vector<1x96xf32> to vector<4x96xf32>
      %353 = arith.addf %352, %351 : vector<4x96xf32>
      %c32_163 = arith.constant 32 : index
      %c0_164 = arith.constant 0 : index
      %354 = vector.load %arg16[%c32_163, %c0_164] : memref<64x96xf32, #tpu.memory_space<vmem>>, vector<32x96xf32>
      %cst_165 = arith.constant dense<0.000000e+00> : vector<4x96xf32>
      %355 = tpu.matmul %346, %354, %cst_165 {dimension_numbers = #tpu.dot_dimension_numbers<[1], [0], [0], [1], [0, 0, 1, 1], [], []>} : vector<4x32xf32>, vector<32x96xf32>, vector<4x96xf32> -> vector<4x96xf32>
      %356 = arith.addf %353, %355 : vector<4x96xf32>
      %c0_166 = arith.constant 0 : index
      %c0_167 = arith.constant 0 : index
      %357 = vector.load %arg17[%c0_166, %c0_167] : memref<32x96xf32, #tpu.memory_space<vmem>>, vector<32x96xf32>
      %cst_168 = arith.constant dense<0.000000e+00> : vector<4x96xf32>
      %358 = tpu.matmul %348, %357, %cst_168 {dimension_numbers = #tpu.dot_dimension_numbers<[1], [0], [0], [1], [0, 0, 1, 1], [], []>} : vector<4x32xf32>, vector<32x96xf32>, vector<4x96xf32> -> vector<4x96xf32>
      %c0_169 = arith.constant 0 : index
      %c0_170 = arith.constant 0 : index
      %359 = vector.load %arg19[%c0_169, %c0_170] : memref<1x96xf32, #tpu.memory_space<vmem>>, vector<1x96xf32>
      %360 = vector.broadcast %359 : vector<1x96xf32> to vector<4x96xf32>
      %361 = arith.addf %358, %360 : vector<4x96xf32>
      %362 = vector.extract_strided_slice %356 {offsets = [0, 0], sizes = [4, 32], strides = [1, 1]} : vector<4x96xf32> to vector<4x32xf32>
      %363 = vector.extract_strided_slice %361 {offsets = [0, 0], sizes = [4, 32], strides = [1, 1]} : vector<4x96xf32> to vector<4x32xf32>
      %364 = arith.addf %362, %363 : vector<4x32xf32>
      %365 = arith.negf %364 : vector<4x32xf32>
      %366 = math.exp %365 : vector<4x32xf32>
      %cst_171 = arith.constant 1.000000e+00 : f32
      %367 = vector.broadcast %cst_171 : f32 to vector<4x32xf32>
      %368 = arith.addf %367, %366 : vector<4x32xf32>
      %369 = arith.divf %367, %368 : vector<4x32xf32>
      %370 = vector.extract_strided_slice %356 {offsets = [0, 32], sizes = [4, 32], strides = [1, 1]} : vector<4x96xf32> to vector<4x32xf32>
      %371 = vector.extract_strided_slice %361 {offsets = [0, 32], sizes = [4, 32], strides = [1, 1]} : vector<4x96xf32> to vector<4x32xf32>
      %372 = arith.addf %370, %371 : vector<4x32xf32>
      %373 = arith.negf %372 : vector<4x32xf32>
      %374 = math.exp %373 : vector<4x32xf32>
      %cst_172 = arith.constant 1.000000e+00 : f32
      %375 = vector.broadcast %cst_172 : f32 to vector<4x32xf32>
      %376 = arith.addf %375, %374 : vector<4x32xf32>
      %377 = arith.divf %375, %376 : vector<4x32xf32>
      %378 = vector.extract_strided_slice %356 {offsets = [0, 64], sizes = [4, 32], strides = [1, 1]} : vector<4x96xf32> to vector<4x32xf32>
      %379 = vector.extract_strided_slice %361 {offsets = [0, 64], sizes = [4, 32], strides = [1, 1]} : vector<4x96xf32> to vector<4x32xf32>
      %380 = arith.mulf %369, %379 : vector<4x32xf32>
      %381 = arith.addf %378, %380 : vector<4x32xf32>
      %382 = math.tanh %381 : vector<4x32xf32>
      %cst_173 = arith.constant 1.000000e+00 : f32
      %383 = vector.broadcast %cst_173 : f32 to vector<4x32xf32>
      %384 = arith.subf %383, %377 : vector<4x32xf32>
      %385 = arith.mulf %384, %382 : vector<4x32xf32>
      %386 = arith.mulf %377, %348 : vector<4x32xf32>
      %387 = arith.addf %385, %386 : vector<4x32xf32>
      %388 = vector.shape_cast %387 : vector<4x32xf32> to vector<2x2x32xf32>
      %389 = vector.shape_cast %27 : vector<2x2xf32> to vector<2x2x1xf32>
      %cst_174 = arith.constant 1.000000e+00 : f32
      %390 = vector.broadcast %cst_174 : f32 to vector<2x2x1xf32>
      %391 = arith.subf %390, %389 : vector<2x2x1xf32>
      %392 = vector.broadcast %391 : vector<2x2x1xf32> to vector<2x2x32xf32>
      %393 = arith.mulf %347, %392 : vector<2x2x32xf32>
      %394 = vector.broadcast %389 : vector<2x2x1xf32> to vector<2x2x32xf32>
      %395 = arith.mulf %388, %394 : vector<2x2x32xf32>
      %396 = arith.addf %393, %395 : vector<2x2x32xf32>
      %397 = vector.shape_cast %53 : vector<2x2xf32> to vector<2x2x1xf32>
      %398 = vector.broadcast %397 : vector<2x2x1xf32> to vector<2x2x32xf32>
      %399 = arith.mulf %398, %396 : vector<2x2x32xf32>
      %cst_175 = arith.constant dense<0.000000e+00> : vector<2x32xf32>
      %400 = vector.multi_reduction <add>, %399, %cst_175 [0] : vector<2x2x32xf32> to vector<2x32xf32>
      %c0_176 = arith.constant 0 : index
      %c0_177 = arith.constant 0 : index
      %401 = vector.load %arg51[%c0_176, %c0_177] : memref<2x32xf32, #tpu.memory_space<vmem>>, vector<2x32xf32>
      %c0_178 = arith.constant 0 : index
      %c0_179 = arith.constant 0 : index
      %402 = vector.load %arg26[%c0_178, %c0_179] : memref<1x96xf32, #tpu.memory_space<vmem>>, vector<1x96xf32>
      %c0_180 = arith.constant 0 : index
      %c0_181 = arith.constant 0 : index
      %403 = vector.load %arg24[%c0_180, %c0_181] : memref<32x96xf32, #tpu.memory_space<vmem>>, vector<32x96xf32>
      %cst_182 = arith.constant dense<0.000000e+00> : vector<2x96xf32>
      %404 = tpu.matmul %400, %403, %cst_182 {dimension_numbers = #tpu.dot_dimension_numbers<[1], [0], [0], [1], [0, 0, 1, 1], [], []>} : vector<2x32xf32>, vector<32x96xf32>, vector<2x96xf32> -> vector<2x96xf32>
      %405 = vector.broadcast %402 : vector<1x96xf32> to vector<2x96xf32>
      %406 = arith.addf %405, %404 : vector<2x96xf32>
      %c0_183 = arith.constant 0 : index
      %c0_184 = arith.constant 0 : index
      %407 = vector.load %arg25[%c0_183, %c0_184] : memref<32x96xf32, #tpu.memory_space<vmem>>, vector<32x96xf32>
      %cst_185 = arith.constant dense<0.000000e+00> : vector<2x96xf32>
      %408 = tpu.matmul %401, %407, %cst_185 {dimension_numbers = #tpu.dot_dimension_numbers<[1], [0], [0], [1], [0, 0, 1, 1], [], []>} : vector<2x32xf32>, vector<32x96xf32>, vector<2x96xf32> -> vector<2x96xf32>
      %c0_186 = arith.constant 0 : index
      %c0_187 = arith.constant 0 : index
      %409 = vector.load %arg27[%c0_186, %c0_187] : memref<1x96xf32, #tpu.memory_space<vmem>>, vector<1x96xf32>
      %410 = vector.broadcast %409 : vector<1x96xf32> to vector<2x96xf32>
      %411 = arith.addf %408, %410 : vector<2x96xf32>
      %412 = vector.extract_strided_slice %406 {offsets = [0, 0], sizes = [2, 32], strides = [1, 1]} : vector<2x96xf32> to vector<2x32xf32>
      %413 = vector.extract_strided_slice %411 {offsets = [0, 0], sizes = [2, 32], strides = [1, 1]} : vector<2x96xf32> to vector<2x32xf32>
      %414 = arith.addf %412, %413 : vector<2x32xf32>
      %415 = arith.negf %414 : vector<2x32xf32>
      %416 = math.exp %415 : vector<2x32xf32>
      %cst_188 = arith.constant 1.000000e+00 : f32
      %417 = vector.broadcast %cst_188 : f32 to vector<2x32xf32>
      %418 = arith.addf %417, %416 : vector<2x32xf32>
      %419 = arith.divf %417, %418 : vector<2x32xf32>
      %420 = vector.extract_strided_slice %406 {offsets = [0, 32], sizes = [2, 32], strides = [1, 1]} : vector<2x96xf32> to vector<2x32xf32>
      %421 = vector.extract_strided_slice %411 {offsets = [0, 32], sizes = [2, 32], strides = [1, 1]} : vector<2x96xf32> to vector<2x32xf32>
      %422 = arith.addf %420, %421 : vector<2x32xf32>
      %423 = arith.negf %422 : vector<2x32xf32>
      %424 = math.exp %423 : vector<2x32xf32>
      %cst_189 = arith.constant 1.000000e+00 : f32
      %425 = vector.broadcast %cst_189 : f32 to vector<2x32xf32>
      %426 = arith.addf %425, %424 : vector<2x32xf32>
      %427 = arith.divf %425, %426 : vector<2x32xf32>
      %428 = vector.extract_strided_slice %406 {offsets = [0, 64], sizes = [2, 32], strides = [1, 1]} : vector<2x96xf32> to vector<2x32xf32>
      %429 = vector.extract_strided_slice %411 {offsets = [0, 64], sizes = [2, 32], strides = [1, 1]} : vector<2x96xf32> to vector<2x32xf32>
      %430 = arith.mulf %419, %429 : vector<2x32xf32>
      %431 = arith.addf %428, %430 : vector<2x32xf32>
      %432 = math.tanh %431 : vector<2x32xf32>
      %cst_190 = arith.constant 1.000000e+00 : f32
      %433 = vector.broadcast %cst_190 : f32 to vector<2x32xf32>
      %434 = arith.subf %433, %427 : vector<2x32xf32>
      %435 = arith.mulf %434, %432 : vector<2x32xf32>
      %436 = arith.mulf %427, %401 : vector<2x32xf32>
      %437 = arith.addf %435, %436 : vector<2x32xf32>
      %c0_191 = arith.constant 0 : index
      %c0_192 = arith.constant 0 : index
      %c0_193 = arith.constant 0 : index
      %438 = vector.load %arg49[%c0_191, %c0_192, %c0_193] : memref<2x2x32xf32, #tpu.memory_space<vmem>>, vector<2x2x32xf32>
      tpu.vector_store %arg49[%c0_191, %c0_192, %c0_193], %396 {strides = array<i32>} : memref<2x2x32xf32, #tpu.memory_space<vmem>>, vector<2x2x32xf32>,
      %c0_194 = arith.constant 0 : index
      %c0_195 = arith.constant 0 : index
      %439 = vector.load %arg51[%c0_194, %c0_195] : memref<2x32xf32, #tpu.memory_space<vmem>>, vector<2x32xf32>
      tpu.vector_store %arg51[%c0_194, %c0_195], %437 {strides = array<i32>} : memref<2x32xf32, #tpu.memory_space<vmem>>, vector<2x32xf32>,
      %440 = tpu.concatenate %40, %40 in 0 : vector<2x32xf32>, vector<2x32xf32> -> vector<4x32xf32>
      %441 = tpu.concatenate %344, %344 in 0 : vector<2x32xf32>, vector<2x32xf32> -> vector<4x32xf32>
      %c0_196 = arith.constant 0 : index
      %c0_197 = arith.constant 0 : index
      %c0_198 = arith.constant 0 : index
      %442 = vector.load %arg50[%c0_196, %c0_197, %c0_198] : memref<2x2x32xf32, #tpu.memory_space<vmem>>, vector<2x2x32xf32>
      %443 = vector.shape_cast %442 : vector<2x2x32xf32> to vector<4x32xf32>
      %c0_199 = arith.constant 0 : index
      %c0_200 = arith.constant 0 : index
      %444 = vector.load %arg22[%c0_199, %c0_200] : memref<1x96xf32, #tpu.memory_space<vmem>>, vector<1x96xf32>
      %c0_201 = arith.constant 0 : index
      %c0_202 = arith.constant 0 : index
      %445 = vector.load %arg20[%c0_201, %c0_202] : memref<64x96xf32, #tpu.memory_space<vmem>>, vector<32x96xf32>
      %cst_203 = arith.constant dense<0.000000e+00> : vector<4x96xf32>
      %446 = tpu.matmul %440, %445, %cst_203 {dimension_numbers = #tpu.dot_dimension_numbers<[1], [0], [0], [1], [0, 0, 1, 1], [], []>} : vector<4x32xf32>, vector<32x96xf32>, vector<4x96xf32> -> vector<4x96xf32>
      %447 = vector.broadcast %444 : vector<1x96xf32> to vector<4x96xf32>
      %448 = arith.addf %447, %446 : vector<4x96xf32>
      %c32_204 = arith.constant 32 : index
      %c0_205 = arith.constant 0 : index
      %449 = vector.load %arg20[%c32_204, %c0_205] : memref<64x96xf32, #tpu.memory_space<vmem>>, vector<32x96xf32>
      %cst_206 = arith.constant dense<0.000000e+00> : vector<4x96xf32>
      %450 = tpu.matmul %441, %449, %cst_206 {dimension_numbers = #tpu.dot_dimension_numbers<[1], [0], [0], [1], [0, 0, 1, 1], [], []>} : vector<4x32xf32>, vector<32x96xf32>, vector<4x96xf32> -> vector<4x96xf32>
      %451 = arith.addf %448, %450 : vector<4x96xf32>
      %c0_207 = arith.constant 0 : index
      %c0_208 = arith.constant 0 : index
      %452 = vector.load %arg21[%c0_207, %c0_208] : memref<32x96xf32, #tpu.memory_space<vmem>>, vector<32x96xf32>
      %cst_209 = arith.constant dense<0.000000e+00> : vector<4x96xf32>
      %453 = tpu.matmul %443, %452, %cst_209 {dimension_numbers = #tpu.dot_dimension_numbers<[1], [0], [0], [1], [0, 0, 1, 1], [], []>} : vector<4x32xf32>, vector<32x96xf32>, vector<4x96xf32> -> vector<4x96xf32>
      %c0_210 = arith.constant 0 : index
      %c0_211 = arith.constant 0 : index
      %454 = vector.load %arg23[%c0_210, %c0_211] : memref<1x96xf32, #tpu.memory_space<vmem>>, vector<1x96xf32>
      %455 = vector.broadcast %454 : vector<1x96xf32> to vector<4x96xf32>
      %456 = arith.addf %453, %455 : vector<4x96xf32>
      %457 = vector.extract_strided_slice %451 {offsets = [0, 0], sizes = [4, 32], strides = [1, 1]} : vector<4x96xf32> to vector<4x32xf32>
      %458 = vector.extract_strided_slice %456 {offsets = [0, 0], sizes = [4, 32], strides = [1, 1]} : vector<4x96xf32> to vector<4x32xf32>
      %459 = arith.addf %457, %458 : vector<4x32xf32>
      %460 = arith.negf %459 : vector<4x32xf32>
      %461 = math.exp %460 : vector<4x32xf32>
      %cst_212 = arith.constant 1.000000e+00 : f32
      %462 = vector.broadcast %cst_212 : f32 to vector<4x32xf32>
      %463 = arith.addf %462, %461 : vector<4x32xf32>
      %464 = arith.divf %462, %463 : vector<4x32xf32>
      %465 = vector.extract_strided_slice %451 {offsets = [0, 32], sizes = [4, 32], strides = [1, 1]} : vector<4x96xf32> to vector<4x32xf32>
      %466 = vector.extract_strided_slice %456 {offsets = [0, 32], sizes = [4, 32], strides = [1, 1]} : vector<4x96xf32> to vector<4x32xf32>
      %467 = arith.addf %465, %466 : vector<4x32xf32>
      %468 = arith.negf %467 : vector<4x32xf32>
      %469 = math.exp %468 : vector<4x32xf32>
      %cst_213 = arith.constant 1.000000e+00 : f32
      %470 = vector.broadcast %cst_213 : f32 to vector<4x32xf32>
      %471 = arith.addf %470, %469 : vector<4x32xf32>
      %472 = arith.divf %470, %471 : vector<4x32xf32>
      %473 = vector.extract_strided_slice %451 {offsets = [0, 64], sizes = [4, 32], strides = [1, 1]} : vector<4x96xf32> to vector<4x32xf32>
      %474 = vector.extract_strided_slice %456 {offsets = [0, 64], sizes = [4, 32], strides = [1, 1]} : vector<4x96xf32> to vector<4x32xf32>
      %475 = arith.mulf %464, %474 : vector<4x32xf32>
      %476 = arith.addf %473, %475 : vector<4x32xf32>
      %477 = math.tanh %476 : vector<4x32xf32>
      %cst_214 = arith.constant 1.000000e+00 : f32
      %478 = vector.broadcast %cst_214 : f32 to vector<4x32xf32>
      %479 = arith.subf %478, %472 : vector<4x32xf32>
      %480 = arith.mulf %479, %477 : vector<4x32xf32>
      %481 = arith.mulf %472, %443 : vector<4x32xf32>
      %482 = arith.addf %480, %481 : vector<4x32xf32>
      %483 = vector.shape_cast %482 : vector<4x32xf32> to vector<2x2x32xf32>
      %484 = vector.shape_cast %27 : vector<2x2xf32> to vector<2x2x1xf32>
      %cst_215 = arith.constant 1.000000e+00 : f32
      %485 = vector.broadcast %cst_215 : f32 to vector<2x2x1xf32>
      %486 = arith.subf %485, %484 : vector<2x2x1xf32>
      %487 = vector.broadcast %486 : vector<2x2x1xf32> to vector<2x2x32xf32>
      %488 = arith.mulf %442, %487 : vector<2x2x32xf32>
      %489 = vector.broadcast %484 : vector<2x2x1xf32> to vector<2x2x32xf32>
      %490 = arith.mulf %483, %489 : vector<2x2x32xf32>
      %491 = arith.addf %488, %490 : vector<2x2x32xf32>
      %492 = vector.shape_cast %53 : vector<2x2xf32> to vector<2x2x1xf32>
      %493 = vector.broadcast %492 : vector<2x2x1xf32> to vector<2x2x32xf32>
      %494 = arith.mulf %493, %491 : vector<2x2x32xf32>
      %cst_216 = arith.constant dense<0.000000e+00> : vector<2x32xf32>
      %495 = vector.multi_reduction <add>, %494, %cst_216 [0] : vector<2x2x32xf32> to vector<2x32xf32>
      %c0_217 = arith.constant 0 : index
      %c0_218 = arith.constant 0 : index
      %496 = vector.load %arg52[%c0_217, %c0_218] : memref<2x32xf32, #tpu.memory_space<vmem>>, vector<2x32xf32>
      %c0_219 = arith.constant 0 : index
      %c0_220 = arith.constant 0 : index
      %497 = vector.load %arg30[%c0_219, %c0_220] : memref<1x96xf32, #tpu.memory_space<vmem>>, vector<1x96xf32>
      %c0_221 = arith.constant 0 : index
      %c0_222 = arith.constant 0 : index
      %498 = vector.load %arg28[%c0_221, %c0_222] : memref<32x96xf32, #tpu.memory_space<vmem>>, vector<32x96xf32>
      %cst_223 = arith.constant dense<0.000000e+00> : vector<2x96xf32>
      %499 = tpu.matmul %495, %498, %cst_223 {dimension_numbers = #tpu.dot_dimension_numbers<[1], [0], [0], [1], [0, 0, 1, 1], [], []>} : vector<2x32xf32>, vector<32x96xf32>, vector<2x96xf32> -> vector<2x96xf32>
      %500 = vector.broadcast %497 : vector<1x96xf32> to vector<2x96xf32>
      %501 = arith.addf %500, %499 : vector<2x96xf32>
      %c0_224 = arith.constant 0 : index
      %c0_225 = arith.constant 0 : index
      %502 = vector.load %arg29[%c0_224, %c0_225] : memref<32x96xf32, #tpu.memory_space<vmem>>, vector<32x96xf32>
      %cst_226 = arith.constant dense<0.000000e+00> : vector<2x96xf32>
      %503 = tpu.matmul %496, %502, %cst_226 {dimension_numbers = #tpu.dot_dimension_numbers<[1], [0], [0], [1], [0, 0, 1, 1], [], []>} : vector<2x32xf32>, vector<32x96xf32>, vector<2x96xf32> -> vector<2x96xf32>
      %c0_227 = arith.constant 0 : index
      %c0_228 = arith.constant 0 : index
      %504 = vector.load %arg31[%c0_227, %c0_228] : memref<1x96xf32, #tpu.memory_space<vmem>>, vector<1x96xf32>
      %505 = vector.broadcast %504 : vector<1x96xf32> to vector<2x96xf32>
      %506 = arith.addf %503, %505 : vector<2x96xf32>
      %507 = vector.extract_strided_slice %501 {offsets = [0, 0], sizes = [2, 32], strides = [1, 1]} : vector<2x96xf32> to vector<2x32xf32>
      %508 = vector.extract_strided_slice %506 {offsets = [0, 0], sizes = [2, 32], strides = [1, 1]} : vector<2x96xf32> to vector<2x32xf32>
      %509 = arith.addf %507, %508 : vector<2x32xf32>
      %510 = arith.negf %509 : vector<2x32xf32>
      %511 = math.exp %510 : vector<2x32xf32>
      %cst_229 = arith.constant 1.000000e+00 : f32
      %512 = vector.broadcast %cst_229 : f32 to vector<2x32xf32>
      %513 = arith.addf %512, %511 : vector<2x32xf32>
      %514 = arith.divf %512, %513 : vector<2x32xf32>
      %515 = vector.extract_strided_slice %501 {offsets = [0, 32], sizes = [2, 32], strides = [1, 1]} : vector<2x96xf32> to vector<2x32xf32>
      %516 = vector.extract_strided_slice %506 {offsets = [0, 32], sizes = [2, 32], strides = [1, 1]} : vector<2x96xf32> to vector<2x32xf32>
      %517 = arith.addf %515, %516 : vector<2x32xf32>
      %518 = arith.negf %517 : vector<2x32xf32>
      %519 = math.exp %518 : vector<2x32xf32>
      %cst_230 = arith.constant 1.000000e+00 : f32
      %520 = vector.broadcast %cst_230 : f32 to vector<2x32xf32>
      %521 = arith.addf %520, %519 : vector<2x32xf32>
      %522 = arith.divf %520, %521 : vector<2x32xf32>
      %523 = vector.extract_strided_slice %501 {offsets = [0, 64], sizes = [2, 32], strides = [1, 1]} : vector<2x96xf32> to vector<2x32xf32>
      %524 = vector.extract_strided_slice %506 {offsets = [0, 64], sizes = [2, 32], strides = [1, 1]} : vector<2x96xf32> to vector<2x32xf32>
      %525 = arith.mulf %514, %524 : vector<2x32xf32>
      %526 = arith.addf %523, %525 : vector<2x32xf32>
      %527 = math.tanh %526 : vector<2x32xf32>
      %cst_231 = arith.constant 1.000000e+00 : f32
      %528 = vector.broadcast %cst_231 : f32 to vector<2x32xf32>
      %529 = arith.subf %528, %522 : vector<2x32xf32>
      %530 = arith.mulf %529, %527 : vector<2x32xf32>
      %531 = arith.mulf %522, %496 : vector<2x32xf32>
      %532 = arith.addf %530, %531 : vector<2x32xf32>
      %c0_232 = arith.constant 0 : index
      %c0_233 = arith.constant 0 : index
      %c0_234 = arith.constant 0 : index
      %533 = vector.load %arg50[%c0_232, %c0_233, %c0_234] : memref<2x2x32xf32, #tpu.memory_space<vmem>>, vector<2x2x32xf32>
      tpu.vector_store %arg50[%c0_232, %c0_233, %c0_234], %491 {strides = array<i32>} : memref<2x2x32xf32, #tpu.memory_space<vmem>>, vector<2x2x32xf32>,
      %c0_235 = arith.constant 0 : index
      %c0_236 = arith.constant 0 : index
      %534 = vector.load %arg52[%c0_235, %c0_236] : memref<2x32xf32, #tpu.memory_space<vmem>>, vector<2x32xf32>
      tpu.vector_store %arg52[%c0_235, %c0_236], %532 {strides = array<i32>} : memref<2x32xf32, #tpu.memory_space<vmem>>, vector<2x32xf32>,
      %535 = vector.broadcast %30 : vector<1x32xf32> to vector<2x32xf32>
      %536 = arith.addf %103, %535 : vector<2x32xf32>
      %537 = arith.index_cast %18 : i32 to index
      %c0_237 = arith.constant 0 : index
      %c0_238 = arith.constant 0 : index
      %538 = vector.load %arg45[%537, %c0_237, %c0_238] : memref<8x2x32xf32, #tpu.memory_space<vmem>>, vector<1x2x32xf32>
      %539 = vector.shape_cast %538 : vector<1x2x32xf32> to vector<2x32xf32>
      %540 = vector.shape_cast %536 : vector<2x32xf32> to vector<1x2x32xf32>
      tpu.vector_store %arg45[%537, %c0_237, %c0_238], %540 {strides = array<i32>} : memref<8x2x32xf32, #tpu.memory_space<vmem>>, vector<1x2x32xf32>,
      %541 = vector.broadcast %30 : vector<1x32xf32> to vector<2x32xf32>
      %542 = arith.addf %143, %541 : vector<2x32xf32>
      %543 = arith.index_cast %18 : i32 to index
      %c0_239 = arith.constant 0 : index
      %c0_240 = arith.constant 0 : index
      %544 = vector.load %arg46[%543, %c0_239, %c0_240] : memref<8x2x32xf32, #tpu.memory_space<vmem>>, vector<1x2x32xf32>
      %545 = vector.shape_cast %544 : vector<1x2x32xf32> to vector<2x32xf32>
      %546 = vector.shape_cast %542 : vector<2x32xf32> to vector<1x2x32xf32>
      tpu.vector_store %arg46[%543, %c0_239, %c0_240], %546 {strides = array<i32>} : memref<8x2x32xf32, #tpu.memory_space<vmem>>, vector<1x2x32xf32>,
      %c0_241 = arith.constant 0 : index
      %c0_242 = arith.constant 0 : index
      %547 = vector.load %arg47[%c0_241, %c0_242] : memref<2x32xf32, #tpu.memory_space<vmem>>, vector<2x32xf32>
      tpu.vector_store %arg47[%c0_241, %c0_242], %103 {strides = array<i32>} : memref<2x32xf32, #tpu.memory_space<vmem>>, vector<2x32xf32>,
      %c0_243 = arith.constant 0 : index
      %c0_244 = arith.constant 0 : index
      %548 = vector.load %arg48[%c0_243, %c0_244] : memref<2x32xf32, #tpu.memory_space<vmem>>, vector<2x32xf32>
      tpu.vector_store %arg48[%c0_243, %c0_244], %143 {strides = array<i32>} : memref<2x32xf32, #tpu.memory_space<vmem>>, vector<2x32xf32>,
      %549 = arith.index_cast %18 : i32 to index
      %c0_245 = arith.constant 0 : index
      %c0_246 = arith.constant 0 : index
      %550 = vector.load %arg42[%549, %c0_245, %c0_246] : memref<8x2x32xf32, #tpu.memory_space<vmem>>, vector<1x2x32xf32>
      %551 = vector.shape_cast %550 : vector<1x2x32xf32> to vector<2x32xf32>
      %552 = vector.shape_cast %437 : vector<2x32xf32> to vector<1x2x32xf32>
      tpu.vector_store %arg42[%549, %c0_245, %c0_246], %552 {strides = array<i32>} : memref<8x2x32xf32, #tpu.memory_space<vmem>>, vector<1x2x32xf32>,
      %553 = arith.index_cast %18 : i32 to index
      %c0_247 = arith.constant 0 : index
      %c0_248 = arith.constant 0 : index
      %554 = vector.load %arg43[%553, %c0_247, %c0_248] : memref<8x2x32xf32, #tpu.memory_space<vmem>>, vector<1x2x32xf32>
      %555 = vector.shape_cast %554 : vector<1x2x32xf32> to vector<2x32xf32>
      %556 = vector.shape_cast %532 : vector<2x32xf32> to vector<1x2x32xf32>
      tpu.vector_store %arg43[%553, %c0_247, %c0_248], %556 {strides = array<i32>} : memref<8x2x32xf32, #tpu.memory_space<vmem>>, vector<1x2x32xf32>,
      %557 = arith.index_cast %18 : i32 to index
      %c0_249 = arith.constant 0 : index
      %c0_250 = arith.constant 0 : index
      %558 = vector.load %arg44[%557, %c0_249, %c0_250] : memref<8x8x2xf32, #tpu.memory_space<vmem>>, vector<1x8x2xf32>
      %559 = vector.shape_cast %558 : vector<1x8x2xf32> to vector<8x2xf32>
      %560 = vector.shape_cast %225 : vector<8x2xf32> to vector<1x8x2xf32>
      tpu.vector_store %arg44[%557, %c0_249, %c0_250], %560 {strides = array<i32>} : memref<8x8x2xf32, #tpu.memory_space<vmem>>, vector<1x8x2xf32>,
    }
    %c8_i32_26 = arith.constant 8 : i32
    return
  }
}

</mosaic_0001>

<bundles_post_ra>
// kernel: tpu_custom_call.1
= control target key start
LH: loop header
LB: loop body
LE: loop exit
PB: predicated region body
PF: predicated region fallthrough
CT: control target
= control target key end

     0   :  { %s6096_s6 = smov 1   ;;  %s6097_s10 = smov 2   ;;  %s7550_s0 = inlined_call_operand.smem [shape: u32[45], index: -1, kind: input, shape index: {}] }
   0x1   :  { %s6194_s5 = sld [smem:[%s7550_s0]]   ;;  %s6098_s14 = smov 3  }
   0x2   :  { %s6199_s9 = sld [smem:[%s7550_s0 + %s6096_s6]]   ;;  %s6099_s18 = smov 4  }
   0x3   :  { %s6204_s13 = sld [smem:[%s7550_s0 + %s6097_s10]]   ;;  %s6100_s22 = smov 5  }
   0x4   :  { %s6209_s17 = sld [smem:[%s7550_s0 + %s6098_s14]]   ;;  %s6101_s26 = smov 6  }
   0x5   :  { %s6214_s21 = sld [smem:[%s7550_s0 + %s6099_s18]]   ;;  %s6102_s30 = smov 7  }
   0x6   :  { %s6219_s25 = sld [smem:[%s7550_s0 + %s6100_s22]]   ;;  %s6103_s4 = smov 8  }
   0x7   :  { %s6224_s29 = sld [smem:[%s7550_s0 + %s6101_s26]]   ;;  %s6104_s10 = smov 9  }
   0x8   :  { %s6229_s3 = sld [smem:[%s7550_s0 + %s6102_s30]]   ;;  %s6105_s15 = smov 10  }
   0x9   :  { %7585 = sst [smem:[#allocation70_spill]] %s6204_s13  ;;  %s6106_s20 = smov 11  }
   0xa   :  { %s6234_s8 = sld [smem:[%s7550_s0 + %s6103_s4]]   ;;  %s6107_s26 = smov 12  }
   0xb   :  { %s6239_s14 = sld [smem:[%s7550_s0 + %s6104_s10]]   ;;  %s6108_s1 = smov 13  }
   0xc   :  { %7586 = sst [smem:[#allocation71_spill]] %s6219_s25  ;;  %s6109_s7 = smov 14  }
   0xd   :  { %s6244_s19 = sld [smem:[%s7550_s0 + %s6105_s15]]   ;;  %s6110_s15 = smov 15  }
   0xe   :  { %7587 = sst [smem:[#allocation72_spill]] %s6229_s3  ;;  %s6111_s22 = smov 16  }
   0xf   :  { %s6249_s24 = sld [smem:[%s7550_s0 + %s6106_s20]]   ;;  %s6112_s28 = smov 17  }
  0x10   :  { %7588 = sst [smem:[#allocation73_spill]] %s6234_s8 }
  0x11   :  { %7589 = sst [smem:[#allocation74_spill]] %s6239_s14 }
  0x12   :  { %s6254_s30 = sld [smem:[%s7550_s0 + %s6107_s26]]  }
  0x13   :  { %s6259_s6 = sld [smem:[%s7550_s0 + %s6108_s1]]  }
  0x14   :  { %s6264_s12 = sld [smem:[%s7550_s0 + %s6109_s7]]   ;;  %s6113_s7 = smov 18  }
  0x15   :  { %7590 = sst [smem:[#allocation75_spill]] %s6249_s24 }
  0x16   :  { %s6269_s20 = sld [smem:[%s7550_s0 + %s6110_s15]]   ;;  %s6114_s15 = smov 19  }
  0x17   :  { %s6274_s27 = sld [smem:[%s7550_s0 + %s6111_s22]]   ;;  %s6115_s22 = smov 20  }
  0x18   :  { %7591 = sst [smem:[#allocation76_spill]] %s6254_s30 }
  0x19   :  { %7592 = sst [smem:[#allocation77_spill]] %s6259_s6 }
  0x1a   :  { %s6279_s4 = sld [smem:[%s7550_s0 + %s6112_s28]]   ;;  %s6116_s28 = smov 21  }
  0x1b   :  { %s6284_s6 = sld [smem:[%s7550_s0 + %s6113_s7]]   ;;  %s6117_s7 = smov 22  }
  0x1c   :  { %7593 = sst [smem:[#allocation78_spill]] %s6269_s20 }
  0x1d   :  { %7594 = sst [smem:[#allocation79_spill]] %s6274_s27 }
  0x1e   :  { %s6289_s30 = sld [smem:[%s7550_s0 + %s6114_s15]]   ;;  %s6118_s15 = smov 23  }
  0x1f   :  { %s6294_s27 = sld [smem:[%s7550_s0 + %s6115_s22]]   ;;  %s6119_s22 = smov 24  }
  0x20   :  { %s6299_s8 = sld [smem:[%s7550_s0 + %s6116_s28]]   ;;  %s6120_s28 = smov 25  }
  0x21   :  { %7595 = sst [smem:[#allocation80_spill]] %s6284_s6 }
  0x22   :  { %s6304_s13 = sld [smem:[%s7550_s0 + %s6117_s7]]   ;;  %s6121_s7 = smov 26  }
  0x23   :  { %s6309_s14 = sld [smem:[%s7550_s0 + %s6118_s15]]   ;;  %s6122_s15 = smov 27  }
  0x24   :  { %s6329_s6 = sld [smem:[%s7550_s0 + %s6122_s15]]   ;;  %s6126_s15 = smov 31  }
  0x25   :  { %7596 = sst [smem:[#allocation81_spill]] %s6294_s27 }
  0x26   :  { %7597 = sst [smem:[#allocation82_spill]] %s6299_s8 }
  0x27   :  { %s6314_s27 = sld [smem:[%s7550_s0 + %s6119_s22]]   ;;  %s6123_s22 = smov 28  }
  0x28   :  { %7598 = sst [smem:[#allocation83_spill]] %s6304_s13 }
  0x29   :  { %s6319_s8 = sld [smem:[%s7550_s0 + %s6120_s28]]   ;;  %s6124_s28 = smov 29  }
  0x2a   :  { %s6324_s13 = sld [smem:[%s7550_s0 + %s6121_s7]]   ;;  %s6125_s7 = smov 30  }
  0x2b   :  { %s6339_s20 = sld [smem:[%s7550_s0 + %s6124_s28]]   ;;  %s6128_s28 = smov 33  }
  0x2c   :  { %s6349_s24 = sld [smem:[%s7550_s0 + %s6126_s15]]   ;;  %s6130_s15 = smov 35  }
  0x2d   :  { %7599 = sst [smem:[#allocation84_spill]] %s6314_s27 }
  0x2e   :  { %s6334_s27 = sld [smem:[%s7550_s0 + %s6123_s22]]   ;;  %s6127_s22 = smov 32  }
  0x30   :  { %7600 = sst [smem:[#allocation85_spill]] %s6324_s13 }
  0x31   :  { %7602 = sst [smem:[#allocation87_spill]] %s6339_s20 }
  0x32   :  { %s6344_s13 = sld [smem:[%s7550_s0 + %s6125_s7]]   ;;  %s6129_s7 = smov 34  }
  0x33   :  { %7603 = sst [smem:[#allocation88_spill]] %s6349_s24 }
  0x34   :  { %7601 = sst [smem:[#allocation86_spill]] %s6334_s27 }
  0x35   :  { %s6354_s27 = sld [smem:[%s7550_s0 + %s6127_s22]]   ;;  %s6131_s22 = smov 36  }
  0x36   :  { %s6359_s20 = sld [smem:[%s7550_s0 + %s6128_s28]]   ;;  %s6132_s28 = smov 37  }
  0x37   :  { %s6364_s3 = sld [smem:[%s7550_s0 + %s6129_s7]]   ;;  %s6133_s7 = smov 38  }
  0x38   :  { %s6369_s24 = sld [smem:[%s7550_s0 + %s6130_s15]]   ;;  %s6134_s15 = smov 39  }
  0x39   :  { %s6384_s25 = sld [smem:[%s7550_s0 + %s6133_s7]]   ;;  %s6137_s7 = smov 42  }
  0x3b   :  { %7604 = sst [smem:[#allocation89_spill]] %s6354_s27 }
  0x3c   :  { %7605 = sst [smem:[#allocation90_spill]] %s6359_s20 }
  0x3d   :  { %s6374_s27 = sld [smem:[%s7550_s0 + %s6131_s22]]   ;;  %s6135_s22 = smov 40  }
  0x3e   :  { %7606 = sst [smem:[#allocation91_spill]] %s6369_s24 }
  0x3f   :  { %s6379_s20 = sld [smem:[%s7550_s0 + %s6132_s28]]   ;;  %s6136_s28 = smov 41  }
  0x40   :  { %7609 = sst [smem:[#allocation94_spill]] %s6384_s25 }
  0x41   :  { %s6389_s24 = sld [smem:[%s7550_s0 + %s6134_s15]]   ;;  %s6138_s15 = smov 43  }
  0x42   :  { %s6404_s25 = sld [smem:[%s7550_s0 + %s6137_s7]]  }
  0x43   :  { %7607 = sst [smem:[#allocation92_spill]] %s6374_s27 }
  0x44   :  { %s6394_s27 = sld [smem:[%s7550_s0 + %s6135_s22]]   ;;  %s6139_s22 = smov 44  }
  0x45   :  { %7608 = sst [smem:[#allocation93_spill]] %s6379_s20 }
  0x46   :  { %s6399_s20 = sld [smem:[%s7550_s0 + %s6136_s28]]  }
  0x47   :  { %7610 = sst [smem:[#allocation95_spill]] %s6389_s24 }
  0x48   :  { %s6409_s24 = sld [smem:[%s7550_s0 + %s6138_s15]]  }
  0x4a   :  { %7611 = sst [smem:[#allocation96_spill]] %s6394_s27 }
  0x4b   :  { %s6414_s27 = sld [smem:[%s7550_s0 + %s6139_s22]]  }
  0x4c   :  { %95 = vsyncpa [#allocation11], 0 }
  0x4d   :  { %96 = vsyncpa [#allocation14], 0 }
  0x4e   :  { %97 = vsyncpa [#allocation17], 0 }
  0x4f   :  { %98 = vsyncpa [#allocation20], 0 }
  0x50   :  { %99 = vsyncpa [#allocation23], 0 }
  0x51   :  { %100 = vsyncpa [#allocation26], 0 }
  0x52   :  { %101 = vsyncpa [#allocation29], 0 }
  0x53   :  { %102 = vsyncpa [#allocation32], 0 }
  0x54   :  { %103 = vsyncpa [#allocation35], 0 }
  0x55   :  { %104 = vsyncpa [#allocation38], 0 }
  0x56   :  { %105 = vsyncpa [#allocation41], 0 }
  0x57   :  { %106 = vsyncpa [#allocation44], 0 }
  0x58   :  { %107 = vsyncpa [#allocation47], 0 }
  0x59   :  { %108 = vsyncpa [#allocation50], 0 }
  0x5a   :  { %109 = vsyncpa [#allocation12], 0 }
  0x5b   :  { %110 = vsyncpa [#allocation53], 0  ;;  %s6140_s0 = smov [#allocation13]   ;;  %s6141_s1 = smov [#allocation16]  }
  0x5c   :  { %s128_s28 = sshll.u32 %s6140_s0, 4  ;;  %s154_s2 = sshll.u32 %s6141_s1, 4  ;;  %s129_s28 = int_to_ptr.vmem [resolvable:$true] %s128_s28  ;;  %s6416_s2 = int_to_ptr.vmem [resolvable:$true] %s154_s2 }
  0x5d   :  { %s5440_s7 = scalar_lea.hbm %s6199_s9, 256 }
  0x5e   :  { %p5441_p0 = scmp.ne.s32.totalorder %s6199_s9, %s5440_s7  ;;  %p5444_p1 = scmp.lt.u32.totalorder %s5440_s7, %s6199_s9 }
  0x60   :  { %p5446_p2 = pnand %p5444_p1, %p5441_p0 }
  0x62   :  { %5449 = shalt.err (!%p5446_p2)
}
  0x63   :  { %s5450_s10 = scalar_lea.vmem %s129_s28, 256  ;;  %p5455_p4 = scmp.lt.s32.totalorder %s129_s28, %s129_s28 }
  0x64   :  { %p5451_p3 = scmp.ne.s32.totalorder %s129_s28, %s5450_s10  ;;  %p5456_p5 = scmp.lt.s32.totalorder %s5450_s10, %s5450_s10 }
  0x66   :  { %p5457_p6 = por %p5456_p5, %p5455_p4 }
  0x68   :  { %p5458_p7 = pnand %p5457_p6, %p5451_p3 }
  0x6a   :  { %5461 = shalt.err (!%p5458_p7)
}
  0x6b   :  { %s6142_s11 = smov 32   ;;  %s6143_s15 = smov 2  }
  0x6c   :  { %134 = dma.hbm_to_vmem [thread:$0]  %s6199_s9, 256, %s129_s28, [#allocation14], %s6142_s11, %s6142_s11, %s6143_s15  }
  0x6d   :  { %s5462_s16 = scalar_lea.hbm %s6214_s21, 384 }
  0x6e   :  { %p5463_p8 = scmp.ne.s32.totalorder %s6214_s21, %s5462_s16  ;;  %p5466_p9 = scmp.lt.u32.totalorder %s5462_s16, %s6214_s21 }
  0x70   :  { %p5468_p10 = pnand %p5466_p9, %p5463_p8 }
  0x72   :  { %5471 = shalt.err (!%p5468_p10)
}
  0x73   :  { %s5472_s18 = scalar_lea.vmem %s6416_s2, 384  ;;  %p5477_p12 = scmp.lt.s32.totalorder %s6416_s2, %s6416_s2 }
  0x74   :  { %p5473_p11 = scmp.ne.s32.totalorder %s6416_s2, %s5472_s18  ;;  %p5478_p13 = scmp.lt.s32.totalorder %s5472_s18, %s5472_s18 }
  0x76   :  { %p5479_p0 = por %p5478_p13, %p5477_p12 }
  0x78   :  { %p5480_p1 = pnand %p5479_p0, %p5473_p11 }
  0x7a   :  { %5483 = shalt.err (!%p5480_p1)
}
  0x7b   :  { %s6144_s22 = smov 128   ;;  %s6145_s9 = smov 8  }
  0x7c   :  { %160 = dma.hbm_to_vmem [thread:$0]  %s6214_s21, 384, %s6416_s2, [#allocation17], %s6144_s22, %s6144_s22, %s6145_s9  }
  0x7d   :  { %s6146_s23 = smov [#allocation19]   ;;  %s6147_s0 = smov [#allocation22]  }
  0x7e   :  { %s176_s26 = sshll.u32 %s6146_s23, 4  ;;  %s203_s28 = sshll.u32 %s6147_s0, 4  ;;  %s177_s26 = int_to_ptr.vmem [resolvable:$true] %s176_s26  ;;  %s204_s28 = int_to_ptr.vmem [resolvable:$true] %s203_s28 }
  0x7f   :  { %s5484_s1 = scalar_lea.hbm %s6224_s29, 384 }
  0x80   :  { %p5485_p2 = scmp.ne.s32.totalorder %s6224_s29, %s5484_s1  ;;  %p5488_p3 = scmp.lt.u32.totalorder %s5484_s1, %s6224_s29 }
  0x82   :  { %p5490_p4 = pnand %p5488_p3, %p5485_p2 }
  0x84   :  { %5493 = shalt.err (!%p5490_p4)
}
  0x85   :  { %s5494_s7 = scalar_lea.vmem %s177_s26, 384  ;;  %p5499_p6 = scmp.lt.s32.totalorder %s177_s26, %s177_s26 }
  0x86   :  { %p5495_p5 = scmp.ne.s32.totalorder %s177_s26, %s5494_s7  ;;  %p5500_p7 = scmp.lt.s32.totalorder %s5494_s7, %s5494_s7 }
  0x88   :  { %p5501_p8 = por %p5500_p7, %p5499_p6 }
  0x8a   :  { %p5502_p9 = pnand %p5501_p8, %p5495_p5 }
  0x8c   :  { %5505 = shalt.err (!%p5502_p9)
}
  0x8d   :  { %182 = dma.hbm_to_vmem [thread:$0]  %s6224_s29, 384, %s177_s26, [#allocation20], %s6144_s22, %s6144_s22, %s6145_s9  }
  0x8e   :  { %s5506_s21 = scalar_lea.hbm %s6244_s19, 16 }
  0x8f   :  { %p5507_p10 = scmp.ne.s32.totalorder %s6244_s19, %s5506_s21  ;;  %p5510_p11 = scmp.lt.u32.totalorder %s5506_s21, %s6244_s19 }
  0x91   :  { %p5512_p12 = pnand %p5510_p11, %p5507_p10 }
  0x93   :  { %5515 = shalt.err (!%p5512_p12)
}
  0x94   :  { %s5516_s2 = scalar_lea.vmem %s204_s28, 16  ;;  %s5520_s10 = scalar_lea.vmem %s204_s28, 32 }
  0x95   :  { %p5517_p13 = scmp.ne.s32.totalorder %s204_s28, %s5516_s2  ;;  %p5521_p0 = scmp.lt.s32.totalorder %s204_s28, %s204_s28 }
  0x96   :  { %p5522_p1 = scmp.lt.s32.totalorder %s5520_s10, %s5516_s2 }
  0x98   :  { %p5523_p2 = por %p5522_p1, %p5521_p0 }
  0x9a   :  { %p5524_p3 = pnand %p5523_p2, %p5517_p13 }
  0x9c   :  { %5527 = shalt.err (!%p5524_p3)
}
  0x9d   :  { %206 = dma.hbm_to_vmem [thread:$0]  %s6244_s19, 16, %s204_s28, [#allocation23]  }
  0x9e   :  { %s6148_s16 = smov [#allocation25]   ;;  %s6149_s18 = smov [#allocation28]  }
  0x9f   :  { %s227_s29 = sshll.u32 %s6148_s16, 4  ;;  %s248_s23 = sshll.u32 %s6149_s18, 4  ;;  %s228_s29 = int_to_ptr.vmem [resolvable:$true] %s227_s29  ;;  %s6448_s23 = int_to_ptr.vmem [resolvable:$true] %s248_s23 }
  0xa0   :  { %s5528_s26 = scalar_lea.hbm %s6264_s12, 16 }
  0xa1   :  { %p5529_p4 = scmp.ne.s32.totalorder %s6264_s12, %s5528_s26  ;;  %p5532_p5 = scmp.lt.u32.totalorder %s5528_s26, %s6264_s12 }
  0xa3   :  { %p5534_p6 = pnand %p5532_p5, %p5529_p4 }
  0xa5   :  { %5537 = shalt.err (!%p5534_p6)
}
  0xa6   :  { %s5538_s0 = scalar_lea.vmem %s228_s29, 16  ;;  %s5542_s1 = scalar_lea.vmem %s228_s29, 32 }
  0xa7   :  { %p5539_p7 = scmp.ne.s32.totalorder %s228_s29, %s5538_s0  ;;  %p5543_p8 = scmp.lt.s32.totalorder %s228_s29, %s228_s29 }
  0xa8   :  { %p5544_p9 = scmp.lt.s32.totalorder %s5542_s1, %s5538_s0 }
  0xaa   :  { %p5545_p10 = por %p5544_p9, %p5543_p8 }
  0xac   :  { %p5546_p11 = pnand %p5545_p10, %p5539_p7 }
  0xae   :  { %5549 = shalt.err (!%p5546_p11)
}
  0xaf   :  { %230 = dma.hbm_to_vmem [thread:$0]  %s6264_s12, 16, %s228_s29, [#allocation26]  }
  0xb0   :  { %s5550_s19 = scalar_lea.hbm %s6279_s4, 512 }
  0xb1   :  { %p5551_p12 = scmp.ne.s32.totalorder %s6279_s4, %s5550_s19  ;;  %p5554_p13 = scmp.lt.u32.totalorder %s5550_s19, %s6279_s4 }
  0xb3   :  { %p5556_p0 = pnand %p5554_p13, %p5551_p12 }
  0xb5   :  { %5559 = shalt.err (!%p5556_p0)
}
  0xb6   :  { %s5560_s28 = scalar_lea.vmem %s6448_s23, 512  ;;  %p5565_p2 = scmp.lt.s32.totalorder %s6448_s23, %s6448_s23 }
  0xb7   :  { %p5561_p1 = scmp.ne.s32.totalorder %s6448_s23, %s5560_s28  ;;  %p5566_p3 = scmp.lt.s32.totalorder %s5560_s28, %s5560_s28 }
  0xb9   :  { %p5567_p4 = por %p5566_p3, %p5565_p2 }
  0xbb   :  { %p5568_p5 = pnand %p5567_p4, %p5561_p1 }
  0xbd   :  { %5571 = shalt.err (!%p5568_p5)
}
  0xbe   :  { %254 = dma.hbm_to_vmem [thread:$0]  %s6279_s4, 512, %s6448_s23, [#allocation29], %s6144_s22, %s6144_s22, %s6145_s9  }
  0xbf   :  { %s6150_s12 = smov [#allocation31]   ;;  %s6151_s21 = smov [#allocation34]  }
  0xc0   :  { %s271_s7 = sshll.u32 %s6150_s12, 4  ;;  %s295_s2 = sshll.u32 %s6151_s21, 4  ;;  %s272_s7 = int_to_ptr.vmem [resolvable:$true] %s271_s7  ;;  %s296_s2 = int_to_ptr.vmem [resolvable:$true] %s295_s2 }
  0xc1   :  { %s5572_s10 = scalar_lea.hbm %s6289_s30, 16 }
  0xc2   :  { %p5573_p6 = scmp.ne.s32.totalorder %s6289_s30, %s5572_s10  ;;  %p5576_p7 = scmp.lt.u32.totalorder %s5572_s10, %s6289_s30 }
  0xc4   :  { %p5578_p8 = pnand %p5576_p7, %p5573_p6 }
  0xc6   :  { %5581 = shalt.err (!%p5578_p8)
}
  0xc7   :  { %s5582_s16 = scalar_lea.vmem %s272_s7, 16  ;;  %s5586_s29 = scalar_lea.vmem %s272_s7, 32 }
  0xc8   :  { %p5583_p9 = scmp.ne.s32.totalorder %s272_s7, %s5582_s16  ;;  %p5587_p10 = scmp.lt.s32.totalorder %s272_s7, %s272_s7 }
  0xc9   :  { %p5588_p11 = scmp.lt.s32.totalorder %s5586_s29, %s5582_s16 }
  0xcb   :  { %p5589_p12 = por %p5588_p11, %p5587_p10 }
  0xcd   :  { %p5590_p13 = pnand %p5589_p12, %p5583_p9 }
  0xcf   :  { %5593 = shalt.err (!%p5590_p13)
}
  0xd0   :  { %274 = dma.hbm_to_vmem [thread:$0]  %s6289_s30, 16, %s272_s7, [#allocation32]  }
  0xd1   :  { %s5594_s4 = scalar_lea.hbm %s6309_s14, 16 }
  0xd2   :  { %p5595_p0 = scmp.ne.s32.totalorder %s6309_s14, %s5594_s4  ;;  %p5598_p1 = scmp.lt.u32.totalorder %s5594_s4, %s6309_s14 }
  0xd4   :  { %p5600_p2 = pnand %p5598_p1, %p5595_p0 }
  0xd6   :  { %5603 = shalt.err (!%p5600_p2)
}
  0xd7   :  { %s5604_s18 = scalar_lea.vmem %s296_s2, 16  ;;  %s5608_s23 = scalar_lea.vmem %s296_s2, 32 }
  0xd8   :  { %p5605_p3 = scmp.ne.s32.totalorder %s296_s2, %s5604_s18  ;;  %p5609_p4 = scmp.lt.s32.totalorder %s296_s2, %s296_s2 }
  0xd9   :  { %p5610_p5 = scmp.lt.s32.totalorder %s5608_s23, %s5604_s18 }
  0xdb   :  { %p5611_p6 = por %p5610_p5, %p5609_p4 }
  0xdd   :  { %p5612_p7 = pnand %p5611_p6, %p5605_p3 }
  0xdf   :  { %5615 = shalt.err (!%p5612_p7)
}
  0xe0   :  { %298 = dma.hbm_to_vmem [thread:$0]  %s6309_s14, 16, %s296_s2, [#allocation35]  }
  0xe1   :  { %s6152_s26 = smov [#allocation37]   ;;  %s6153_s0 = smov [#allocation40]  }
  0xe2   :  { %s316_s30 = sshll.u32 %s6152_s26, 4  ;;  %s339_s1 = sshll.u32 %s6153_s0, 4  ;;  %s317_s30 = int_to_ptr.vmem [resolvable:$true] %s316_s30  ;;  %s340_s1 = int_to_ptr.vmem [resolvable:$true] %s339_s1 }
  0xe3   :  { %s5616_s19 = scalar_lea.hbm %s6319_s8, 512 }
  0xe4   :  { %p5617_p8 = scmp.ne.s32.totalorder %s6319_s8, %s5616_s19  ;;  %p5620_p9 = scmp.lt.u32.totalorder %s5616_s19, %s6319_s8 }
  0xe6   :  { %p5622_p10 = pnand %p5620_p9, %p5617_p8 }
  0xe8   :  { %5625 = shalt.err (!%p5622_p10)
}
  0xe9   :  { %s5626_s28 = scalar_lea.vmem %s317_s30, 512  ;;  %p5631_p12 = scmp.lt.s32.totalorder %s317_s30, %s317_s30 }
  0xea   :  { %p5627_p11 = scmp.ne.s32.totalorder %s317_s30, %s5626_s28  ;;  %p5632_p13 = scmp.lt.s32.totalorder %s5626_s28, %s5626_s28 }
  0xec   :  { %p5633_p0 = por %p5632_p13, %p5631_p12 }
  0xee   :  { %p5634_p1 = pnand %p5633_p0, %p5627_p11 }
  0xf0   :  { %5637 = shalt.err (!%p5634_p1)
}
  0xf1   :  { %322 = dma.hbm_to_vmem [thread:$0]  %s6319_s8, 512, %s317_s30, [#allocation38], %s6144_s22, %s6144_s22, %s6145_s9  }
  0xf2   :  { %s5638_s14 = scalar_lea.hbm %s6329_s6, 16 }
  0xf3   :  { %p5639_p2 = scmp.ne.s32.totalorder %s6329_s6, %s5638_s14  ;;  %p5642_p3 = scmp.lt.u32.totalorder %s5638_s14, %s6329_s6 }
  0xf5   :  { %p5644_p4 = pnand %p5642_p3, %p5639_p2 }
  0xf7   :  { %5647 = shalt.err (!%p5644_p4)
}
  0xf8   :  { %s5648_s12 = scalar_lea.vmem %s340_s1, 16  ;;  %s5652_s7 = scalar_lea.vmem %s340_s1, 32 }
  0xf9   :  { %p5649_p5 = scmp.ne.s32.totalorder %s340_s1, %s5648_s12  ;;  %p5653_p6 = scmp.lt.s32.totalorder %s340_s1, %s340_s1 }
  0xfa   :  { %p5654_p7 = scmp.lt.s32.totalorder %s5652_s7, %s5648_s12 }
  0xfc   :  { %p5655_p8 = por %p5654_p7, %p5653_p6 }
  0xfe   :  { %p5656_p9 = pnand %p5655_p8, %p5649_p5 }
 0x100   :  { %5659 = shalt.err (!%p5656_p9)
}
 0x101   :  { %342 = dma.hbm_to_vmem [thread:$0]  %s6329_s6, 16, %s340_s1, [#allocation41]  }
 0x102   :  { %s6154_s21 = smov [#allocation43]   ;;  %s6155_s2 = smov [#allocation46]  }
 0x103   :  { %s363_s8 = sshll.u32 %s6154_s21, 4  ;;  %s386_s10 = sshll.u32 %s6155_s2, 4  ;;  %s364_s8 = int_to_ptr.vmem [resolvable:$true] %s363_s8  ;;  %s6485_s10 = int_to_ptr.vmem [resolvable:$true] %s386_s10 }
 0x104   :  { %s5660_s16 = scalar_lea.hbm %s6344_s13, 16 }
 0x105   :  { %p5661_p10 = scmp.ne.s32.totalorder %s6344_s13, %s5660_s16  ;;  %p5664_p11 = scmp.lt.u32.totalorder %s5660_s16, %s6344_s13 }
 0x107   :  { %p5666_p12 = pnand %p5664_p11, %p5661_p10 }
 0x109   :  { %5669 = shalt.err (!%p5666_p12)
}
 0x10a   :  { %s5670_s29 = scalar_lea.vmem %s364_s8, 16  ;;  %s5674_s4 = scalar_lea.vmem %s364_s8, 32 }
 0x10b   :  { %p5671_p13 = scmp.ne.s32.totalorder %s364_s8, %s5670_s29  ;;  %p5675_p0 = scmp.lt.s32.totalorder %s364_s8, %s364_s8 }
 0x10c   :  { %p5676_p1 = scmp.lt.s32.totalorder %s5674_s4, %s5670_s29 }
 0x10e   :  { %p5677_p2 = por %p5676_p1, %p5675_p0 }
 0x110   :  { %p5678_p3 = pnand %p5677_p2, %p5671_p13 }
 0x112   :  { %5681 = shalt.err (!%p5678_p3)
}
 0x113   :  { %366 = dma.hbm_to_vmem [thread:$0]  %s6344_s13, 16, %s364_s8, [#allocation44]  }
 0x114   :  { %s5682_s6 = scalar_lea.hbm %s6364_s3, 512 }
 0x115   :  { %p5683_p4 = scmp.ne.s32.totalorder %s6364_s3, %s5682_s6  ;;  %p5686_p5 = scmp.lt.u32.totalorder %s5682_s6, %s6364_s3 }
 0x117   :  { %p5688_p6 = pnand %p5686_p5, %p5683_p4 }
 0x119   :  { %5691 = shalt.err (!%p5688_p6)
}
 0x11a   :  { %s5692_s18 = scalar_lea.vmem %s6485_s10, 512  ;;  %p5697_p8 = scmp.lt.s32.totalorder %s6485_s10, %s6485_s10 }
 0x11b   :  { %p5693_p7 = scmp.ne.s32.totalorder %s6485_s10, %s5692_s18  ;;  %p5698_p9 = scmp.lt.s32.totalorder %s5692_s18, %s5692_s18 }
 0x11d   :  { %p5699_p10 = por %p5698_p9, %p5697_p8 }
 0x11f   :  { %p5700_p11 = pnand %p5699_p10, %p5693_p7 }
 0x121   :  { %5703 = shalt.err (!%p5700_p11)
}
 0x122   :  { %392 = dma.hbm_to_vmem [thread:$0]  %s6364_s3, 512, %s6485_s10, [#allocation47], %s6144_s22, %s6144_s22, %s6145_s9  }
 0x123   :  { %s6156_s13 = smov [#allocation10]   ;;  %s6157_s26 = smov [#allocation15]  }
 0x124   :  { %s116_s23 = sshll.u32 %s6156_s13, 4  ;;  %s142_s30 = sshll.u32 %s6157_s26, 4  ;;  %s117_s23 = int_to_ptr.vmem [resolvable:$true] %s116_s23  ;;  %s6503_s30 = int_to_ptr.vmem [resolvable:$true] %s142_s30 }
 0x125   :  { %s5704_s0 = scalar_lea.hbm %s6194_s5, 256 }
 0x126   :  { %p5705_p12 = scmp.ne.s32.totalorder %s6194_s5, %s5704_s0  ;;  %p5708_p13 = scmp.lt.u32.totalorder %s5704_s0, %s6194_s5 }
 0x128   :  { %p5710_p0 = pnand %p5708_p13, %p5705_p12 }
 0x12a   :  { %5713 = shalt.err (!%p5710_p0)
}
 0x12b   :  { %s5714_s1 = scalar_lea.vmem %s117_s23, 256  ;;  %p5719_p2 = scmp.lt.s32.totalorder %s117_s23, %s117_s23 }
 0x12c   :  { %p5715_p1 = scmp.ne.s32.totalorder %s117_s23, %s5714_s1  ;;  %p5720_p3 = scmp.lt.s32.totalorder %s5714_s1, %s5714_s1 }
 0x12e   :  { %p5721_p4 = por %p5720_p3, %p5719_p2 }
 0x130   :  { %p5722_p5 = pnand %p5721_p4, %p5715_p1 }
 0x132   :  { %5725 = shalt.err (!%p5722_p5)
}
 0x133   :  { %122 = dma.hbm_to_vmem [thread:$0]  %s6194_s5, 256, %s117_s23, [#allocation11], %s6142_s11, %s6142_s11, %s6143_s15  }
 0x134   :  { %s5726_s3 = scalar_lea.hbm %s6209_s17, 128 }
 0x135   :  { %p5727_p6 = scmp.ne.s32.totalorder %s6209_s17, %s5726_s3  ;;  %p5730_p7 = scmp.lt.u32.totalorder %s5726_s3, %s6209_s17 }
 0x137   :  { %p5732_p8 = pnand %p5730_p7, %p5727_p6 }
 0x139   :  { %5735 = shalt.err (!%p5732_p8)
}
 0x13a   :  { %s5736_s19 = scalar_lea.vmem %s6503_s30, 128  ;;  %p5741_p10 = scmp.lt.s32.totalorder %s6503_s30, %s6503_s30 }
 0x13b   :  { %p5737_p9 = scmp.ne.s32.totalorder %s6503_s30, %s5736_s19  ;;  %p5742_p11 = scmp.lt.s32.totalorder %s5736_s19, %s5736_s19 }
 0x13d   :  { %p5743_p12 = por %p5742_p11, %p5741_p10 }
 0x13f   :  { %p5744_p13 = pnand %p5743_p12, %p5737_p9 }
 0x141   :  { %5747 = shalt.err (!%p5744_p13)
}
 0x142   :  { %s6158_s28 = smov 16   ;;  %s7612_s5 = sld [smem:[#allocation71_spill]] }
 0x143   :  { %s6159_s14 = smov 1   ;;  %s6160_s12 = smov [#allocation18]  }
 0x144   :  { %148 = dma.hbm_to_vmem [thread:$0]  %s6209_s17, 128, %s6503_s30, [#allocation14], %s6158_s28, %s6158_s28, %s6159_s14  }
 0x145   :  { %s167_s7 = sshll.u32 %s6160_s12, 4  ;;  %s6161_s21 = smov [#allocation21]   ;;  %s168_s7 = int_to_ptr.vmem [resolvable:$true] %s167_s7 }
 0x146   :  { %s189_s8 = sshll.u32 %s6161_s21, 4  ;;  %s190_s8 = int_to_ptr.vmem [resolvable:$true] %s189_s8 }
 0x148   :  { %s5748_s2 = scalar_lea.hbm %s7612_s5, 16 }
 0x149   :  { %p5749_p0 = scmp.ne.s32.totalorder %s7612_s5, %s5748_s2  ;;  %p5752_p1 = scmp.lt.u32.totalorder %s5748_s2, %s7612_s5 }
 0x14b   :  { %p5754_p2 = pnand %p5752_p1, %p5749_p0 }
 0x14d   :  { %5757 = shalt.err (!%p5754_p2)
}
 0x14e   :  { %s5758_s10 = scalar_lea.vmem %s168_s7, 16  ;;  %s5762_s16 = scalar_lea.vmem %s168_s7, 32 }
 0x14f   :  { %p5759_p3 = scmp.ne.s32.totalorder %s168_s7, %s5758_s10  ;;  %p5763_p4 = scmp.lt.s32.totalorder %s168_s7, %s168_s7 }
 0x150   :  { %p5764_p5 = scmp.lt.s32.totalorder %s5762_s16, %s5758_s10 }
 0x152   :  { %p5765_p6 = por %p5764_p5, %p5763_p4 }
 0x154   :  { %p5766_p7 = pnand %p5765_p6, %p5759_p3 }
 0x156   :  { %5769 = shalt.err (!%p5766_p7)
}
 0x157   :  { %s7613_s17 = sld [smem:[#allocation72_spill]] }
 0x158   :  { %170 = dma.hbm_to_vmem [thread:$0]  %s7612_s5, 16, %s168_s7, [#allocation17]  }
 0x15d   :  { %s5770_s29 = scalar_lea.hbm %s7613_s17, 16 }
 0x15e   :  { %p5771_p8 = scmp.ne.s32.totalorder %s7613_s17, %s5770_s29  ;;  %p5774_p9 = scmp.lt.u32.totalorder %s5770_s29, %s7613_s17 }
 0x160   :  { %p5776_p10 = pnand %p5774_p9, %p5771_p8 }
 0x162   :  { %5779 = shalt.err (!%p5776_p10)
}
 0x163   :  { %s5780_s4 = scalar_lea.vmem %s190_s8, 16  ;;  %s5784_s6 = scalar_lea.vmem %s190_s8, 32 }
 0x164   :  { %p5781_p11 = scmp.ne.s32.totalorder %s190_s8, %s5780_s4  ;;  %p5785_p12 = scmp.lt.s32.totalorder %s190_s8, %s190_s8 }
 0x165   :  { %p5786_p13 = scmp.lt.s32.totalorder %s5784_s6, %s5780_s4 }
 0x167   :  { %p5787_p0 = por %p5786_p13, %p5785_p12 }
 0x169   :  { %p5788_p1 = pnand %p5787_p0, %p5781_p11 }
 0x16b   :  { %5791 = shalt.err (!%p5788_p1)
}
 0x16c   :  { %s7614_s18 = sld [smem:[#allocation75_spill]]  ;;  %s6162_s13 = smov [#allocation24]  }
 0x16d   :  { %192 = dma.hbm_to_vmem [thread:$0]  %s7613_s17, 16, %s190_s8, [#allocation20]  }
 0x16e   :  { %s213_s23 = sshll.u32 %s6162_s13, 4  ;;  %s6163_s26 = smov [#allocation27]   ;;  %s214_s23 = int_to_ptr.vmem [resolvable:$true] %s213_s23 }
 0x16f   :  { %s237_s30 = sshll.u32 %s6163_s26, 4  ;;  %s238_s30 = int_to_ptr.vmem [resolvable:$true] %s237_s30 }
 0x172   :  { %s5792_s0 = scalar_lea.hbm %s7614_s18, 16 }
 0x173   :  { %p5793_p2 = scmp.ne.s32.totalorder %s7614_s18, %s5792_s0  ;;  %p5796_p3 = scmp.lt.u32.totalorder %s5792_s0, %s7614_s18 }
 0x175   :  { %p5798_p4 = pnand %p5796_p3, %p5793_p2 }
 0x177   :  { %5801 = shalt.err (!%p5798_p4)
}
 0x178   :  { %s5802_s1 = scalar_lea.vmem %s214_s23, 16  ;;  %s5806_s3 = scalar_lea.vmem %s214_s23, 32 }
 0x179   :  { %p5803_p5 = scmp.ne.s32.totalorder %s214_s23, %s5802_s1  ;;  %p5807_p6 = scmp.lt.s32.totalorder %s214_s23, %s214_s23 }
 0x17a   :  { %p5808_p7 = scmp.lt.s32.totalorder %s5806_s3, %s5802_s1 }
 0x17c   :  { %p5809_p8 = por %p5808_p7, %p5807_p6 }
 0x17e   :  { %p5810_p9 = pnand %p5809_p8, %p5803_p5 }
 0x180   :  { %5813 = shalt.err (!%p5810_p9)
}
 0x181   :  { %s7615_s19 = sld [smem:[#allocation78_spill]] }
 0x182   :  { %216 = dma.hbm_to_vmem [thread:$0]  %s7614_s18, 16, %s214_s23, [#allocation23]  }
 0x187   :  { %s5814_s28 = scalar_lea.hbm %s7615_s19, 16 }
 0x188   :  { %p5815_p10 = scmp.ne.s32.totalorder %s7615_s19, %s5814_s28  ;;  %p5818_p11 = scmp.lt.u32.totalorder %s5814_s28, %s7615_s19 }
 0x18a   :  { %p5820_p12 = pnand %p5818_p11, %p5815_p10 }
 0x18c   :  { %5823 = shalt.err (!%p5820_p12)
}
 0x18d   :  { %s5824_s5 = scalar_lea.vmem %s238_s30, 16  ;;  %s5828_s14 = scalar_lea.vmem %s238_s30, 32 }
 0x18e   :  { %p5825_p13 = scmp.ne.s32.totalorder %s238_s30, %s5824_s5  ;;  %p5829_p0 = scmp.lt.s32.totalorder %s238_s30, %s238_s30 }
 0x18f   :  { %p5830_p1 = scmp.lt.s32.totalorder %s5828_s14, %s5824_s5 }
 0x191   :  { %p5831_p2 = por %p5830_p1, %p5829_p0 }
 0x193   :  { %p5832_p3 = pnand %p5831_p2, %p5825_p13 }
 0x195   :  { %5835 = shalt.err (!%p5832_p3)
}
 0x196   :  { %s7616_s12 = sld [smem:[#allocation80_spill]]  ;;  %s6164_s7 = smov [#allocation30]  }
 0x197   :  { %240 = dma.hbm_to_vmem [thread:$0]  %s7615_s19, 16, %s238_s30, [#allocation26]  }
 0x198   :  { %s261_s21 = sshll.u32 %s6164_s7, 4  ;;  %s6165_s8 = smov [#allocation33]   ;;  %s262_s21 = int_to_ptr.vmem [resolvable:$true] %s261_s21 }
 0x199   :  { %s285_s2 = sshll.u32 %s6165_s8, 4  ;;  %s286_s2 = int_to_ptr.vmem [resolvable:$true] %s285_s2 }
 0x19c   :  { %s5836_s10 = scalar_lea.hbm %s7616_s12, 16 }
 0x19d   :  { %p5837_p4 = scmp.ne.s32.totalorder %s7616_s12, %s5836_s10  ;;  %p5840_p5 = scmp.lt.u32.totalorder %s5836_s10, %s7616_s12 }
 0x19f   :  { %p5842_p6 = pnand %p5840_p5, %p5837_p4 }
 0x1a1   :  { %5845 = shalt.err (!%p5842_p6)
}
 0x1a2   :  { %s5846_s16 = scalar_lea.vmem %s262_s21, 16  ;;  %s5850_s17 = scalar_lea.vmem %s262_s21, 32 }
 0x1a3   :  { %p5847_p7 = scmp.ne.s32.totalorder %s262_s21, %s5846_s16  ;;  %p5851_p8 = scmp.lt.s32.totalorder %s262_s21, %s262_s21 }
 0x1a4   :  { %p5852_p9 = scmp.lt.s32.totalorder %s5850_s17, %s5846_s16 }
 0x1a6   :  { %p5853_p10 = por %p5852_p9, %p5851_p8 }
 0x1a8   :  { %p5854_p11 = pnand %p5853_p10, %p5847_p7 }
 0x1aa   :  { %5857 = shalt.err (!%p5854_p11)
}
 0x1ab   :  { %s7617_s29 = sld [smem:[#allocation83_spill]] }
 0x1ac   :  { %264 = dma.hbm_to_vmem [thread:$0]  %s7616_s12, 16, %s262_s21, [#allocation29]  }
 0x1b1   :  { %s5858_s4 = scalar_lea.hbm %s7617_s29, 16 }
 0x1b2   :  { %p5859_p12 = scmp.ne.s32.totalorder %s7617_s29, %s5858_s4  ;;  %p5862_p13 = scmp.lt.u32.totalorder %s5858_s4, %s7617_s29 }
 0x1b4   :  { %p5864_p0 = pnand %p5862_p13, %p5859_p12 }
 0x1b6   :  { %5867 = shalt.err (!%p5864_p0)
}
 0x1b7   :  { %s5868_s6 = scalar_lea.vmem %s286_s2, 16  ;;  %s5872_s18 = scalar_lea.vmem %s286_s2, 32 }
 0x1b8   :  { %p5869_p1 = scmp.ne.s32.totalorder %s286_s2, %s5868_s6  ;;  %p5873_p2 = scmp.lt.s32.totalorder %s286_s2, %s286_s2 }
 0x1b9   :  { %p5874_p3 = scmp.lt.s32.totalorder %s5872_s18, %s5868_s6 }
 0x1bb   :  { %p5875_p4 = por %p5874_p3, %p5873_p2 }
 0x1bd   :  { %p5876_p5 = pnand %p5875_p4, %p5869_p1 }
 0x1bf   :  { %5879 = shalt.err (!%p5876_p5)
}
 0x1c0   :  { %s7618_s13 = sld [smem:[#allocation84_spill]]  ;;  %s6166_s23 = smov [#allocation36]  }
 0x1c1   :  { %288 = dma.hbm_to_vmem [thread:$0]  %s7617_s29, 16, %s286_s2, [#allocation32]  }
 0x1c2   :  { %s304_s26 = sshll.u32 %s6166_s23, 4  ;;  %s6167_s30 = smov [#allocation39]   ;;  %s305_s26 = int_to_ptr.vmem [resolvable:$true] %s304_s26 }
 0x1c3   :  { %s329_s0 = sshll.u32 %s6167_s30, 4  ;;  %s330_s0 = int_to_ptr.vmem [resolvable:$true] %s329_s0 }
 0x1c6   :  { %s5880_s1 = scalar_lea.hbm %s7618_s13, 512 }
 0x1c7   :  { %p5881_p6 = scmp.ne.s32.totalorder %s7618_s13, %s5880_s1  ;;  %p5884_p7 = scmp.lt.u32.totalorder %s5880_s1, %s7618_s13 }
 0x1c9   :  { %p5886_p8 = pnand %p5884_p7, %p5881_p6 }
 0x1cb   :  { %5889 = shalt.err (!%p5886_p8)
}
 0x1cc   :  { %s5890_s3 = scalar_lea.vmem %s305_s26, 512  ;;  %p5895_p10 = scmp.lt.s32.totalorder %s305_s26, %s305_s26 }
 0x1cd   :  { %p5891_p9 = scmp.ne.s32.totalorder %s305_s26, %s5890_s3  ;;  %p5896_p11 = scmp.lt.s32.totalorder %s5890_s3, %s5890_s3 }
 0x1cf   :  { %p5897_p12 = por %p5896_p11, %p5895_p10 }
 0x1d1   :  { %p5898_p13 = pnand %p5897_p12, %p5891_p9 }
 0x1d3   :  { %5901 = shalt.err (!%p5898_p13)
}
 0x1d4   :  { %s7619_s19 = sld [smem:[#allocation85_spill]] }
 0x1d5   :  { %310 = dma.hbm_to_vmem [thread:$0]  %s7618_s13, 512, %s305_s26, [#allocation35], %s6144_s22, %s6144_s22, %s6145_s9  }
 0x1da   :  { %s5902_s28 = scalar_lea.hbm %s7619_s19, 16 }
 0x1db   :  { %p5903_p0 = scmp.ne.s32.totalorder %s7619_s19, %s5902_s28  ;;  %p5906_p1 = scmp.lt.u32.totalorder %s5902_s28, %s7619_s19 }
 0x1dd   :  { %p5908_p2 = pnand %p5906_p1, %p5903_p0 }
 0x1df   :  { %5911 = shalt.err (!%p5908_p2)
}
 0x1e0   :  { %s5912_s5 = scalar_lea.vmem %s330_s0, 16  ;;  %s5916_s14 = scalar_lea.vmem %s330_s0, 32 }
 0x1e1   :  { %p5913_p3 = scmp.ne.s32.totalorder %s330_s0, %s5912_s5  ;;  %p5917_p4 = scmp.lt.s32.totalorder %s330_s0, %s330_s0 }
 0x1e2   :  { %p5918_p5 = scmp.lt.s32.totalorder %s5916_s14, %s5912_s5 }
 0x1e4   :  { %p5919_p6 = por %p5918_p5, %p5917_p4 }
 0x1e6   :  { %p5920_p7 = pnand %p5919_p6, %p5913_p3 }
 0x1e8   :  { %5923 = shalt.err (!%p5920_p7)
}
 0x1e9   :  { %s7620_s12 = sld [smem:[#allocation87_spill]]  ;;  %s6168_s7 = smov [#allocation42]  }
 0x1ea   :  { %332 = dma.hbm_to_vmem [thread:$0]  %s7619_s19, 16, %s330_s0, [#allocation38]  }
 0x1eb   :  { %s350_s21 = sshll.u32 %s6168_s7, 4  ;;  %s6169_s8 = smov [#allocation45]   ;;  %s351_s21 = int_to_ptr.vmem [resolvable:$true] %s350_s21 }
 0x1ec   :  { %s373_s2 = sshll.u32 %s6169_s8, 4  ;;  %s374_s2 = int_to_ptr.vmem [resolvable:$true] %s373_s2 }
 0x1ef   :  { %s5924_s10 = scalar_lea.hbm %s7620_s12, 512 }
 0x1f0   :  { %p5925_p8 = scmp.ne.s32.totalorder %s7620_s12, %s5924_s10  ;;  %p5928_p9 = scmp.lt.u32.totalorder %s5924_s10, %s7620_s12 }
 0x1f2   :  { %p5930_p10 = pnand %p5928_p9, %p5925_p8 }
 0x1f4   :  { %5933 = shalt.err (!%p5930_p10)
}
 0x1f5   :  { %s5934_s16 = scalar_lea.vmem %s351_s21, 512  ;;  %p5939_p12 = scmp.lt.s32.totalorder %s351_s21, %s351_s21 }
 0x1f6   :  { %p5935_p11 = scmp.ne.s32.totalorder %s351_s21, %s5934_s16  ;;  %p5940_p13 = scmp.lt.s32.totalorder %s5934_s16, %s5934_s16 }
 0x1f8   :  { %p5941_p0 = por %p5940_p13, %p5939_p12 }
 0x1fa   :  { %p5942_p1 = pnand %p5941_p0, %p5935_p11 }
 0x1fc   :  { %5945 = shalt.err (!%p5942_p1)
}
 0x1fd   :  { %s7621_s17 = sld [smem:[#allocation88_spill]] }
 0x1fe   :  { %356 = dma.hbm_to_vmem [thread:$0]  %s7620_s12, 512, %s351_s21, [#allocation41], %s6144_s22, %s6144_s22, %s6145_s9  }
 0x203   :  { %s5946_s29 = scalar_lea.hbm %s7621_s17, 16 }
 0x204   :  { %p5947_p2 = scmp.ne.s32.totalorder %s7621_s17, %s5946_s29  ;;  %p5950_p3 = scmp.lt.u32.totalorder %s5946_s29, %s7621_s17 }
 0x206   :  { %p5952_p4 = pnand %p5950_p3, %p5947_p2 }
 0x208   :  { %5955 = shalt.err (!%p5952_p4)
}
 0x209   :  { %s5956_s4 = scalar_lea.vmem %s374_s2, 16  ;;  %s5960_s6 = scalar_lea.vmem %s374_s2, 32 }
 0x20a   :  { %p5957_p5 = scmp.ne.s32.totalorder %s374_s2, %s5956_s4  ;;  %p5961_p6 = scmp.lt.s32.totalorder %s374_s2, %s374_s2 }
 0x20b   :  { %p5962_p7 = scmp.lt.s32.totalorder %s5960_s6, %s5956_s4 }
 0x20d   :  { %p5963_p8 = por %p5962_p7, %p5961_p6 }
 0x20f   :  { %p5964_p9 = pnand %p5963_p8, %p5957_p5 }
 0x211   :  { %5967 = shalt.err (!%p5964_p9)
}
 0x212   :  { %s7622_s18 = sld [smem:[#allocation91_spill]]  ;;  %s6170_s13 = smov [#allocation48]  }
 0x213   :  { %376 = dma.hbm_to_vmem [thread:$0]  %s7621_s17, 16, %s374_s2, [#allocation44]  }
 0x214   :  { %s399_s22 = sshll.u32 %s6170_s13, 4  ;;  %s6171_s9 = smov [#allocation49]   ;;  %s400_s22 = int_to_ptr.vmem [resolvable:$true] %s399_s22 }
 0x215   :  { %s411_s23 = sshll.u32 %s6171_s9, 4  ;;  %s412_s23 = int_to_ptr.vmem [resolvable:$true] %s411_s23 }
 0x218   :  { %s5968_s26 = scalar_lea.hbm %s7622_s18, 16 }
 0x219   :  { %p5969_p10 = scmp.ne.s32.totalorder %s7622_s18, %s5968_s26  ;;  %p5972_p11 = scmp.lt.u32.totalorder %s5968_s26, %s7622_s18 }
 0x21b   :  { %p5974_p12 = pnand %p5972_p11, %p5969_p10 }
 0x21d   :  { %5977 = shalt.err (!%p5974_p12)
}
 0x21e   :  { %s5978_s30 = scalar_lea.vmem %s400_s22, 16  ;;  %s5982_s0 = scalar_lea.vmem %s400_s22, 32 }
 0x21f   :  { %p5979_p13 = scmp.ne.s32.totalorder %s400_s22, %s5978_s30  ;;  %p5983_p0 = scmp.lt.s32.totalorder %s400_s22, %s400_s22 }
 0x220   :  { %p5984_p1 = scmp.lt.s32.totalorder %s5982_s0, %s5978_s30 }
 0x222   :  { %p5985_p2 = por %p5984_p1, %p5983_p0 }
 0x224   :  { %p5986_p3 = pnand %p5985_p2, %p5979_p13 }
 0x226   :  { %5989 = shalt.err (!%p5986_p3)
}
 0x227   :  { %s7623_s1 = sld [smem:[#allocation93_spill]] }
 0x228   :  { %402 = dma.hbm_to_vmem [thread:$0]  %s7622_s18, 16, %s400_s22, [#allocation47]  }
 0x22d   :  { %s5990_s3 = scalar_lea.hbm %s7623_s1, 16 }
 0x22e   :  { %p5991_p4 = scmp.ne.s32.totalorder %s7623_s1, %s5990_s3  ;;  %p5994_p5 = scmp.lt.u32.totalorder %s5990_s3, %s7623_s1 }
 0x230   :  { %p5996_p6 = pnand %p5994_p5, %p5991_p4 }
 0x232   :  { %5999 = shalt.err (!%p5996_p6)
}
 0x233   :  { %s6000_s19 = scalar_lea.vmem %s412_s23, 16  ;;  %s6004_s28 = scalar_lea.vmem %s412_s23, 32 }
 0x234   :  { %p6001_p7 = scmp.ne.s32.totalorder %s412_s23, %s6000_s19  ;;  %p6005_p8 = scmp.lt.s32.totalorder %s412_s23, %s412_s23 }
 0x235   :  { %p6006_p9 = scmp.lt.s32.totalorder %s6004_s28, %s6000_s19 }
 0x237   :  { %p6007_p10 = por %p6006_p9, %p6005_p8 }
 0x239   :  { %p6008_p11 = pnand %p6007_p10, %p6001_p7 }
 0x23b   :  { %6011 = shalt.err (!%p6008_p11)
}
 0x23c   :  { %414 = dma.hbm_to_vmem [thread:$0]  %s7623_s1, 16, %s412_s23, [#allocation50]  }
 0x23d   :  { %6060 = dma.done.wait [#allocation11], 256  }
 0x23e   :  { %6061 = vsyncadd [#allocation11], 4294967040 }
 0x23f   :  { %6062 = dma.done.wait [#allocation14], 384  }
 0x240   :  { %6063 = vsyncadd [#allocation14], 4294966912 }
 0x241   :  { %6064 = dma.done.wait [#allocation17], 400  }
 0x242   :  { %6065 = vsyncadd [#allocation17], 4294966896 }
 0x243   :  { %6066 = dma.done.wait [#allocation20], 400  }
 0x244   :  { %6067 = vsyncadd [#allocation20], 4294966896 }
 0x245   :  { %6068 = dma.done.wait [#allocation23], 32  }
 0x246   :  { %6069 = vsyncadd [#allocation23], 4294967264 }
 0x247   :  { %6070 = dma.done.wait [#allocation26], 32  }
 0x248   :  { %6071 = vsyncadd [#allocation26], 4294967264 }
 0x249   :  { %6072 = dma.done.wait [#allocation29], 528  }
 0x24a   :  { %6073 = vsyncadd [#allocation29], 4294966768 }
 0x24b   :  { %6074 = dma.done.wait [#allocation32], 32  }
 0x24c   :  { %6075 = vsyncadd [#allocation32], 4294967264 }
 0x24d   :  { %6076 = dma.done.wait [#allocation35], 528  }
 0x24e   :  { %6077 = vsyncadd [#allocation35], 4294966768 }
 0x24f   :  { %6078 = dma.done.wait [#allocation38], 528  }
 0x250   :  { %6079 = vsyncadd [#allocation38], 4294966768 }
 0x251   :  { %6080 = dma.done.wait [#allocation41], 528  }
 0x252   :  { %6081 = vsyncadd [#allocation41], 4294966768 }
 0x253   :  { %6082 = dma.done.wait [#allocation44], 32  }
 0x254   :  { %6083 = vsyncadd [#allocation44], 4294967264 }
 0x255   :  { %6084 = dma.done.wait [#allocation47], 528  }
 0x256   :  { %6085 = vsyncadd [#allocation47], 4294966768 }
 0x257   :  { %6086 = dma.done.wait [#allocation50], 16  }
 0x258   :  { %6087 = vsyncadd [#allocation50], 4294967280  ;;  %vm501_vm0 = vcmask 254976   ;;  %v6172_v0 = vmov 0.0   ;;  %s6599_s5 = smov 0  }
 0x259   :  { %502 = vst.msk [vmem:[#allocation2] sm:$0x3] %vm501_vm0, %v6172_v0  ;;  %503 = vst.msk [vmem:[#allocation2 + $0x2] sm:$0x3] %vm501_vm0, %v6172_v0 }
 0x25a   :  { %504 = vst.msk [vmem:[#allocation2 + $0x4] sm:$0x3] %vm501_vm0, %v6172_v0  ;;  %505 = vst.msk [vmem:[#allocation2 + $0x6] sm:$0x3] %vm501_vm0, %v6172_v0 }
 0x25b   :  { %506 = vst.msk [vmem:[#allocation2 + $0x8] sm:$0x3] %vm501_vm0, %v6172_v0  ;;  %507 = vst.msk [vmem:[#allocation2 + $0xa] sm:$0x3] %vm501_vm0, %v6172_v0 }
 0x25c   :  { %508 = vst.msk [vmem:[#allocation2 + $0xc] sm:$0x3] %vm501_vm0, %v6172_v0  ;;  %509 = vst.msk [vmem:[#allocation2 + $0xe] sm:$0x3] %vm501_vm0, %v6172_v0 }
 0x25d   :  { %510 = vst.msk [vmem:[#allocation3] sm:$0x3] %vm501_vm0, %v6172_v0  ;;  %511 = vst.msk [vmem:[#allocation3 + $0x2] sm:$0x3] %vm501_vm0, %v6172_v0 }
 0x25e   :  { %512 = vst.msk [vmem:[#allocation3 + $0x4] sm:$0x3] %vm501_vm0, %v6172_v0  ;;  %513 = vst.msk [vmem:[#allocation3 + $0x6] sm:$0x3] %vm501_vm0, %v6172_v0 }
 0x25f   :  { %514 = vst.msk [vmem:[#allocation3 + $0x8] sm:$0x3] %vm501_vm0, %v6172_v0  ;;  %515 = vst.msk [vmem:[#allocation3 + $0xa] sm:$0x3] %vm501_vm0, %v6172_v0 }
 0x260   :  { %516 = vst.msk [vmem:[#allocation3 + $0xc] sm:$0x3] %vm501_vm0, %v6172_v0  ;;  %517 = vst.msk [vmem:[#allocation3 + $0xe] sm:$0x3] %vm501_vm0, %v6172_v0 }
 0x261   :  { %518 = vst.msk [vmem:[#allocation4] sm:$0x3] %vm501_vm0, %v6172_v0  ;;  %519 = vst.msk [vmem:[#allocation5] sm:$0x3] %vm501_vm0, %v6172_v0 }
 0x262   :  { %520 = vst.msk [vmem:[#allocation6] sm:$0x3] %vm501_vm0, %v6172_v0  ;;  %521 = vst.msk [vmem:[#allocation6 + $0x2] sm:$0x3] %vm501_vm0, %v6172_v0 }
 0x263   :  { %522 = vst.msk [vmem:[#allocation7] sm:$0x3] %vm501_vm0, %v6172_v0  ;;  %523 = vst.msk [vmem:[#allocation7 + $0x2] sm:$0x3] %vm501_vm0, %v6172_v0 }
 0x264   :  { %524 = vst.msk [vmem:[#allocation8] sm:$0x3] %vm501_vm0, %v6172_v0  ;;  %525 = vst.msk [vmem:[#allocation9] sm:$0x3] %vm501_vm0, %v6172_v0 }
 0x265 LB: > { %s7624_s14 = sld [smem:[#allocation74_spill]]  ;;  %v541_v1 = vld [vmem:[#allocation16] sm:$0xff]  ;;  %v542_v2 = vld [vmem:[#allocation16 + $0x8] sm:$0xff]  ;;  %v7581_v4 = vmov 0.0|0.0   ;;  %vm6174_vm1 = vmmov 0   ;;  %v7583_v8 = vmov 0.0   ;;  %v7576_v29 = vlaneseq  ;;  %s6094_s5 = sphi %s6599_s5, %s531_s5  }
 0x266   : > { %v625_v3 = vld [vmem:[#allocation19] sm:$0xff]  ;;  %5041 = vmatprep.subr.bf16.mxu0 %v7581_v4  ;;  %5044 = vmatprep.subr.bf16.mxu1 %v7581_v4  ;;  %v5042_v5 = vpack.c.bf16 %v542_v2, %v541_v1  ;;  %v626_v6 = vld [vmem:[#allocation19 + $0x8] sm:$0xff]  ;;  %s7625_s12 = sld [smem:[#allocation70_spill]]  ;;  %s6611_s7 = sshll.u32 %s6094_s5, 1  ;;  %v543_v11 = vld [vmem:[#allocation16 + $0x10] sm:$0xff]  ;;  %vm713_vm2 = vcmask 9216  }
 0x267   : > { %v5045_v7 = vpack.c.bf16 %v626_v6, %v625_v3  ;;  %4743 = vmatprep.mubr.msk.f32.mxu0 %vm6174_vm1, %v7583_v8  ;;  %4752 = vmatprep.mubr.msk.f32.mxu1 %vm6174_vm1, %v7583_v8  ;;  %s7626_s21 = sld [smem:[#allocation73_spill]]  ;;  %v627_v12 = vld [vmem:[#allocation19 + $0x10] sm:$0xf]  ;;  %vm639_vm3 = vcmask 1043456   ;;  %s533_s8 = scalar_lea.vmem [#allocation10], %s6611_s7  ;;  %vm551_vm4 = vcmask 195584  }
 0x268   : > { %5043 = vmatpush3.bf16.msra.mxu0 %v5042_v5  ;;  %v534_v13 = vld [vmem:[%s533_s8] sm:$0x3]  ;;  %s535_s10 = scalar_lea.vmem [#allocation13], %s6611_s7  ;;  %vm635_vm5 = vcmask 162816   ;;  %s7627_s16 = sld [smem:[#allocation76_spill]]  ;;  %vm772_vm6 = vcmask 261120  }
 0x269   : > { %5046 = vmatpush3.bf16.msra.mxu1 %v5045_v7  ;;  %4741 = vmatprep.subr.mxu0 %v7583_v8  ;;  %v536_v14 = vld [vmem:[%s535_s10] sm:$0x3]  ;;  %v6642_v34 = vshrl.u32 %v7576_v29, 7  ;;  %v6176_v56 = vmov 1983009808   ;;  %s7628_s17 = sld [smem:[#allocation90_spill]] }
 0x26a   : > { %4750 = vmatprep.subr.mxu1 %v7583_v8  ;;  %v766_v31 = vld [vmem:[#allocation4] sm:$0x3]  ;;  %v1369_v57 = vunpack.c.l.s4 %v6176_v56  ;;  %v4531_v58 = vld [vmem:[#allocation18] ss:$0 sm:$0xff]  ;;  %v738_v59 = vld [vmem:[#allocation6] sm:$0x3] }
 0x26b   : > { %v931_v9 = vld [vmem:[%s7624_s14] sm:$0xff]  ;;  %v932_v10 = vld [vmem:[%s7624_s14 + $0x8] sm:$0xff]  ;;  %v933_v19 = vld [vmem:[%s7624_s14 + $0x10] sm:$0xff]  ;;  %v7577_v49 = vsub.s32 0, %v6642_v34  ;;  %v7578_v51 = vsub.s32 1, %v6642_v34  ;;  %s7629_s29 = sld [smem:[#allocation77_spill]] }
 0x26c   : > { %s6620_s2 = scalar_lea.vmem %s7625_s12, %s6611_s7  ;;  %v5060_v16 = vpack.c.bf16 %v932_v10, %v931_v9  ;;  %4742 = vmatpush3.msra.mxu0 %v543_v11  ;;  %v934_v20 = vld [vmem:[%s7624_s14 + $0x18] sm:$0xff]  ;;  %v4533_v60 = vld [vmem:[#allocation21] ss:$0 sm:$0xff]  ;;  %v1370_v63 = vunpack.c.0.s8 %v1369_v57  ;;  %v759_v0 = vld [vmem:[#allocation7] sm:$0x3]  ;;  %s7630_s4 = sld [smem:[#allocation89_spill]] }
 0x26d   : > { %v538_v15 = vld [vmem:[%s6620_s2] sm:$0x3]  ;;  %v769_v21 = vld [vmem:[%s7626_s21 + $0x8] sm:$0xff]  ;;  %4751 = vmatpush3.msk.msra.mxu1 %vm639_vm3, %v627_v12  ;;  %4744 = vmatmul.mubr.msk.f32.vlgmr.msra.gmra.mrb[0].mxu0 %vm551_vm4, %v534_v13  ;;  %v5063_v25 = vpack.c.bf16 %v934_v20, %v933_v19  ;;  %v770_v41 = vld [vmem:[%s7626_s21 + $0x10] sm:$0xff]  ;;  %s7633_s6 = sld [smem:[#allocation94_spill]]  ;;  %s7635_s18 = sld [smem:[#allocation92_spill]] }
 0x26e   : > { %v768_v17 = vld [vmem:[%s7626_s21] sm:$0xff]  ;;  %v714_v18 = vsel %vm713_vm2, %v538_v15, -inf  ;;  %4753 = vmatmul.mubr.msk.f32.vlgmr.msra.gmra.mrb[0].mxu1 %vm635_vm5, %v536_v14  ;;  %5059 = vmatprep.subr.bf16.mxu1 %v7581_v4  ;;  %v1047_v27 = vld [vmem:[%s7627_s16 + $0x8] sm:$0xff]  ;;  %v771_v42 = vld [vmem:[%s7626_s21 + $0x18] sm:$0xff]  ;;  %v6685_v20 = vsub.s32 %v1370_v63, %v6642_v34  ;;  %s7636_s13 = sld [smem:[#allocation96_spill]]  ;;  %s7637_s22 = sld [smem:[#allocation79_spill]] }
 0x26f   : > { %v715_v22 = vrot.slane %v714_v18, 4  ;;  %v5048_v23 = vpack.c.bf16 %v769_v21, %v768_v17  ;;  %5061 = vmatpush3.bf16.msra.mxu1 %v5060_v16  ;;  %4785 = vmatprep.mubr.msk.f32.mxu1 %vm6174_vm1, %v7583_v8  ;;  %v1046_v26 = vld [vmem:[%s7627_s16] sm:$0xff]  ;;  %v1048_v43 = vld [vmem:[%s7627_s16 + $0x10] sm:$0xff]  ;;  %v5051_v44 = vpack.c.bf16 %v771_v42, %v770_v41  ;;  %v1049_v45 = vld [vmem:[%s7627_s16 + $0x18] sm:$0xff]  ;;  %s7638_s9 = sld [smem:[#allocation95_spill]]  ;;  %p2402_p12 = scmp.gt.s32.totalorder %s6094_s5, 0 }
 0x270   : > { %5062 = vmatprep.subr.bf16.mxu1 %v7581_v4  ;;  %5047 = vmatprep.subr.bf16.mxu0 %v7581_v4  ;;  %v5066_v32 = vpack.c.bf16 %v1047_v27, %v1046_v26  ;;  %v5069_v47 = vpack.c.bf16 %v1049_v45, %v1048_v43  ;;  %v853_v61 = vld [vmem:[%s7626_s21 + $0x20] sm:$0xff]  ;;  %v854_v62 = vld [vmem:[%s7626_s21 + $0x28] sm:$0xff]  ;;  %v6672_v7 = vld [vmem:[#allocation3] sm:$0x3]  ;;  %s6180_s30 = smov 64   ;;  %s6181_s0 = smov 32  }
 0x271   : > { %v716_v24 = vmax.f32 %v714_v18, %v715_v22  ;;  %5049 = vmatpush3.bf16.msra.mxu0 %v5048_v23  ;;  %4763 = vmatprep.mubr.msk.f32.mxu0 %vm6174_vm1, %v7583_v8  ;;  %v739_v1 = vld [vmem:[#allocation6 + $0x2] sm:$0x3]  ;;  %v1131_v3 = vld [vmem:[%s7627_s16 + $0x28] sm:$0xff]  ;;  %v6674_v9 = vld [vmem:[#allocation3 + $0x2] sm:$0x3]  ;;  %v5054_v11 = vpack.c.bf16 %v854_v62, %v853_v61  ;;  %s7640_s1 = sld [smem:[#allocation82_spill]] }
 0x272   : > { %5050 = vmatprep.subr.bf16.mxu0 %v7581_v4  ;;  %v1130_v2 = vld [vmem:[%s7627_s16 + $0x20] sm:$0xff]  ;;  %v760_v5 = vld [vmem:[#allocation7 + $0x2] sm:$0x3]  ;;  %v6676_v12 = vld [vmem:[#allocation3 + $0x4] sm:$0x3]  ;;  %s6182_s3 = smov 96  }
 0x273   : > { %v717_v28 = vrot.slane %v716_v24, 2  ;;  %5064 = vmatpush3.bf16.msra.mxu1 %v5063_v25  ;;  %v6678_v13 = vld [vmem:[#allocation3 + $0x6] sm:$0x3]  ;;  %v5072_v16 = vpack.c.bf16 %v1131_v3, %v1130_v2  ;;  %v856_v18 = vld [vmem:[%s7626_s21 + $0x38] sm:$0xff]  ;;  %v1882_v27 = vld [vmem:[%s7628_s17] sm:$0xff]  ;;  %s7642_s19 = sld [smem:[#allocation81_spill]] }
 0x274   : > { %5065 = vmatprep.subr.bf16.mxu1 %v7581_v4  ;;  %v855_v17 = vld [vmem:[%s7626_s21 + $0x30] sm:$0xff]  ;;  %v1133_v26 = vld [vmem:[%s7627_s16 + $0x38] sm:$0xff]  ;;  %v6716_v43 = vld [vmem:[#allocation2] sm:$0x3]  ;;  %s2403_s23 = scalar_select %p2402_p12, 1, 0 }
 0x275   : > { %v718_v30 = vmax.f32 %v716_v24, %v717_v28  ;;  %5052 = vmatpush3.bf16.msra.mxu0 %v5051_v44  ;;  %v1132_v25 = vld [vmem:[%s7627_s16 + $0x30] sm:$0xff]  ;;  %v6714_v42 = vld [vmem:[#allocation3 + $0xe] sm:$0x3]  ;;  %v6718_v44 = vld [vmem:[#allocation2 + $0x2] sm:$0x3]  ;;  %s7643_s28 = sld [smem:[#allocation86_spill]] }
 0x276   : > { %4786 = vmatmul.mubr.msk.f32.vlgmr.msra.gmra.mrb[2].mxu1 %vm772_vm6, %v766_v31  ;;  %5053 = vmatprep.subr.bf16.mxu0 %v7581_v4  ;;  %v1883_v31 = vld [vmem:[%s7628_s17 + $0x8] sm:$0xff]  ;;  %v5075_v41 = vpack.c.bf16 %v1133_v26, %v1132_v25  ;;  %v1885_v56 = vld [vmem:[%s7628_s17 + $0x18] sm:$0xff]  ;;  %v1210_v63 = vld [vmem:[%s7629_s29 + $0x10] sm:$0xff]  ;;  %s2404_s26 = scvt.s32.f32 %s2403_s23  ;;  %s6183_s12 = smov 127  }
 0x277   : > { %v719_v33 = vrot.slane %v718_v30, 1  ;;  %5067 = vmatpush3.bf16.msra.mxu1 %v5066_v32  ;;  %4796 = vmatprep.mubr.msk.f32.mxu1 %vm6174_vm1, %v7583_v8  ;;  %v1208_v32 = vld [vmem:[%s7629_s29] sm:$0xff]  ;;  %v6760_v25 = vld [vmem:[#allocation2 + $0xc] sm:$0x3]  ;;  %v6762_v26 = vld [vmem:[#allocation2 + $0xe] sm:$0x3] }
 0x278   : > { %5068 = vmatprep.subr.bf16.mxu1 %v7581_v4  ;;  %s539_s8 = scalar_lea.vmem [#allocation15], %s6094_s5  ;;  %s4269_s10 = scalar_lea.vmem [#allocation51], %s6611_s7 }
 0x279   : > { %v720_v35 = vmax.f32 %v718_v30, %v719_v33  ;;  %v1209_v33 = vld [vmem:[%s7629_s29 + $0x8] sm:$0xff]  ;;  %s4250_s23 = scalar_lea.vmem [#allocation2], %s6611_s7 }
 0x27b   : > { %vm723_vm7 = vcmp.eq.f32.partialorder %v538_v15, %v720_v35  ;;  %5070 = vmatpush3.bf16.msra.mxu1 %v5069_v47  ;;  %v1894_v35 = vcombine.low %v6672_v7, %v6674_v9  ;;  %v5091_v47 = vpack.c.bf16 %v1883_v31, %v1882_v27  ;;  %v1356_v31 = vld [vmem:[%s7630_s4 + $0x10] sm:$0xff] }
 0x27c   : > { %v724_v36 = vsel %vm723_vm7, %v6642_v34, 2  ;;  %5071 = vmatprep.subr.bf16.mxu1 %v7581_v4 }
 0x27d   : > { %v725_v37 = vsel %vm713_vm2, %v724_v36, 2147483647  ;;  %v1895_v36 = vcombine.low %v6676_v12, %v6678_v13  ;;  %v1902_v57 = vrot.slane %v1894_v35, %v6685_v20  ;;  %v1384_v35 = vcombine.low %v6760_v25, %v6762_v26 }
 0x27e   : > { %v726_v38 = vrot.slane %v725_v37, 4 }
 0x280   : > { %vm727_vm8 = vcmp.lt.s32.totalorder %v725_v37, %v726_v38 }
 0x281   : > { %v728_v39 = vsel %vm727_vm8, %v725_v37, %v726_v38  ;;  %v5057_v37 = vpack.c.bf16 %v856_v18, %v855_v17  ;;  %v6707_v38 = vld [vmem:[#allocation3 + $0x8] sm:$0x3]  ;;  %v6753_v18 = vld [vmem:[#allocation2 + $0x8] sm:$0x3] }
 0x282   : > { %v729_v40 = vrot.slane %v728_v39, 2 }
 0x284   : > { %vm730_vm9 = vcmp.lt.s32.totalorder %v728_v39, %v729_v40 }
 0x285   : > { %v731_v46 = vsel %vm730_vm9, %v728_v39, %v729_v40  ;;  %v6709_v39 = vld [vmem:[#allocation3 + $0xa] sm:$0x3]  ;;  %v6711_v40 = vld [vmem:[#allocation3 + $0xc] sm:$0x3] }
 0x286   : > { %v732_v48 = vrot.slane %v731_v46, 1  ;;  %v1912_v61 = vcombine.low %v6711_v40, %v6714_v42 }
 0x288   : > { %vm733_vm10 = vcmp.lt.s32.totalorder %v731_v46, %v732_v48 }
 0x289   : > { %v734_v50 = vsel %vm733_vm10, %v731_v46, %v732_v48  ;;  %v6725_v48 = vld [vmem:[#allocation2 + $0x4] sm:$0x3]  ;;  %vm4399_vm10 = vcmask 1043459  }
 0x28a   : > { %vm735_vm11 = vcmp.eq.s32.totalorder %v6642_v34, %v734_v50  ;;  %v6727_v50 = vld [vmem:[#allocation2 + $0x6] sm:$0x3] }
 0x28b   : > { %v4536_v52 = vsel %vm735_vm11, 1.0, %v7583_v8  ;;  %v1367_v2 = vcombine.low %v6725_v48, %v6727_v50  ;;  %vm4401_vm11 = vcmask 1044484  }
 0x28c   : > { %v743_v53 = vrot.slane %v4536_v52, %v7577_v49  ;;  %v750_v54 = vrot.slane %v4536_v52, %v7578_v51 }
 0x28e   : > { %745 = vbcast.lane.b32.xlu0 %v743_v53, 256 }
 0x292   : > { %752 = vbcast.lane.b32.xlu0 %v750_v54, 256  ;;  %v1884_v54 = vld [vmem:[%s7628_s17 + $0x10] sm:$0xff] }
 0x300   : > { %v6664_v55 = vpop.permute.xlu0 %745 }
 0x301   : > { %v754_v21 = vmul.f32 %v6664_v55, %v738_v59  ;;  %v761_v28 = vmul.f32 %v759_v0, %v6664_v55  ;;  %v5078_v59 = vpack.c.bf16 %v1209_v33, %v1208_v32  ;;  %v1211_v0 = vld [vmem:[%s7629_s29 + $0x18] sm:$0xff] }
 0x302   : > { %v1357_v32 = vld [vmem:[%s7630_s4 + $0x18] sm:$0xff] }
 0x303   : > { %v756_v45 = vsel %vm501_vm0, %v754_v21, 0.0  ;;  %v763_v52 = vsel %vm501_vm0, %v761_v28, 0.0 }
 0x304   : > { %v6670_v6 = vpop.permute.xlu0 %752 }
 0x305   : > { %v755_v23 = vmul.f32 %v6670_v6, %v739_v1  ;;  %v762_v30 = vmul.f32 %v760_v5, %v6670_v6  ;;  %v1366_v1 = vcombine.low %v6716_v43, %v6718_v44 }
 0x307   : > { %v757_v46 = vsel %vm501_vm0, %v755_v23, 0.0  ;;  %v764_v53 = vsel %vm501_vm0, %v762_v30, 0.0  ;;  %v1926_v23 = vrot.slane %v1912_v61, %v6685_v20  ;;  %v1374_v28 = vrot.slane %v1366_v1, %v6685_v20 }
 0x308   : > { %v758_v62 = vadd.f32 %v757_v46, %v756_v45  ;;  %v765_v5 = vadd.f32 %v764_v53, %v763_v52  ;;  %v1381_v30 = vrot.slane %v1367_v2, %v6685_v20  ;;  %v7579_v53 = vmov 0  }
 0x309   : > { %5318 = vset.pattern.permute.xlu0 %v7579_v53  ;;  %5317 = vset.pattern.permute.xlu1 %v7579_v53 }
 0x30a   : > { %v1382_v45 = vcombine.low %v1374_v28, %v1381_v30 }
 0x340   : > { %v621_v10 = vpop.f32.mrb[0].mxu0 }
 0x341   : > { %v6680_v14 = vadd.f32 %v4531_v58, %v621_v10  ;;  %v709_v15 = vpop.f32.mrb[0].mxu1  ;;  %v4745_v19 = vpop.f32.mrb[1].mxu0  ;;  %v1909_v58 = vrot.slane %v1895_v36, %v6685_v20  ;;  %v5095_v10 = vpack.c.bf16 %v1885_v56, %v1884_v54  ;;  %v1044_v36 = vld [vmem:[#allocation5] sm:$0x3] }
 0x342   : > { %v6688_v22 = vadd.f32 %v4533_v60, %v709_v15  ;;  %v4754_v24 = vpop.f32.mrb[1].mxu1  ;;  %v1911_v60 = vcombine.low %v6707_v38, %v6709_v39  ;;  %v1355_v15 = vld [vmem:[%s7630_s4 + $0x8] sm:$0xff]  ;;  %v5081_v19 = vpack.c.bf16 %v1211_v0, %v1210_v63 }
 0x343   : > { %4764 = vmatmul.mubr.msk.f32.vlgmr.msra.gmra.mrb[2].mxu0 %vm772_vm6, %v6680_v14  ;;  %v1910_v17 = vcombine.low %v1902_v57, %v1909_v58  ;;  %v6758_v24 = vld [vmem:[#allocation2 + $0xa] sm:$0x3] }
 0x344   : > { %5055 = vmatpush3.bf16.msra.mxu0 %v5054_v11  ;;  %4797 = vmatmul.mubr.msk.f32.vlgmr.msra.gmra.mrb[4].mxu1 %vm772_vm6, %v6688_v22  ;;  %v1354_v11 = vld [vmem:[%s7630_s4] sm:$0xff]  ;;  %v1919_v21 = vrot.slane %v1911_v60, %v6685_v20  ;;  %v1383_v33 = vcombine.low %v6753_v18, %v6758_v24 }
 0x345   : > { %5073 = vmatpush3.bf16.msra.mxu1 %v5072_v16  ;;  %5056 = vmatprep.subr.bf16.mxu0 %v7581_v4  ;;  %v5083_v27 = vpack.c.bf16 %v1355_v15, %v1354_v11 }
 0x346   : > { %5074 = vmatprep.subr.bf16.mxu1 %v7581_v4  ;;  %4774 = vmatprep.mubr.msk.f32.mxu0 %vm6174_vm1, %v7583_v8  ;;  %v1391_v46 = vrot.slane %v1383_v33, %v6685_v20 }
 0x347   : > { %4807 = vmatprep.mubr.msk.f32.mxu1 %vm6174_vm1, %v7583_v8 }
 0x348   : > { %5058 = vmatpush3.bf16.msra.mxu0 %v5057_v37  ;;  %v1927_v37 = vcombine.low %v1919_v21, %v1926_v23 }
 0x349   : > { %5076 = vmatpush3.bf16.msra.mxu1 %v5075_v41  ;;  %5077 = vmatprep.subr.bf16.mxu0 %v7581_v4  ;;  %v6748_v3 = vpop.f32.mrb[2].mxu1  ;;  %v5087_v41 = vpack.c.bf16 %v1357_v32, %v1356_v31 }
 0x34a   : > { %5092 = vmatprep.subr.bf16.mxu1 %v5091_v47  ;;  %v4787_v16 = vpop.f32.mrb[3].mxu1 }
 0x34b   : > { %4775 = vmatmul.mubr.msk.f32.vlgmr.msra.gmra.mrb[2].mxu0 %vm772_vm6, %v758_v62 }
 0x34c   : > { %4808 = vmatmul.mubr.msk.f32.vlgmr.msra.gmra.mrb[4].mxu1 %vm772_vm6, %v765_v5  ;;  %5079 = vmatpush3.bf16.msra.mxu0 %v5078_v59  ;;  %v6795_v59 = vstv %s6094_s5 }
 0x34d   : > { %5094 = vmatpush3.bf16.msra.mxu1 %v5091_v47  ;;  %5080 = vmatprep.subr.bf16.mxu0 %v7581_v4  ;;  %v1398_v47 = vrot.slane %v1384_v35, %v6685_v20  ;;  %vm1326_vm12 = vcmp.gt.s32.totalorder %v6795_v59, 4  ;;  %vm1327_vm13 = vcmp.gt.s32.totalorder %v6795_v59, 5  ;;  %vm1322_vm14 = vcmp.gt.s32.totalorder %v6795_v59, 0 }
 0x34e   : > { %5096 = vmatprep.subr.bf16.mxu1 %v5095_v10  ;;  %4818 = vmatprep.mubr.msk.f32.mxu0 %vm6174_vm1, %v7583_v8  ;;  %vm1328_vm15 = vcmp.gt.s32.totalorder %v6795_v59, 6  ;;  %vm1323_vm3 = vcmp.gt.s32.totalorder %v6795_v59, 1  ;;  %vm1324_vm4 = vcmp.gt.s32.totalorder %v6795_v59, 2  ;;  %vm1329_vm5 = vcmp.gt.s32.totalorder %v6795_v59, 7 }
 0x34f   : > { %4840 = vmatprep.mubr.msk.f32.mxu1 %vm772_vm6, %v1910_v17  ;;  %v1399_v52 = vcombine.low %v1391_v46, %v1398_v47  ;;  %vm1325_vm7 = vcmp.gt.s32.totalorder %v6795_v59, 3 }
 0x350   : > { %5082 = vmatpush3.bf16.msra.mxu0 %v5081_v19 }
 0x351   : > { %5098 = vmatpush3.bf16.msra.mxu1 %v5095_v10  ;;  %5084 = vmatprep.subr.bf16.mxu0 %v5083_v27 }
 0x352   : > { %5105 = vmatprep.subr.bf16.mxu1 %v7581_v4 }
 0x353   : > { %4819 = vmatmul.mubr.msk.f32.vlgmr.msra.gmra.mrb[4].mxu0 %vm772_vm6, %v1044_v36 }
 0x354   : > { %4841 = vmatmul.mubr.msk.f32.vlgmr.msra.gmra.mrb[6].mxu1 %vm772_vm6, %v1927_v37  ;;  %5086 = vmatpush3.bf16.msra.mxu0 %v5083_v27 }
 0x355   : > { %5088 = vmatprep.subr.bf16.mxu0 %v5087_v41  ;;  %4829 = vmatprep.mubr.msk.f32.mxu0 %vm772_vm6, %v1382_v45 }
 0x356   : > { %4862 = vmatprep.mubr.msk.f32.mxu1 %vm6174_vm1, %v7583_v8 }
 0x358   : > { %5090 = vmatpush3.bf16.msra.mxu0 %v5087_v41 }
 0x359   : > { %5099 = vmatprep.subr.bf16.mxu0 %v7581_v4 }
 0x35b   : > { %4830 = vmatmul.mubr.msk.f32.vlgmr.msra.gmra.mrb[6].mxu0 %vm772_vm6, %v1399_v52 }
 0x35c   : > { %4851 = vmatprep.mubr.msk.f32.mxu0 %vm6174_vm1, %v7583_v8 }
 0x41e   : > { %v6790_v54 = vpop.f32.mrb[2].mxu0 }
 0x41f   : > { %v6792_v56 = vpop.f32.mrb[4].mxu1  ;;  %v4776_v57 = vpop.f32.mrb[3].mxu0 }
 0x420   : > { %v4809_v58 = vpop.f32.mrb[5].mxu1 }
 0x426   : > { %v6797_v60 = vpop.f32.mrb[4].mxu0 }
 0x427   : > { %v4842_v61 = vpop.f32.mrb[6].mxu1  ;;  %v4820_v62 = vpop.f32.mrb[5].mxu0 }
 0x428   : > { %v2026_v63 = vcombine.high %v4842_v61, %v4842_v61  ;;  %v2033_v0 = vrot.slane %v4842_v61, %v6685_v20  ;;  %v1998_v1 = vpop.f32.mrb[7].mxu1 }
 0x429   : > { %v2009_v2 = vcombine.high %v1998_v1, %v1998_v1  ;;  %v2016_v5 = vrot.slane %v1998_v1, %v6685_v20 }
 0x42a   : > { %v2040_v10 = vrot.slane %v2026_v63, %v6685_v20  ;;  %v2041_v11 = vcombine.high %v2033_v0, %v2033_v0  ;;  %v6809_v15 = vsel %vm1326_vm12, %v2033_v0, -1e+30 }
 0x42b   : > { %v2023_v16 = vrot.slane %v2009_v2, %v6685_v20  ;;  %v2024_v17 = vcombine.high %v2016_v5, %v2016_v5  ;;  %v2051_v27 = vsel %vm1322_vm14, %v2016_v5, -1e+30  ;;  %v2063_v28 = vsel %vm713_vm2, %v6809_v15, -inf }
 0x42c   : > { %v2042_v19 = vcombine.high %v2040_v10, %v2040_v10  ;;  %v6817_v21 = vsel %vm1327_vm13, %v2041_v11, -1e+30  ;;  %v6821_v23 = vsel %vm1328_vm15, %v2040_v10, -1e+30  ;;  %v2059_v45 = vsel %vm713_vm2, %v2051_v27, -inf }
 0x42d   : > { %v2065_v30 = vsel %vm713_vm2, %v6817_v21, -inf  ;;  %v2067_v31 = vsel %vm713_vm2, %v6821_v23, -inf  ;;  %v2025_v32 = vcombine.high %v2023_v16, %v2023_v16  ;;  %v2052_v35 = vsel %vm1323_vm3, %v2024_v17, -1e+30 }
 0x42e   : > { %v6833_v33 = vsel %vm1329_vm5, %v2042_v19, -1e+30  ;;  %v2053_v36 = vsel %vm1324_vm4, %v2023_v16, -1e+30  ;;  %v2060_v46 = vsel %vm713_vm2, %v2052_v35, -inf  ;;  %v4831_v47 = vpop.f32.mrb[6].mxu0  ;;  %v2064_v58 = vmax.f32 %v2059_v45, %v2063_v28 }
 0x42f   : > { %v2069_v37 = vsel %vm713_vm2, %v6833_v33, -inf  ;;  %v2054_v41 = vsel %vm1325_vm7, %v2025_v32, -1e+30  ;;  %v2061_v52 = vsel %vm713_vm2, %v2053_v36, -inf  ;;  %v1470_v61 = vpop.f32.mrb[7].mxu0  ;;  %v2066_v62 = vmax.f32 %v2060_v46, %v2065_v30 }
 0x430   : > { %v2062_v57 = vsel %vm713_vm2, %v2054_v41, -inf  ;;  %v2068_v63 = vmax.f32 %v2061_v52, %v2067_v31  ;;  %v1498_v1 = vcombine.high %v4831_v47, %v4831_v47  ;;  %v1505_v2 = vrot.slane %v4831_v47, %v6685_v20 }
 0x431   : > { %v2070_v0 = vmax.f32 %v2062_v57, %v2069_v37  ;;  %v1481_v5 = vcombine.high %v1470_v61, %v1470_v61  ;;  %v1488_v10 = vrot.slane %v1470_v61, %v6685_v20  ;;  %v2071_v11 = vmax.f32 %v2064_v58, %v2066_v62 }
 0x432   : > { %v1512_v17 = vrot.slane %v1498_v1, %v6685_v20  ;;  %v1513_v19 = vcombine.high %v1505_v2, %v1505_v2  ;;  %v6852_v32 = vsel %vm1326_vm12, %v1505_v2, -1e+30 }
 0x433   : > { %v2072_v16 = vmax.f32 %v2068_v63, %v2070_v0  ;;  %v1495_v28 = vrot.slane %v1481_v5, %v6685_v20  ;;  %v1496_v30 = vcombine.high %v1488_v10, %v1488_v10  ;;  %v1543_v47 = vsel %vm713_vm2, %v6852_v32, -inf }
 0x434   : > { %v1514_v37 = vcombine.high %v1512_v17, %v1512_v17  ;;  %v6857_v45 = vsel %vm1328_vm15, %v1512_v17, -1e+30  ;;  %v6861_v46 = vsel %vm1327_vm13, %v1513_v19, -1e+30  ;;  %v1531_v1 = vsel %vm1322_vm14, %v1488_v10, -1e+30 }
 0x435   : > { %v2073_v31 = vmax.f32 %v2071_v11, %v2072_v16  ;;  %v1547_v52 = vsel %vm713_vm2, %v6857_v45, -inf  ;;  %v1497_v57 = vcombine.high %v1495_v28, %v1495_v28  ;;  %v1532_v2 = vsel %vm1323_vm3, %v1496_v30, -1e+30 }
 0x436   : > { %v6869_v0 = vsel %vm1329_vm5, %v1514_v37, -1e+30  ;;  %v1539_v10 = vsel %vm713_vm2, %v1531_v1, -inf  ;;  %v1540_v30 = vsel %vm713_vm2, %v1532_v2, -inf }
 0x437   : > { %v2074_v58 = vsub.f32 %v2051_v27, %v2073_v31  ;;  %v2075_v61 = vsub.f32 %v2052_v35, %v2073_v31  ;;  %v2076_v62 = vsub.f32 %v2053_v36, %v2073_v31  ;;  %v2077_v63 = vsub.f32 %v2054_v41, %v2073_v31 }
 0x438   : > { %v2078_v17 = vsub.f32 %v6809_v15, %v2073_v31  ;;  %v1545_v27 = vsel %vm713_vm2, %v6861_v46, -inf  ;;  %v1549_v35 = vsel %vm713_vm2, %v6869_v0, -inf  ;;  %v1533_v36 = vsel %vm1324_vm4, %v1495_v28, -1e+30 }
 0x439   : > { %v2082_v5 = vmul.f32 1.442695, %v2074_v58  ;;  %v2084_v11 = vmul.f32 1.442695, %v2075_v61  ;;  %v2086_v16 = vmul.f32 1.442695, %v2076_v62  ;;  %v1544_v58 = vmax.f32 %v1539_v10, %v1543_v47 }
 0x43a   : > { %v2088_v19 = vmul.f32 1.442695, %v2077_v63  ;;  %v1534_v41 = vsel %vm1325_vm7, %v1497_v57, -1e+30  ;;  %v1541_v15 = vsel %vm713_vm2, %v1533_v36, -inf  ;;  %v1546_v61 = vmax.f32 %v1540_v30, %v1545_v27 }
 0x43b   : > { %5323 = vpow2.f32 %v2082_v5  ;;  %v1542_v37 = vsel %vm713_vm2, %v1534_v41, -inf  ;;  %v1548_v62 = vmax.f32 %v1541_v15, %v1547_v52  ;;  %v2079_v28 = vsub.f32 %v6817_v21, %v2073_v31 }
 0x43c   : > { %5325 = vpow2.f32 %v2084_v11  ;;  %v1550_v63 = vmax.f32 %v1542_v37, %v1549_v35  ;;  %v2080_v5 = vsub.f32 %v6821_v23, %v2073_v31  ;;  %v2081_v57 = vsub.f32 %v6833_v33, %v2073_v31 }
 0x43d   : > { %5327 = vpow2.f32 %v2086_v16  ;;  %v1551_v29 = vmax.f32 %v1544_v58, %v1546_v61  ;;  %v2090_v51 = vmul.f32 1.442695, %v2078_v17  ;;  %v2092_v11 = vmul.f32 1.442695, %v2079_v28 }
 0x43e   : > { %5329 = vpow2.f32 %v2088_v19  ;;  %v1552_v49 = vmax.f32 %v1548_v62, %v1550_v63  ;;  %v2094_v53 = vmul.f32 1.442695, %v2080_v5  ;;  %v2096_v8 = vmul.f32 1.442695, %v2081_v57 }
 0x43f   : > { %5331 = vpow2.f32 %v2090_v51  ;;  %v7631_v47 = vmov 0.0  }
 0x440   : > { %v1553_v4 = vmax.f32 %v1551_v29, %v1552_v49  ;;  %v6894_v52 = vsel %vm1322_vm14, 1.0, %v7631_v47  ;;  %v6899_v21 = vsel %vm1323_vm3, 1.0, %v7631_v47  ;;  %v6904_v23 = vsel %vm1324_vm4, 1.0, %v7631_v47 }
 0x441   : > { %5333 = vpow2.f32 %v2092_v11  ;;  %v4554_v62 = vsel %vm1327_vm13, 1.0, %v7631_v47  ;;  %vm4405_vm13 = vcmask 1046534   ;;  %vm4407_vm14 = vcmask 1047559  }
 0x442   : > { %v1554_v33 = vsub.f32 %v1531_v1, %v1553_v4  ;;  %v1555_v29 = vsub.f32 %v1532_v2, %v1553_v4  ;;  %v1556_v49 = vsub.f32 %v1533_v36, %v1553_v4  ;;  %v1557_v51 = vsub.f32 %v1534_v41, %v1553_v4 }
 0x443   : > { %5335 = vpow2.f32 %v2094_v53  ;;  %v1558_v31 = vsub.f32 %v6852_v32, %v1553_v4  ;;  %v1559_v16 = vsub.f32 %v6861_v46, %v1553_v4  ;;  %v1560_v17 = vsub.f32 %v6857_v45, %v1553_v4 }
 0x444   : > { %v1562_v27 = vmul.f32 1.442695, %v1554_v33  ;;  %v1564_v35 = vmul.f32 1.442695, %v1555_v29  ;;  %v1566_v10 = vmul.f32 1.442695, %v1556_v49  ;;  %5337 = vpow2.f32 %v2096_v8 }
 0x445   : > { %v5324_v19 = vpop.eup %5323  ;;  %v4552_v1 = vsel %vm1325_vm7, 1.0, %v7631_v47  ;;  %v1568_v53 = vmul.f32 1.442695, %v1557_v51  ;;  %v1561_v32 = vsub.f32 %v6869_v0, %v1553_v4  ;;  %v4553_v45 = vsel %vm1326_vm12, 1.0, %v7631_v47 }
 0x446   : > { %v5326_v30 = vpop.eup %5325  ;;  %v6913_v2 = vmul.f32 %v5324_v19, %v6894_v52  ;;  %5339 = vpow2.f32 %v1562_v27  ;;  %v1570_v8 = vmul.f32 1.442695, %v1558_v31  ;;  %v1572_v58 = vmul.f32 1.442695, %v1559_v16 }
 0x447   : > { %v5328_v36 = vpop.eup %5327  ;;  %v6920_v46 = vmul.f32 %v5326_v30, %v6899_v21  ;;  %5341 = vpow2.f32 %v1564_v35  ;;  %v1574_v61 = vmul.f32 1.442695, %v1560_v17  ;;  %v1576_v28 = vmul.f32 1.442695, %v1561_v32 }
 0x448   : > { %v5330_v41 = vpop.eup %5329  ;;  %v2106_v15 = vsel %vm713_vm2, %v6913_v2, 0.0  ;;  %v6925_v37 = vmul.f32 %v5328_v36, %v6904_v23  ;;  %5343 = vpow2.f32 %v1566_v10  ;;  %v4555_v33 = vsel %vm1328_vm15, 1.0, %v7631_v47 }
 0x449   : > { %v6927_v4 = vmul.f32 %v5330_v41, %v4552_v1  ;;  %v2107_v0 = vsel %vm713_vm2, %v6920_v46, 0.0  ;;  %5345 = vpow2.f32 %v1568_v53  ;;  %v5332_v5 = vpop.eup %5331  ;;  %v4556_v17 = vsel %vm1329_vm5, 1.0, %v7631_v47 }
 0x44a   : > { %v2108_v63 = vadd.f32 %v2107_v0, %v2106_v15  ;;  %v2109_v57 = vsel %vm713_vm2, %v6925_v37, 0.0  ;;  %5347 = vpow2.f32 %v1570_v8  ;;  %v6939_v29 = vmul.f32 %v5332_v5, %v4553_v45 }
 0x44b   : > { %v5334_v11 = vpop.eup %5333  ;;  %5349 = vpow2.f32 %v1572_v58  ;;  %v2111_v51 = vsel %vm713_vm2, %v6927_v4, 0.0  ;;  %vm4403_vm12 = vcmask 1045509   ;;  %vm4412_vm15 = vcmask 15360  }
 0x44c   : > { %v2110_v49 = vadd.f32 %v2109_v57, %v2108_v63  ;;  %v2103_v31 = vmul.f32 %v5334_v11, %v4554_v62  ;;  %5351 = vpow2.f32 %v1574_v61  ;;  %v2113_v10 = vsel %vm713_vm2, %v6939_v29, 0.0 }
 0x44d   : > { %v5336_v16 = vpop.eup %5335  ;;  %5353 = vpow2.f32 %v1576_v28 }
 0x44e   : > { %v2112_v19 = vadd.f32 %v2111_v51, %v2110_v49  ;;  %v5338_v27 = vpop.eup %5337  ;;  %v2104_v35 = vmul.f32 %v5336_v16, %v4555_v33  ;;  %v2115_v36 = vsel %vm713_vm2, %v2103_v31, 0.0 }
 0x44f   : > { %v2105_v32 = vmul.f32 %v5338_v27, %v4556_v17 }
 0x450   : > { %v2114_v30 = vadd.f32 %v2113_v10, %v2112_v19  ;;  %v5340_v53 = vpop.eup %5339  ;;  %v2117_v59 = vsel %vm713_vm2, %v2104_v35, 0.0 }
 0x451   : > { %v5342_v8 = vpop.eup %5341  ;;  %v1578_v15 = vmul.f32 %v5340_v53, %v6894_v52  ;;  %v2119_v11 = vsel %vm713_vm2, %v2105_v32, 0.0 }
 0x452   : > { %v2116_v41 = vadd.f32 %v2115_v36, %v2114_v30  ;;  %v5344_v58 = vpop.eup %5343  ;;  %v1579_v0 = vmul.f32 %v5342_v8, %v6899_v21 }
 0x453   : > { %v5346_v61 = vpop.eup %5345  ;;  %v1580_v28 = vmul.f32 %v5344_v58, %v6904_v23  ;;  %v1586_v5 = vsel %vm713_vm2, %v1578_v15, 0.0 }
 0x454   : > { %v2118_v63 = vadd.f32 %v2117_v59, %v2116_v41  ;;  %v5348_v57 = vpop.eup %5347  ;;  %v1581_v49 = vmul.f32 %v5346_v61, %v4552_v1  ;;  %v1587_v51 = vsel %vm713_vm2, %v1579_v0, 0.0 }
 0x455   : > { %v5350_v16 = vpop.eup %5349  ;;  %v1582_v52 = vmul.f32 %v5348_v57, %v4553_v45  ;;  %v1588_v27 = vadd.f32 %v1587_v51, %v1586_v5  ;;  %v1589_v10 = vsel %vm713_vm2, %v1580_v28, 0.0 }
 0x456   : > { %v2120_v19 = vadd.f32 %v2119_v11, %v2118_v63  ;;  %v5352_v30 = vpop.eup %5351  ;;  %v1583_v21 = vmul.f32 %v5350_v16, %v4554_v62  ;;  %v1591_v53 = vsel %vm713_vm2, %v1581_v49, 0.0 }
 0x457   : > { %v5354_v36 = vpop.eup %5353  ;;  %v1590_v23 = vadd.f32 %v1589_v10, %v1588_v27  ;;  %v1584_v41 = vmul.f32 %v5352_v30, %v4555_v33  ;;  %v1593_v58 = vsel %vm713_vm2, %v1582_v52, 0.0 }
 0x458   : > { %vm2121_vm8 = vcmp.gt.f32.partialorder %v2120_v19, 0.0  ;;  %v1585_v59 = vmul.f32 %v5354_v36, %v4556_v17  ;;  %v1595_v61 = vsel %vm713_vm2, %v1583_v21, 0.0 }
 0x459   : > { %v2122_v8 = vsel %vm2121_vm8, %v2120_v19, 1.0  ;;  %v1592_v1 = vadd.f32 %v1591_v53, %v1590_v23  ;;  %v1597_v63 = vsel %vm713_vm2, %v1584_v41, 0.0 }
 0x45a   : > { %5355 = vrcp.f32 %v2122_v8  ;;  %v1599_v62 = vsel %vm713_vm2, %v1585_v59, 0.0  ;;  %v7632_v8 = vmov 0.0|0.0   ;;  %vm3136_vm2 = vcmask 1041408  }
 0x45b   : > { %v1594_v45 = vadd.f32 %v1593_v58, %v1592_v1 }
 0x45d   : > { %v1596_v5 = vadd.f32 %v1595_v61, %v1594_v45 }
 0x45f   : > { %v1598_v57 = vadd.f32 %v1597_v63, %v1596_v5 }
 0x461   : > { %v1600_v11 = vadd.f32 %v1599_v62, %v1598_v57 }
 0x463   : > { %vm1601_vm9 = vcmp.gt.f32.partialorder %v1600_v11, 0.0 }
 0x464   : > { %v5356_v51 = vpop.eup %5355  ;;  %v1602_v53 = vsel %vm1601_vm9, %v1600_v11, 1.0 }
 0x465   : > { %v6963_v16 = vmul.f32 %v5356_v51, %v6925_v37  ;;  %v6966_v33 = vmul.f32 %v5356_v51, %v6913_v2  ;;  %v6968_v19 = vmul.f32 %v5356_v51, %v2103_v31  ;;  %v6971_v17 = vmul.f32 %v5356_v51, %v6920_v46 }
 0x466   : > { %v6973_v27 = vmul.f32 %v5356_v51, %v2105_v32  ;;  %v6976_v10 = vmul.f32 %v5356_v51, %v6927_v4  ;;  %v6979_v30 = vmul.f32 %v5356_v51, %v6939_v29  ;;  %5357 = vrcp.f32 %v1602_v53 }
 0x467   : > { %2158 = vperm.xlu0 %5318, %v6963_v16   ;;  %2134 = vperm.xlu1 %5317, %v6966_v33   ;;  %v6983_v2 = vmul.f32 %v5356_v51, %v2104_v35 }
 0x46b   : > { %2194 = vperm.xlu0 %5318, %v6968_v19   ;;  %2146 = vperm.xlu1 %5317, %v6971_v17  }
 0x46f   : > { %2218 = vperm.xlu0 %5318, %v6973_v27   ;;  %2170 = vperm.xlu1 %5317, %v6976_v10  }
 0x470   : > { %v5358_v46 = vpop.eup %5357 }
 0x471   : > { %v6989_v37 = vmul.f32 %v5358_v46, %v1579_v0  ;;  %v6991_v4 = vmul.f32 %v5358_v46, %v1581_v49  ;;  %v6993_v29 = vmul.f32 %v5358_v46, %v1583_v21  ;;  %v6995_v31 = vmul.f32 %v5358_v46, %v1578_v15  ;;  %v2405_v15 = vld [vmem:[#allocation46] sm:$0xff]  ;;  %v2406_v0 = vld [vmem:[#allocation46 + $0x8] sm:$0xff]  ;;  %v2407_v49 = vld [vmem:[#allocation46 + $0x10] sm:$0xff] }
 0x472   : > { %v6998_v35 = vmul.f32 %v5358_v46, %v1585_v59  ;;  %v7000_v32 = vmul.f32 %v5358_v46, %v1580_v28  ;;  %v7002_v36 = vmul.f32 %v5358_v46, %v1582_v52  ;;  %v7004_v23 = vmul.f32 %v5358_v46, %v1584_v41  ;;  %v2408_v52 = vld [vmem:[#allocation46 + $0x18] sm:$0xff] }
 0x473   : > { %2182 = vperm.xlu1 %5317, %v6979_v30   ;;  %1626 = vperm.xlu0 %5318, %v6989_v37   ;;  %v5100_v28 = vpack.c.bf16 %v2406_v0, %v2405_v15  ;;  %v5103_v21 = vpack.c.bf16 %v2408_v52, %v2407_v49  ;;  %v6178_v41 = vmov 269488144  }
 0x474   : > { %v1618_v58 = vunpack.c.l.s4 %v6178_v41 }
 0x475   : > { %5107 = vmatpush3.bf16.msra.mxu1 %v5100_v28  ;;  %5101 = vmatpush3.bf16.msra.mxu0 %v5100_v28 }
 0x476   : > { %5108 = vmatprep.subr.bf16.mxu1 %v7632_v8  ;;  %5102 = vmatprep.subr.bf16.mxu0 %v7632_v8  ;;  %v1619_v1 = vunpack.c.0.s8 %v1618_v58 }
 0x477   : > { %2206 = vperm.xlu1 %5317, %v6983_v2   ;;  %1650 = vperm.xlu0 %5318, %v6991_v4  }
 0x478   : > { %v7020_v59 = vsub.s32 %v1619_v1, %v6642_v34 }
 0x479   : > { %5110 = vmatpush3.bf16.msra.mxu1 %v5103_v21  ;;  %5104 = vmatpush3.bf16.msra.mxu0 %v5103_v21 }
 0x47a   : > { %5111 = vmatprep.subr.bf16.mxu0 %v7632_v8  ;;  %5117 = vmatprep.subr.bf16.mxu1 %v7632_v8 }
 0x47b   : > { %1614 = vperm.xlu1 %5317, %v6995_v31   ;;  %1674 = vperm.xlu0 %5318, %v6993_v29  }
 0x47f   : > { %1638 = vperm.xlu1 %5317, %v7000_v32   ;;  %1698 = vperm.xlu0 %5318, %v6998_v35  }
 0x483   : > { %1662 = vperm.xlu1 %5317, %v7002_v36  }
 0x487   : > { %1686 = vperm.xlu1 %5317, %v7004_v23  }
 0x4e6   : > { %v2159_v61 = vpop.permute.xlu0 %2158  ;;  %v2135_v45 = vpop.permute.xlu1 %2134 }
 0x4e7   : > { %v2143_v63 = vrot.slane %v2135_v45, %v7020_v59  ;;  %v2167_v5 = vrot.slane %v2159_v61, %v7020_v59 }
 0x4e9   : > { %v2228_v11 = vmul.f32 %v2143_v63, %v6672_v7  ;;  %v2230_v53 = vmul.f32 %v2167_v5, %v6676_v12 }
 0x4ea   : > { %v2195_v62 = vpop.permute.xlu0 %2194  ;;  %v2147_v57 = vpop.permute.xlu1 %2146 }
 0x4eb   : > { %v2155_v51 = vrot.slane %v2147_v57, %v7020_v59  ;;  %v2236_v28 = vsel %vm501_vm0, %v2228_v11, 0.0  ;;  %v2239_v41 = vsel %vm501_vm0, %v2230_v53, 0.0  ;;  %v2203_v58 = vrot.slane %v2195_v62, %v7020_v59 }
 0x4ed   : > { %v2229_v46 = vmul.f32 %v2155_v51, %v6674_v9  ;;  %v2233_v63 = vmul.f32 %v2203_v58, %v6709_v39 }
 0x4ee   : > { %v2219_v15 = vpop.permute.xlu0 %2218  ;;  %v2171_v0 = vpop.permute.xlu1 %2170 }
 0x4ef   : > { %v2237_v49 = vsel %vm501_vm0, %v2229_v46, 0.0  ;;  %v2179_v52 = vrot.slane %v2171_v0, %v7020_v59  ;;  %v2227_v5 = vrot.slane %v2219_v15, %v7020_v59  ;;  %v2245_v0 = vsel %vm501_vm0, %v2233_v63, 0.0 }
 0x4f0   : > { %v2238_v21 = vadd.f32 %v2237_v49, %v2236_v28 }
 0x4f1   : > { %v2231_v7 = vmul.f32 %v2179_v52, %v6678_v13  ;;  %v2235_v28 = vmul.f32 %v2227_v5, %v6714_v42 }
 0x4f2   : > { %v2240_v1 = vadd.f32 %v2239_v41, %v2238_v21  ;;  %v2183_v61 = vpop.permute.xlu1 %2182  ;;  %v1627_v45 = vpop.permute.xlu0 %1626 }
 0x4f3   : > { %v2241_v12 = vsel %vm501_vm0, %v2231_v7, 0.0  ;;  %v2191_v9 = vrot.slane %v2183_v61, %v7020_v59  ;;  %v1635_v49 = vrot.slane %v1627_v45, %v7020_v59  ;;  %v2249_v7 = vsel %vm501_vm0, %v2235_v28, 0.0 }
 0x4f4   : > { %v2242_v11 = vadd.f32 %v2241_v12, %v2240_v1 }
 0x4f5   : > { %v2232_v57 = vmul.f32 %v2191_v9, %v6707_v38  ;;  %v1709_v1 = vmul.f32 %v1635_v49, %v6718_v44 }
 0x4f6   : > { %v2207_v51 = vpop.permute.xlu1 %2206  ;;  %v1651_v13 = vpop.permute.xlu0 %1650 }
 0x4f7   : > { %v2243_v53 = vsel %vm501_vm0, %v2232_v57, 0.0  ;;  %v2215_v62 = vrot.slane %v2207_v51, %v7020_v59  ;;  %v1659_v61 = vrot.slane %v1651_v13, %v7020_v59  ;;  %v1717_v63 = vsel %vm501_vm0, %v1709_v1, 0.0 }
 0x4f8   : > { %v2244_v46 = vadd.f32 %v2243_v53, %v2242_v11 }
 0x4f9   : > { %v2234_v39 = vmul.f32 %v2215_v62, %v6711_v40  ;;  %v1711_v5 = vmul.f32 %v1659_v61, %v6727_v50  ;;  %v6179_v61 = vmov 1  }
 0x4fa   : > { %v2246_v52 = vadd.f32 %v2245_v0, %v2244_v46  ;;  %v1615_v15 = vpop.permute.xlu1 %1614  ;;  %v1675_v58 = vpop.permute.xlu0 %1674  ;;  %5320 = vset.pattern.permute.xlu1 %v6179_v61  ;;  %5319 = vset.pattern.permute.xlu0 %v6179_v61 }
 0x4fb   : > { %v2247_v38 = vsel %vm501_vm0, %v2234_v39, 0.0  ;;  %v1623_v21 = vrot.slane %v1615_v15, %v7020_v59  ;;  %v1683_v44 = vrot.slane %v1675_v58, %v7020_v59  ;;  %v1721_v46 = vsel %vm501_vm0, %v1711_v5, 0.0 }
 0x4fc   : > { %v2248_v41 = vadd.f32 %v2247_v38, %v2246_v52 }
 0x4fd   : > { %v1708_v42 = vmul.f32 %v1623_v21, %v6716_v43  ;;  %v1713_v0 = vmul.f32 %v1683_v44, %v6758_v24 }
 0x4fe   : > { %v7051_v12 = vadd.f32 %v2249_v7, %v2248_v41  ;;  %v1639_v9 = vpop.permute.xlu1 %1638  ;;  %v1699_v11 = vpop.permute.xlu0 %1698 }
 0x4ff   : > { %v1716_v40 = vsel %vm501_vm0, %v1708_v42, 0.0  ;;  %v1647_v45 = vrot.slane %v1639_v9, %v7020_v59  ;;  %v1707_v50 = vrot.slane %v1699_v11, %v7020_v59  ;;  %v1725_v38 = vsel %vm501_vm0, %v1713_v0, 0.0  ;;  %v2610_v11 = vld [vmem:[%s7633_s6 + $0x20] sm:$0xff] }
 0x500   : > { %4863 = vmatmul.mubr.msk.f32.vlgmr.msra.gmra.mrb[8].mxu1 %vm772_vm6, %v7051_v12  ;;  %v1718_v43 = vadd.f32 %v1717_v63, %v1716_v40 }
 0x501   : > { %v1710_v57 = vmul.f32 %v1647_v45, %v6725_v48  ;;  %4884 = vmatprep.mubr.msk.f32.mxu1 %vm6174_vm1, %v7631_v47  ;;  %v1715_v21 = vmul.f32 %v1707_v50, %v6762_v26  ;;  %v4561_v26 = vld [vmem:[#allocation48] ss:$0 sm:$0xff] }
 0x502   : > { %v1663_v51 = vpop.permute.xlu1 %1662 }
 0x503   : > { %v1719_v53 = vsel %vm501_vm0, %v1710_v57, 0.0  ;;  %v1671_v62 = vrot.slane %v1663_v51, %v7020_v59  ;;  %v1729_v1 = vsel %vm501_vm0, %v1715_v21, 0.0  ;;  %v2611_v51 = vld [vmem:[%s7633_s6 + $0x28] sm:$0xff]  ;;  %v2609_v21 = vld [vmem:[%s7633_s6 + $0x18] sm:$0xff] }
 0x504   : > { %v1720_v13 = vadd.f32 %v1719_v53, %v1718_v43 }
 0x505   : > { %v1712_v28 = vmul.f32 %v1671_v62, %v6753_v18  ;;  %v5112_v62 = vpack.c.bf16 %v2611_v51, %v2610_v11 }
 0x506   : > { %v1722_v48 = vadd.f32 %v1721_v46, %v1720_v13  ;;  %v1687_v49 = vpop.permute.xlu1 %1686  ;;  %v2612_v13 = vld [vmem:[%s7633_s6 + $0x30] sm:$0xff]  ;;  %v2613_v46 = vld [vmem:[%s7633_s6 + $0x38] sm:$0xff] }
 0x507   : > { %v1723_v39 = vsel %vm501_vm0, %v1712_v28, 0.0  ;;  %v1695_v52 = vrot.slane %v1687_v49, %v7020_v59  ;;  %v5115_v0 = vpack.c.bf16 %v2613_v46, %v2612_v13  ;;  %v7634_v49 = vmov 0   ;;  %v5420_v13 = vld [vmem:[#allocation3 + $0x2] sm:$0x3] }
 0x508   : > { %v1724_v15 = vadd.f32 %v1723_v39, %v1722_v48  ;;  %v2606_v39 = vld [vmem:[%s7633_s6] sm:$0xff] }
 0x509   : > { %v1714_v41 = vmul.f32 %v1695_v52, %v6760_v25  ;;  %v2607_v52 = vld [vmem:[%s7633_s6 + $0x8] sm:$0xff] }
 0x50a   : > { %v1726_v58 = vadd.f32 %v1725_v38, %v1724_v15  ;;  %v2608_v15 = vld [vmem:[%s7633_s6 + $0x10] sm:$0xff]  ;;  %v5118_v38 = vpack.c.bf16 %v2607_v52, %v2606_v39 }
 0x50b   : > { %v1727_v24 = vsel %vm501_vm0, %v1714_v41, 0.0  ;;  %v5121_v41 = vpack.c.bf16 %v2609_v21, %v2608_v15  ;;  %v5421_v39 = vld [vmem:[#allocation3 + $0x4] sm:$0x3]  ;;  %v5422_v21 = vld [vmem:[#allocation3 + $0x6] sm:$0x3] }
 0x50c   : > { %v1728_v7 = vadd.f32 %v1727_v24, %v1726_v58  ;;  %5119 = vmatpush3.bf16.msra.mxu1 %v5118_v38 }
 0x50d   : > { %5120 = vmatprep.subr.bf16.mxu1 %v7632_v8 }
 0x50e   : > { %v7076_v18 = vadd.f32 %v1729_v1, %v1728_v7 }
 0x510   : > { %4852 = vmatmul.mubr.msk.f32.vlgmr.msra.gmra.mrb[8].mxu0 %vm772_vm6, %v7076_v18  ;;  %5122 = vmatpush3.bf16.msra.mxu1 %v5121_v41 }
 0x511   : > { %4873 = vmatprep.mubr.msk.f32.mxu0 %vm6174_vm1, %v7631_v47  ;;  %5113 = vmatpush3.bf16.msra.mxu0 %v5112_v62 }
 0x512   : > { %5114 = vmatprep.subr.bf16.mxu0 %v7632_v8  ;;  %5129 = vmatprep.subr.bf16.mxu1 %v7632_v8 }
 0x515   : > { %5116 = vmatpush3.bf16.msra.mxu0 %v5115_v0 }
 0x516   : > { %5123 = vmatprep.subr.bf16.mxu0 %v7632_v8 }
 0x5d3   : > { %v2558_v42 = vpop.f32.mrb[8].mxu1 }
 0x5d4   : > { %v2559_v25 = vadd.f32 %v4561_v26, %v2558_v42  ;;  %v4864_v9 = vpop.f32.mrb[9].mxu1 }
 0x5d6   : > { %v2574_v40 = vmul.f32 %v2559_v25, %v7051_v12  ;;  %v2570_v45 = vmul.f32 %v2559_v25, %v7076_v18 }
 0x5d8   : > { %v2575_v63 = vsel %vm501_vm0, %v2574_v40, 0.0  ;;  %v2571_v5 = vsel %vm501_vm0, %v2570_v45, 0.0 }
 0x5d9   : > { %2576 = vadd.xlane.f32.xlu0 %v2575_v63  ;;  %2572 = vadd.xlane.f32.xlu1 %v2571_v5 }
 0x5e3   : > { %v2485_v44 = vpop.f32.mrb[8].mxu0 }
 0x5e4   : > { %v4853_v57 = vpop.f32.mrb[9].mxu0  ;;  %v2486_v43 = vadd.f32 %v4561_v26, %v2485_v44 }
 0x5e6   : > { %v2562_v53 = vmul.f32 %v2486_v43, %v7076_v18  ;;  %v2566_v28 = vmul.f32 %v2486_v43, %v7051_v12 }
 0x5e8   : > { %v2563_v50 = vsel %vm501_vm0, %v2562_v53, 0.0  ;;  %v2567_v48 = vsel %vm501_vm0, %v2566_v28, 0.0  ;;  %v5419_v53 = vld [vmem:[#allocation3] sm:$0x3] }
 0x5ea   : > { %2263 = vperm.xlu1 %5320, %v6971_v17  }
 0x5ee   : > { %2274 = vperm.xlu1 %5320, %v6963_v16  }
 0x5ef   : > { %2252 = vperm.xlu0 %5319, %v6966_v33  }
 0x5f2   : > { %2285 = vperm.xlu1 %5320, %v6976_v10  }
 0x5f6   : > { %2296 = vperm.xlu1 %5320, %v6979_v30  }
 0x5fa   : > { %2307 = vperm.xlu1 %5320, %v6968_v19  }
 0x5fe   : > { %2318 = vperm.xlu1 %5320, %v6983_v2  }
 0x602   : > { %2329 = vperm.xlu1 %5320, %v6973_v27  }
 0x606   : > { %1732 = vperm.xlu1 %5320, %v6995_v31  }
 0x60e   : > { %2564 = vadd.xlane.f32.xlu0 %v2563_v50 }
 0x624   : > { %1743 = vperm.xlu0 %5319, %v6989_v37  }
 0x628   : > { %1765 = vperm.xlu0 %5319, %v6991_v4  }
 0x62a   : > { %2568 = vadd.xlane.f32.xlu1 %v2567_v48 }
 0x62c   : > { %1787 = vperm.xlu0 %5319, %v6993_v29  }
 0x630   : > { %1809 = vperm.xlu0 %5319, %v6998_v35  }
 0x634   : > { %5321 = vset.pattern.permute.xlu0 %v7634_v49 }
 0x63b   : > { %1754 = vperm.xlu1 %5320, %v7000_v32  }
 0x63f   : > { %1776 = vperm.xlu1 %5320, %v7002_v36  }
 0x643   : > { %1798 = vperm.xlu1 %5320, %v7004_v23  }
 0x647   : > { %5322 = vset.pattern.permute.xlu1 %v7634_v49 }
 0x666   : > { %v2577_v58 = vpop.xlane.xlu0 %2576  ;;  %v2573_v24 = vpop.xlane.xlu1 %2572 }
 0x667   : > { %v2589_v7 = vmax.f32 %v2573_v24, %v2577_v58 }
 0x669   : > { %v2590_v1 = vsub.f32 %v2573_v24, %v2589_v7  ;;  %v2593_v61 = vsub.f32 %v2577_v58, %v2589_v7 }
 0x66a   : > { %v2264_v26 = vpop.permute.xlu1 %2263 }
 0x66b   : > { %v2591_v42 = vmul.f32 1.442695, %v2590_v1  ;;  %v2594_v25 = vmul.f32 1.442695, %v2593_v61  ;;  %v2272_v11 = vrot.slane %v2264_v26, %v7020_v59  ;;  %v5423_v61 = vld [vmem:[#allocation3 + $0x8] sm:$0x3] }
 0x66d   : > { %5359 = vpow2.f32 %v2591_v42  ;;  %v2340_v46 = vmul.f32 %v5420_v13, %v2272_v11 }
 0x66e   : > { %5361 = vpow2.f32 %v2594_v25  ;;  %v2275_v9 = vpop.permute.xlu1 %2274  ;;  %v2253_v45 = vpop.permute.xlu0 %2252 }
 0x66f   : > { %v2261_v44 = vrot.slane %v2253_v45, %v7020_v59  ;;  %v2283_v0 = vrot.slane %v2275_v9, %v7020_v59  ;;  %v2348_v49 = vsel %vm501_vm0, %v2340_v46, 0.0  ;;  %v2770_v45 = vld [vmem:[%s7635_s18] sm:$0xff]  ;;  %v5425_v46 = vld [vmem:[#allocation3 + $0xc] sm:$0x3] }
 0x671   : > { %v2339_v62 = vmul.f32 %v5419_v53, %v2261_v44  ;;  %v2341_v52 = vmul.f32 %v5421_v39, %v2283_v0  ;;  %v5426_v39 = vld [vmem:[#allocation3 + $0xe] sm:$0x3] }
 0x672   : > { %v2286_v40 = vpop.permute.xlu1 %2285 }
 0x673   : > { %v2347_v28 = vsel %vm501_vm0, %v2339_v62, 0.0  ;;  %v2294_v48 = vrot.slane %v2286_v40, %v7020_v59  ;;  %v2350_v1 = vsel %vm501_vm0, %v2341_v52, 0.0 }
 0x674   : > { %v2349_v38 = vadd.f32 %v2348_v49, %v2347_v28  ;;  %v2772_v28 = vld [vmem:[%s7635_s18 + $0x10] sm:$0xff] }
 0x675   : > { %v2342_v41 = vmul.f32 %v5422_v21, %v2294_v48  ;;  %v2773_v48 = vld [vmem:[%s7635_s18 + $0x18] sm:$0xff] }
 0x676   : > { %v2297_v63 = vpop.permute.xlu1 %2296  ;;  %v2351_v40 = vadd.f32 %v2350_v1, %v2349_v38  ;;  %v7145_v21 = vpack.c.bf16 %v2773_v48, %v2772_v28 }
 0x677   : > { %v5360_v5 = vpop.eup %5359  ;;  %v2305_v15 = vrot.slane %v2297_v63, %v7020_v59  ;;  %v2771_v63 = vld [vmem:[%s7635_s18 + $0x8] sm:$0xff]  ;;  %v2352_v44 = vsel %vm501_vm0, %v2342_v41, 0.0 }
 0x678   : > { %v5362_v57 = vpop.eup %5361  ;;  %v2353_v0 = vadd.f32 %v2352_v44, %v2351_v40 }
 0x679   : > { %v2596_v43 = vadd.f32 %v5362_v57, %v5360_v5  ;;  %v2343_v26 = vmul.f32 %v5423_v61, %v2305_v15 }
 0x67a   : > { %v2308_v51 = vpop.permute.xlu1 %2307 }
 0x67b   : > { %5363 = vrcp.f32 %v2596_v43  ;;  %v2316_v58 = vrot.slane %v2308_v51, %v7020_v59  ;;  %v5424_v43 = vld [vmem:[#allocation3 + $0xa] sm:$0x3]  ;;  %v2354_v13 = vsel %vm501_vm0, %v2343_v26, 0.0 }
 0x67c   : > { %v2355_v15 = vadd.f32 %v2354_v13, %v2353_v0 }
 0x67d   : > { %v2344_v11 = vmul.f32 %v5424_v43, %v2316_v58 }
 0x67e   : > { %v2319_v50 = vpop.permute.xlu1 %2318 }
 0x67f   : > { %v2327_v42 = vrot.slane %v2319_v50, %v7020_v59  ;;  %v2356_v49 = vsel %vm501_vm0, %v2344_v11, 0.0 }
 0x680   : > { %v2357_v41 = vadd.f32 %v2356_v49, %v2355_v15 }
 0x682   : > { %v2330_v24 = vpop.permute.xlu1 %2329 }
 0x683   : > { %v2338_v51 = vrot.slane %v2330_v24, %v7020_v59 }
 0x685   : > { %v5364_v7 = vpop.eup %5363  ;;  %v2346_v52 = vmul.f32 %v5426_v39, %v2338_v51 }
 0x686   : > { %v2598_v25 = vmul.f32 %v5364_v7, %v5360_v5  ;;  %v2599_v9 = vmul.f32 %v5364_v7, %v5362_v57  ;;  %v2345_v5 = vmul.f32 %v5425_v46, %v2327_v42  ;;  %v7137_v57 = vpack.c.bf16 %v2771_v63, %v2770_v45  ;;  %v1733_v1 = vpop.permute.xlu1 %1732 }
 0x687   : > { %v2360_v58 = vsel %vm501_vm0, %v2346_v52, 0.0  ;;  %v1741_v11 = vrot.slane %v1733_v1, %v7020_v59  ;;  %v5430_v1 = vld [vmem:[#allocation2 + $0x6] sm:$0x3] }
 0x688   : > { %v2603_v53 = vmul.f32 %v2598_v25, %v7076_v18  ;;  %v2604_v62 = vmul.f32 %v2599_v9, %v7051_v12  ;;  %v2358_v38 = vsel %vm501_vm0, %v2345_v5, 0.0  ;;  %v5428_v5 = vld [vmem:[#allocation2] sm:$0x3] }
 0x689   : > { %v2359_v24 = vadd.f32 %v2358_v38, %v2357_v41  ;;  %v1819_v0 = vmul.f32 %v5428_v5, %v1741_v11 }
 0x68a   : > { %v2605_v50 = vadd.f32 %v2604_v62, %v2603_v53  ;;  %v5427_v53 = vld [vmem:[#allocation2 + $0x2] sm:$0x3] }
 0x68b   : > { %v7152_v7 = vadd.f32 %v2360_v58, %v2359_v24  ;;  %v1827_v38 = vsel %vm501_vm0, %v1819_v0, 0.0 }
 0x68c   : > { %4874 = vmatmul.mubr.msk.f32.vlgmr.msra.gmra.mrb[10].mxu0 %vm772_vm6, %v2605_v50  ;;  %v5429_v50 = vld [vmem:[#allocation2 + $0x4] sm:$0x3] }
 0x68d   : > { %5125 = vmatpush3.bf16.msra.mxu0 %v7137_v57  ;;  %4895 = vmatprep.mubr.msk.f32.mxu0 %vm6174_vm1, %v7631_v47 }
 0x68e   : > { %5126 = vmatprep.subr.bf16.mxu0 %v7632_v8 }
 0x691   : > { %5128 = vmatpush3.bf16.msra.mxu0 %v7145_v21 }
 0x692   : > { %5135 = vmatprep.subr.bf16.mxu0 %v7632_v8 }
 0x694   : > { %4896 = vmatmul.mubr.msk.f32.vlgmr.msra.gmra.mrb[12].mxu0 %vm772_vm6, %v7152_v7 }
 0x695   : > { %4917 = vmatprep.mubr.msk.f32.mxu0 %vm6174_vm1, %v7631_v47 }
 0x69b   : > { %v2565_v61 = vpop.xlane.xlu0 %2564 }
 0x6a3   : > { %v1744_v63 = vpop.permute.xlu0 %1743 }
 0x6a4   : > { %v1752_v43 = vrot.slane %v1744_v63, %v7020_v59 }
 0x6a6   : > { %v1820_v62 = vmul.f32 %v5427_v53, %v1752_v43  ;;  %v5432_v53 = vld [vmem:[#allocation2 + $0xa] sm:$0x3] }
 0x6a7   : > { %v1766_v13 = vpop.permute.xlu0 %1765 }
 0x6a8   : > { %v1828_v39 = vsel %vm501_vm0, %v1820_v62, 0.0  ;;  %v1774_v52 = vrot.slane %v1766_v13, %v7020_v59 }
 0x6a9   : > { %v1829_v24 = vadd.f32 %v1828_v39, %v1827_v38 }
 0x6b7   : > { %v2569_v26 = vpop.xlane.xlu1 %2568 }
 0x6b8   : > { %v2578_v42 = vmax.f32 %v2565_v61, %v2569_v26 }
 0x6ba   : > { %v2579_v25 = vsub.f32 %v2565_v61, %v2578_v42  ;;  %v2582_v9 = vsub.f32 %v2569_v26, %v2578_v42  ;;  %v1822_v61 = vmul.f32 %v5430_v1, %v1774_v52  ;;  %v1788_v26 = vpop.permute.xlu0 %1787  ;;  %v5434_v1 = vld [vmem:[#allocation2 + $0xe] sm:$0x3] }
 0x6bb   : > { %v1755_v44 = vpop.permute.xlu1 %1754  ;;  %v1796_v63 = vrot.slane %v1788_v26, %v7020_v59 }
 0x6bc   : > { %v2580_v40 = vmul.f32 1.442695, %v2579_v25  ;;  %v2583_v45 = vmul.f32 1.442695, %v2582_v9  ;;  %v1763_v51 = vrot.slane %v1755_v44, %v7020_v59  ;;  %v5431_v25 = vld [vmem:[#allocation2 + $0x8] sm:$0x3] }
 0x6bd   : > { %v1824_v62 = vmul.f32 %v5432_v53, %v1796_v63  ;;  %v2971_v63 = vld [vmem:[%s7636_s13] sm:$0xff] }
 0x6be   : > { %5365 = vpow2.f32 %v2580_v40  ;;  %v1821_v28 = vmul.f32 %v5429_v50, %v1763_v51  ;;  %v1810_v13 = vpop.permute.xlu0 %1809 }
 0x6bf   : > { %5367 = vpow2.f32 %v2583_v45  ;;  %v1777_v49 = vpop.permute.xlu1 %1776  ;;  %v1832_v45 = vsel %vm501_vm0, %v1822_v61, 0.0  ;;  %v1818_v38 = vrot.slane %v1810_v13, %v7020_v59  ;;  %v4567_v61 = vld [vmem:[#allocation49] ss:$0 sm:$0xff] }
 0x6c0   : > { %v1830_v41 = vsel %vm501_vm0, %v1821_v28, 0.0  ;;  %v1785_v58 = vrot.slane %v1777_v49, %v7020_v59  ;;  %v5433_v28 = vld [vmem:[#allocation2 + $0xc] sm:$0x3] }
 0x6c1   : > { %v1831_v42 = vadd.f32 %v1830_v41, %v1829_v24 }
 0x6c2   : > { %v1823_v9 = vmul.f32 %v5431_v25, %v1785_v58 }
 0x6c3   : > { %v1799_v40 = vpop.permute.xlu1 %1798  ;;  %v1833_v44 = vadd.f32 %v1832_v45, %v1831_v42 }
 0x6c4   : > { %v1834_v43 = vsel %vm501_vm0, %v1823_v9, 0.0  ;;  %v1807_v11 = vrot.slane %v1799_v40, %v7020_v59 }
 0x6c5   : > { %v1835_v50 = vadd.f32 %v1834_v43, %v1833_v44  ;;  %v2972_v44 = vld [vmem:[%s7636_s13 + $0x8] sm:$0xff]  ;;  %v2973_v43 = vld [vmem:[%s7636_s13 + $0x10] sm:$0xff] }
 0x6c6   : > { %v1825_v49 = vmul.f32 %v5433_v28, %v1807_v11  ;;  %v5142_v11 = vpack.c.bf16 %v2972_v44, %v2971_v63  ;;  %v3305_v44 = vld [vmem:[#allocation28] sm:$0xff] }
 0x6c8   : > { %v5366_v46 = vpop.eup %5365  ;;  %v1838_v24 = vsel %vm501_vm0, %v1825_v49, 0.0 }
 0x6c9   : > { %v5368_v48 = vpop.eup %5367 }
 0x6ca   : > { %v2585_v15 = vadd.f32 %v5368_v48, %v5366_v46 }
 0x6cc   : > { %5369 = vrcp.f32 %v2585_v15  ;;  %v1836_v15 = vsel %vm501_vm0, %v1824_v62, 0.0 }
 0x6cd   : > { %v1837_v41 = vadd.f32 %v1836_v15, %v1835_v50 }
 0x6d6   : > { %v5370_v51 = vpop.eup %5369 }
 0x6d7   : > { %v2587_v5 = vmul.f32 %v5370_v51, %v5366_v46  ;;  %v2588_v0 = vmul.f32 %v5370_v51, %v5368_v48  ;;  %v1826_v46 = vmul.f32 %v5434_v1, %v1818_v38  ;;  %v2974_v51 = vld [vmem:[%s7636_s13 + $0x18] sm:$0xff]  ;;  %v2975_v38 = vld [vmem:[%s7636_s13 + $0x20] sm:$0xff] }
 0x6d8   : > { %v5145_v53 = vpack.c.bf16 %v2974_v51, %v2973_v43  ;;  %v2978_v1 = vld [vmem:[%s7636_s13 + $0x38] sm:$0xff] }
 0x6d9   : > { %v2600_v39 = vmul.f32 %v2587_v5, %v7076_v18  ;;  %v2601_v52 = vmul.f32 %v2588_v0, %v7051_v12  ;;  %v1839_v18 = vadd.f32 %v1838_v24, %v1837_v41  ;;  %v1840_v12 = vsel %vm501_vm0, %v1826_v46, 0.0  ;;  %v2976_v41 = vld [vmem:[%s7636_s13 + $0x28] sm:$0xff]  ;;  %v3306_v43 = vld [vmem:[#allocation28 + $0x8] sm:$0xff] }
 0x6da   : > { %v5136_v24 = vpack.c.bf16 %v2976_v41, %v2975_v38 }
 0x6db   : > { %v2602_v58 = vadd.f32 %v2601_v52, %v2600_v39  ;;  %v7183_v59 = vadd.f32 %v1840_v12, %v1839_v18 }
 0x6dc   : > { %5137 = vmatpush3.bf16.msra.mxu0 %v5136_v24 }
 0x6dd   : > { %4885 = vmatmul.mubr.msk.f32.vlgmr.msra.gmra.mrb[10].mxu1 %vm772_vm6, %v2602_v58  ;;  %v2977_v58 = vld [vmem:[%s7636_s13 + $0x30] sm:$0xff]  ;;  %5138 = vmatprep.subr.bf16.mxu0 %v7632_v8 }
 0x6de   : > { %5131 = vmatpush3.bf16.msra.mxu1 %v7137_v57  ;;  %4906 = vmatprep.mubr.msk.f32.mxu1 %vm6174_vm1, %v7631_v47  ;;  %v5139_v46 = vpack.c.bf16 %v2978_v1, %v2977_v58 }
 0x6df   : > { %5132 = vmatprep.subr.bf16.mxu1 %v7632_v8 }
 0x6e0   : > { %5140 = vmatpush3.bf16.msra.mxu0 %v5139_v46 }
 0x6e1   : > { %5147 = vmatprep.subr.bf16.mxu0 %v7632_v8 }
 0x6e2   : > { %5134 = vmatpush3.bf16.msra.mxu1 %v7145_v21 }
 0x6e3   : > { %5141 = vmatprep.subr.bf16.mxu1 %v7632_v8 }
 0x6e5   : > { %4907 = vmatmul.mubr.msk.f32.vlgmr.msra.gmra.mrb[12].mxu1 %vm772_vm6, %v7183_v59 }
 0x6e6   : > { %4928 = vmatprep.mubr.msk.f32.mxu1 %vm6174_vm1, %v7631_v47  ;;  %5143 = vmatpush3.bf16.msra.mxu1 %v5142_v11 }
 0x6e7   : > { %5144 = vmatprep.subr.bf16.mxu1 %v7632_v8 }
 0x6ea   : > { %5146 = vmatpush3.bf16.msra.mxu1 %v5145_v53  ;;  %v5160_v53 = vpack.c.bf16 %v3306_v43, %v3305_v44  ;;  %v3146_v44 = vld [vmem:[%s7637_s22 + $0x18] sm:$0xff]  ;;  %v4566_v43 = vld [vmem:[%s7638_s9] ss:$0 sm:$0xff] }
 0x6eb   : > { %5159 = vmatprep.subr.bf16.mxu1 %v7632_v8 }
 0x75f   : > { %v2683_v57 = vpop.f32.mrb[10].mxu0 }
 0x760   : > { %v4875_v48 = vpop.f32.mrb[11].mxu0 }
 0x767   : > { %v2850_v26 = vpop.f32.mrb[12].mxu0 }
 0x768   : > { %v2851_v42 = vadd.f32 %v4567_v61, %v2850_v26  ;;  %v4897_v21 = vpop.f32.mrb[13].mxu0 }
 0x76a   : > { %v2931_v25 = vmul.f32 %v2851_v42, %v7183_v59  ;;  %v2927_v9 = vmul.f32 %v2851_v42, %v7152_v7 }
 0x76c   : > { %v2932_v40 = vsel %vm501_vm0, %v2931_v25, 0.0  ;;  %v2928_v45 = vsel %vm501_vm0, %v2927_v9, 0.0 }
 0x76d   : > { %2933 = vadd.xlane.f32.xlu0 %v2932_v40  ;;  %2929 = vadd.xlane.f32.xlu1 %v2928_v45 }
 0x7b0   : > { %v2756_v62 = vpop.f32.mrb[10].mxu1 }
 0x7b1   : > { %v7200_v13 = vadd.f32 %v2756_v62, %v2683_v57  ;;  %v4886_v5 = vpop.f32.mrb[11].mxu1 }
 0x7b2   : > { %v3307_v5 = vld [vmem:[#allocation28 + $0x10] sm:$0xff] }
 0x7b8   : > { %v2923_v0 = vpop.f32.mrb[12].mxu1 }
 0x7b9   : > { %v2924_v50 = vadd.f32 %v4567_v61, %v2923_v0  ;;  %v4908_v28 = vpop.f32.mrb[13].mxu1  ;;  %v3308_v0 = vld [vmem:[#allocation28 + $0x18] sm:$0xff] }
 0x7ba   : > { %v7216_v28 = vld [vmem:[#allocation6 + $0x2] sm:$0x3] }
 0x7bb   : > { %v2935_v49 = vmul.f32 %v2924_v50, %v7152_v7  ;;  %v2939_v39 = vmul.f32 %v2924_v50, %v7183_v59  ;;  %v7214_v50 = vld [vmem:[#allocation6] sm:$0x3] }
 0x7bd   : > { %v2936_v52 = vsel %vm501_vm0, %v2935_v49, 0.0  ;;  %v2940_v15 = vsel %vm501_vm0, %v2939_v39, 0.0  ;;  %v3318_v49 = vcombine.low %v7214_v50, %v7216_v28  ;;  %v5163_v39 = vpack.c.bf16 %v3308_v0, %v3307_v5  ;;  %v3229_v0 = vld [vmem:[%s7637_s22 + $0x30] sm:$0xff] }
 0x7be   : > { %2937 = vadd.xlane.f32.xlu0 %v2936_v52  ;;  %2941 = vadd.xlane.f32.xlu1 %v2940_v15 }
 0x7bf   : > { %v7225_v52 = vrot.slane %v3318_v49, %v6685_v20  ;;  %v3230_v49 = vld [vmem:[%s7637_s22 + $0x38] sm:$0xff] }
 0x7fa   : > { %v2934_v18 = vpop.xlane.xlu0 %2933  ;;  %v2930_v12 = vpop.xlane.xlu1 %2929 }
 0x7fb   : > { %v2943_v57 = vmax.f32 %v2930_v12, %v2934_v18 }
 0x7fd   : > { %v2944_v48 = vsub.f32 %v2930_v12, %v2943_v57  ;;  %v2947_v61 = vsub.f32 %v2934_v18, %v2943_v57 }
 0x7ff   : > { %v2945_v26 = vmul.f32 1.442695, %v2944_v48  ;;  %v2948_v42 = vmul.f32 1.442695, %v2947_v61 }
 0x801   : > { %5371 = vpow2.f32 %v2945_v26 }
 0x802   : > { %5373 = vpow2.f32 %v2948_v42  ;;  %v3143_v42 = vld [vmem:[%s7637_s22] sm:$0xff] }
 0x80b   : > { %v5372_v21 = vpop.eup %5371 }
 0x80c   : > { %v5374_v25 = vpop.eup %5373 }
 0x80d   : > { %v2950_v9 = vadd.f32 %v5374_v25, %v5372_v21 }
 0x80f   : > { %5375 = vrcp.f32 %v2950_v9 }
 0x819   : > { %v5376_v40 = vpop.eup %5375 }
 0x81a   : > { %v2952_v45 = vmul.f32 %v5376_v40, %v5372_v21  ;;  %v2953_v63 = vmul.f32 %v5376_v40, %v5374_v25  ;;  %v3144_v21 = vld [vmem:[%s7637_s22 + $0x8] sm:$0xff] }
 0x81b   : > { %v5148_v40 = vpack.c.bf16 %v3144_v21, %v3143_v42 }
 0x81c   : > { %v2965_v11 = vmul.f32 %v2952_v45, %v7152_v7  ;;  %v2966_v51 = vmul.f32 %v2953_v63, %v7183_v59  ;;  %v3145_v63 = vld [vmem:[%s7637_s22 + $0x10] sm:$0xff] }
 0x81e   : > { %v2967_v62 = vadd.f32 %v2966_v51, %v2965_v11  ;;  %v5151_v11 = vpack.c.bf16 %v3146_v44, %v3145_v63  ;;  %v3228_v51 = vld [vmem:[%s7637_s22 + $0x28] sm:$0xff] }
 0x820   : > { %4929 = vmatmul.mubr.msk.f32.vlgmr.msra.gmra.mrb[14].mxu1 %vm772_vm6, %v2967_v62  ;;  %v7248_v62 = vstv %s2404_s26  ;;  %s4257_s26 = scalar_lea.vmem [#allocation3], %s6611_s7 }
 0x821   : > { %5161 = vmatpush3.bf16.msra.mxu1 %v5160_v53  ;;  %4961 = vmatprep.mubr.msk.f32.mxu1 %vm6174_vm1, %v7631_v47  ;;  %v2767_v53 = vadd.f32 %v4566_v43, %v7200_v13 }
 0x822   : > { %5162 = vmatprep.subr.bf16.mxu1 %v7632_v8 }
 0x825   : > { %5164 = vmatpush3.bf16.msra.mxu1 %v5163_v39 }
 0x826   : > { %5165 = vmatprep.subr.bf16.mxu1 %v7632_v8 }
 0x828   : > { %4962 = vmatmul.mubr.msk.f32.vlgmr.msra.gmra.mrb[16].mxu1 %vm772_vm6, %v7225_v52 }
 0x829   : > { %4972 = vmatprep.mubr.msk.f32.mxu1 %vm6174_vm1, %v7631_v47 }
 0x84b   : > { %v2938_v15 = vpop.xlane.xlu0 %2937  ;;  %v2942_v38 = vpop.xlane.xlu1 %2941 }
 0x84c   : > { %v2954_v41 = vmax.f32 %v2938_v15, %v2942_v38 }
 0x84e   : > { %v2955_v58 = vsub.f32 %v2938_v15, %v2954_v41  ;;  %v2958_v24 = vsub.f32 %v2942_v38, %v2954_v41  ;;  %v2769_v15 = vmul.f32 %v7248_v62, %v2767_v53  ;;  %v5157_v38 = vpack.c.bf16 %v3230_v49, %v3229_v0  ;;  %v3574_v0 = vld [vmem:[#allocation37 + $0x8] sm:$0xff]  ;;  %v3575_v49 = vld [vmem:[#allocation37 + $0x10] sm:$0xff] }
 0x850   : > { %v2956_v1 = vmul.f32 1.442695, %v2955_v58  ;;  %v2959_v46 = vmul.f32 1.442695, %v2958_v24  ;;  %v3139_v13 = vrot.slane %v2769_v15, 6 }
 0x851   : > { %v4576_v24 = vld [vmem:[#allocation31] ss:$0 sm:$0xff] }
 0x852   : > { %5377 = vpow2.f32 %v2956_v1  ;;  %v3141_v41 = vsel %vm3136_vm2, %v2769_v15, %v3139_v13  ;;  %v3576_v13 = vld [vmem:[#allocation37 + $0x18] sm:$0xff] }
 0x853   : > { %5379 = vpow2.f32 %v2959_v46 }
 0x85c   : > { %v5378_v18 = vpop.eup %5377 }
 0x85d   : > { %v5380_v12 = vpop.eup %5379 }
 0x85e   : > { %v2961_v57 = vadd.f32 %v5380_v12, %v5378_v18 }
 0x860   : > { %5381 = vrcp.f32 %v2961_v57 }
 0x86a   : > { %v5382_v48 = vpop.eup %5381 }
 0x86b   : > { %v2963_v61 = vmul.f32 %v5382_v48, %v5378_v18  ;;  %v2964_v26 = vmul.f32 %v5382_v48, %v5380_v12 }
 0x86d   : > { %v2968_v25 = vmul.f32 %v2963_v61, %v7152_v7  ;;  %v2969_v9 = vmul.f32 %v2964_v26, %v7183_v59  ;;  %v3227_v7 = vld [vmem:[%s7637_s22 + $0x20] sm:$0xff]  ;;  %v3134_v59 = vrot.slane %v6680_v14, 6  ;;  %v4574_v61 = vld [vmem:[#allocation30] ss:$0 sm:$0xff] }
 0x86e   : > { %v5154_v5 = vpack.c.bf16 %v3228_v51, %v3227_v7 }
 0x86f   : > { %v2970_v45 = vadd.f32 %v2969_v9, %v2968_v25  ;;  %v3137_v39 = vsel %vm3136_vm2, %v6680_v14, %v3134_v59 }
 0x871   : > { %4918 = vmatmul.mubr.msk.f32.vlgmr.msra.gmra.mrb[14].mxu0 %vm772_vm6, %v2970_v45 }
 0x872   : > { %5149 = vmatpush3.bf16.msra.mxu0 %v5148_v40  ;;  %4939 = vmatprep.mubr.msk.f32.mxu0 %vm6174_vm1, %v7631_v47 }
 0x873   : > { %5150 = vmatprep.subr.bf16.mxu0 %v7632_v8 }
 0x876   : > { %5152 = vmatpush3.bf16.msra.mxu0 %v5151_v11  ;;  %v7639_v11 = vsub.s32 1, %v6642_v34 }
 0x877   : > { %5153 = vmatprep.subr.bf16.mxu0 %v7632_v8 }
 0x879   : > { %4940 = vmatmul.mubr.msk.f32.vlgmr.msra.gmra.mrb[16].mxu0 %vm772_vm6, %v3137_v39  ;;  %v7641_v39 = vsub.s32 0, %v6642_v34 }
 0x87a   : > { %5155 = vmatpush3.bf16.msra.mxu0 %v5154_v5  ;;  %4950 = vmatprep.mubr.msk.f32.mxu0 %vm6174_vm1, %v7631_v47  ;;  %v3573_v5 = vld [vmem:[#allocation37] sm:$0xff] }
 0x87b   : > { %5156 = vmatprep.subr.bf16.mxu0 %v7632_v8 }
 0x87e   : > { %5158 = vmatpush3.bf16.msra.mxu0 %v5157_v38  ;;  %v5172_v38 = vpack.c.bf16 %v3574_v0, %v3573_v5 }
 0x87f   : > { %5171 = vmatprep.subr.bf16.mxu0 %v7632_v8 }
 0x881   : > { %4951 = vmatmul.mubr.msk.f32.vlgmr.msra.gmra.mrb[16].mxu0 %vm772_vm6, %v3141_v41  ;;  %v5175_v41 = vpack.c.bf16 %v3576_v13, %v3575_v49 }
 0x882   : > { %4983 = vmatprep.mubr.msk.f32.mxu0 %vm6174_vm1, %v7631_v47  ;;  %5173 = vmatpush3.bf16.msra.mxu0 %v5172_v38 }
 0x883   : > { %5174 = vmatprep.subr.bf16.mxu0 %v7632_v8 }
 0x886   : > { %5176 = vmatpush3.bf16.msra.mxu0 %v5175_v41 }
 0x887   : > { %5189 = vmatprep.subr.bf16.mxu0 %v7632_v8 }
 0x8f3   : > { %v3121_v14 = vpop.f32.mrb[14].mxu1 }
 0x8f4   : > { %v4930_v58 = vpop.f32.mrb[15].mxu1 }
 0x8f5   : > { %v3866_v58 = vld [vmem:[%s7640_s1 + $0x8] sm:$0xff] }
 0x8fb   : > { %v3394_v1 = vpop.f32.mrb[16].mxu1 }
 0x8fc   : > { %v3395_v46 = vadd.f32 %v4576_v24, %v3394_v1  ;;  %v4963_v18 = vpop.f32.mrb[17].mxu1  ;;  %v7280_v24 = vld [vmem:[#allocation8] sm:$0x3] }
 0x8fd   : > { %v3868_v18 = vld [vmem:[%s7640_s1 + $0x18] sm:$0xff]  ;;  %4984 = vmatmul.mubr.msk.f32.vlgmr.msra.gmra.mrb[18].mxu0 %vm772_vm6, %v7280_v24 }
 0x8fe   : > { %3406 = vrot.lane.b32.xlu0 %v3395_v46, %s6180_s30  ;;  %5016 = vmatprep.mubr.msk.f32.mxu0 %vm6174_vm1, %v7631_v47 }
 0x902   : > { %3422 = vrot.lane.b32.xlu0 %v7225_v52, %s6181_s0  ;;  %v5437_v52 = vld [vmem:[%s6620_s2] sm:$0x3]  ;;  %s4596_s2 = sshll.u32 %s6094_s5, 3  ;;  %s531_s5 = sadd.s32 1, %s6094_s5  }
 0x903   : > { %v3448_v7 = vrot.slane %v5437_v52, %v7639_v11  ;;  %v3441_v15 = vrot.slane %v5437_v52, %v7641_v39  ;;  %s4411_s9 = scalar_lea.vmem %s6414_s27, %s4596_s2  ;;  %p528_p13 = scmp.ge.s32.totalorder %s531_s5, 8  }
 0x906   : > { %3450 = vbcast.lane.b32.xlu0 %v3448_v7, 256 }
 0x944   : > { %v3048_v12 = vpop.f32.mrb[14].mxu0 }
 0x945   : > { %v7268_v57 = vadd.f32 %v3121_v14, %v3048_v12  ;;  %v4919_v48 = vpop.f32.mrb[15].mxu0  ;;  %v3865_v14 = vld [vmem:[%s7640_s1] sm:$0xff]  ;;  %v7285_v12 = vld [vmem:[#allocation7] sm:$0x3] }
 0x946   : > { %v5190_v1 = vpack.c.bf16 %v3866_v58, %v3865_v14  ;;  %v7287_v48 = vld [vmem:[#allocation7 + $0x2] sm:$0x3]  ;;  %v4587_v14 = vld [vmem:[#allocation34] ss:$0 sm:$0xff] }
 0x948   : > { %5191 = vmatpush3.bf16.msra.mxu0 %v5190_v1 }
 0x949   : > { %5192 = vmatprep.subr.bf16.mxu0 %v7632_v8 }
 0x954   : > { %v3300_v26 = vpop.f32.mrb[16].mxu0 }
 0x955   : > { %v5209_v42 = vadd.f32 %v4574_v61, %v3300_v26  ;;  %v4952_v21 = vpop.f32.mrb[17].mxu0  ;;  %v3878_v61 = vcombine.low %v7285_v12, %v7287_v48 }
 0x957   : > { %v3398_v25 = vadd.f32 %v5209_v42, %v3395_v46  ;;  %v3867_v46 = vld [vmem:[%s7640_s1 + $0x10] sm:$0xff] }
 0x958   : > { %v5193_v26 = vpack.c.bf16 %v3868_v18, %v3867_v46 }
 0x959   : > { %v4578_v9 = vmul.f32 -1.442695, %v3398_v25 }
 0x95a   : > { %5194 = vmatpush3.bf16.msra.mxu0 %v5193_v26 }
 0x95b   : > { %5383 = vpow2.f32 %v4578_v9  ;;  %5195 = vmatprep.subr.bf16.mxu0 %v7632_v8 }
 0x965   : > { %v5384_v40 = vpop.eup %5383 }
 0x966   : > { %v3402_v45 = vadd.f32 1.0, %v5384_v40 }
 0x968   : > { %5385 = vrcp.f32 %v3402_v45 }
 0x970   : > { %v3407_v44 = vpop.permute.xlu0 %3406 }
 0x972   : > { %v5386_v63 = vpop.eup %5385 }
 0x973   : > { %v3409_v43 = vmul.f32 %v5386_v63, %v3407_v44  ;;  %v3416_v25 = vsub.f32 1.0, %v5386_v63  ;;  %v3489_v44 = vld [vmem:[#allocation36] sm:$0xff] }
 0x974   : > { %v3423_v21 = vpop.permute.xlu0 %3422 }
 0x975   : > { %3411 = vrot.lane.b32.xlu1 %v3409_v43, %s6180_s30  ;;  %v3425_v40 = vmul.f32 %v5386_v63, %v3423_v21  ;;  %v3490_v43 = vld [vmem:[#allocation36 + $0x8] sm:$0xff] }
 0x976   : > { %v5166_v52 = vpack.c.bf16 %v3490_v43, %v3489_v44  ;;  %v3703_v43 = vld [vmem:[%s7642_s19] sm:$0xff] }
 0x978   : > { %5167 = vmatpush3.bf16.msra.mxu1 %v5166_v52  ;;  %v7308_v5 = vpop.permute.xlu0 %3450  ;;  %v3704_v52 = vld [vmem:[%s7642_s19 + $0x8] sm:$0xff] }
 0x979   : > { %5168 = vmatprep.subr.bf16.mxu1 %v7632_v8 }
 0x9d0   : > { %v7317_v13 = vpop.f32.mrb[18].mxu0 }
 0x9d1   : > { %v4985_v41 = vpop.f32.mrb[19].mxu0 }
 0x9e7   : > { %v3412_v51 = vpop.permute.xlu1 %3411 }
 0x9e8   : > { %v3414_v59 = vadd.f32 %v5209_v42, %v3412_v51  ;;  %v7297_v42 = vrot.slane %v3878_v61, %v6685_v20  ;;  %v3453_v61 = vsub.f32 1.0, %v7308_v5 }
 0x9ea   : > { %5387 = vtanh.f32 %v3414_v59  ;;  %5017 = vmatmul.mubr.msk.f32.vlgmr.msra.gmra.mrb[20].mxu0 %vm772_vm6, %v7297_v42  ;;  %v3491_v59 = vld [vmem:[#allocation36 + $0x10] sm:$0xff] }
 0x9eb   : > { %5027 = vmatprep.mubr.msk.f32.mxu0 %vm6174_vm1, %v7631_v47 }
 0x9f4   : > { %v5388_v53 = vpop.eup %5387 }
 0x9f5   : > { %3418 = vrot.lane.b32.xlu1 %v5388_v53, %s6182_s3  ;;  %v3492_v53 = vld [vmem:[#allocation36 + $0x18] sm:$0xff] }
 0x9f6   : > { %v5169_v0 = vpack.c.bf16 %v3492_v53, %v3491_v59  ;;  %v5178_v59 = vpack.c.bf16 %v3704_v52, %v3703_v43  ;;  %v3705_v53 = vld [vmem:[%s7642_s19 + $0x10] sm:$0xff] }
 0x9f8   : > { %5170 = vmatpush3.bf16.msra.mxu1 %v5169_v0  ;;  %v3706_v0 = vld [vmem:[%s7642_s19 + $0x18] sm:$0xff] }
 0x9f9   : > { %3443 = vbcast.lane.b32.xlu1 %v3441_v15, 256  ;;  %5177 = vmatprep.subr.bf16.mxu1 %v7632_v8 }
 0xa67   : > { %v3419_v9 = vpop.permute.xlu1 %3418 }
 0xa68   : > { %v3421_v45 = vmul.f32 %v3419_v9, %v3416_v25  ;;  %v3455_v9 = vmul.f32 %v7216_v28, %v3453_v61 }
 0xa6a   : > { %v3426_v11 = vadd.f32 %v3425_v40, %v3421_v45 }
 0xa6b   : > { %v7304_v7 = vpop.permute.xlu1 %3443 }
 0xa6c   : > { %v3434_v51 = vrot.slane %v3426_v11, %v6685_v20  ;;  %v3452_v18 = vsub.f32 1.0, %v7304_v7 }
 0xa6e   : > { %v3456_v49 = vmul.f32 %v7304_v7, %v3434_v51  ;;  %v3435_v63 = vcombine.high %v3434_v51, %v3434_v51  ;;  %v3454_v26 = vmul.f32 %v7214_v50, %v3452_v18 }
 0xa70   : > { %v3457_v39 = vmul.f32 %v7308_v5, %v3435_v63  ;;  %v3466_v15 = vrot.slane %v3456_v49, %v6685_v20  ;;  %v4572_v49 = vld [vmem:[%s6399_s20] ss:$0 sm:$0xff]  ;;  %v5181_v63 = vpack.c.bf16 %v3706_v0, %v3705_v53 }
 0xa71   : > { %v3132_v41 = vadd.f32 %v4572_v49, %v7268_v57  ;;  %v4117_v0 = vld [vmem:[#allocation42] sm:$0xff]  ;;  %v4119_v49 = vld [vmem:[#allocation42 + $0x10] sm:$0xff] }
 0xa72   : > { %3474 = vrot.lane.b32.xlu1 %v3466_v15, %s6182_s3  ;;  %v3473_v38 = vrot.slane %v3457_v39, %v6685_v20  ;;  %v3787_v39 = vld [vmem:[%s7642_s19 + $0x20] sm:$0xff]  ;;  %v3788_v15 = vld [vmem:[%s7642_s19 + $0x28] sm:$0xff] }
 0xa74   : > { %3476 = vrot.lane.b32.xlu0 %v3473_v38, %s6182_s3  ;;  %v3693_v38 = vrot.slane %v6688_v22, 6 }
 0xabd   : > { %v3954_v58 = vpop.f32.mrb[20].mxu0 }
 0xabe   : > { %v3955_v1 = vadd.f32 %v4587_v14, %v3954_v58  ;;  %v5018_v46 = vpop.f32.mrb[21].mxu0  ;;  %v5184_v14 = vpack.c.bf16 %v3788_v15, %v3787_v39  ;;  %v3789_v58 = vld [vmem:[%s7642_s19 + $0x30] sm:$0xff]  ;;  %v4120_v39 = vld [vmem:[#allocation42 + $0x18] sm:$0xff] }
 0xabf   : > { %v3790_v46 = vld [vmem:[%s7642_s19 + $0x38] sm:$0xff]  ;;  %v5205_v15 = vpack.c.bf16 %v4120_v39, %v4119_v49 }
 0xac0   : > { %3966 = vrot.lane.b32.xlu1 %v3955_v1, %s6180_s30 }
 0xae4   : > { %v3475_v21 = vpop.permute.xlu1 %3474 }
 0xae5   : > { %v3480_v25 = vadd.f32 %v3475_v21, %v3454_v26  ;;  %v3695_v26 = vsel %vm3136_vm2, %v6688_v22, %v3693_v38  ;;  %v3133_v21 = vmul.f32 %v3132_v41, %v7248_v62 }
 0xae6   : > { %v3477_v40 = vpop.permute.xlu0 %3476 }
 0xae7   : > { %v3482_v45 = vmul.f32 %v3480_v25, %v6664_v55  ;;  %3686 = vst.msk [vmem:[#allocation6] sm:$0x3] %vm501_vm0, %v3480_v25  ;;  %v3481_v44 = vadd.f32 %v3477_v40, %v3455_v9  ;;  %v5187_v25 = vpack.c.bf16 %v3790_v46, %v3789_v58  ;;  %v3697_v57 = vrot.slane %v3133_v21, 6  ;;  %v4585_v40 = vld [vmem:[#allocation33] ss:$0 sm:$0xff] }
 0xae9   : > { %v3483_v50 = vmul.f32 %v3481_v44, %v6670_v6  ;;  %3687 = vst.msk [vmem:[#allocation6 + $0x2] sm:$0x3] %vm501_vm0, %v3481_v44  ;;  %v3484_v11 = vsel %vm501_vm0, %v3482_v45, 0.0  ;;  %v3699_v9 = vsel %vm3136_vm2, %v3133_v21, %v3697_v57  ;;  %v4034_v57 = vld [vmem:[%s7643_s28 + $0x8] sm:$0xff] }
 0xaeb   : > { %v3485_v51 = vsel %vm501_vm0, %v3483_v50, 0.0 }
 0xaec   : > { %v3486_v28 = vadd.f32 %v3485_v51, %v3484_v11 }
 0xaee   : > { %4973 = vmatmul.mubr.msk.f32.vlgmr.msra.gmra.mrb[18].mxu1 %vm772_vm6, %v3486_v28 }
 0xaef   : > { %5179 = vmatpush3.bf16.msra.mxu1 %v5178_v59  ;;  %4994 = vmatprep.mubr.msk.f32.mxu1 %vm6174_vm1, %v7631_v47 }
 0xaf0   : > { %5180 = vmatprep.subr.bf16.mxu1 %v7632_v8 }
 0xaf3   : > { %5182 = vmatpush3.bf16.msra.mxu1 %v5181_v63 }
 0xaf4   : > { %5183 = vmatprep.subr.bf16.mxu1 %v7632_v8 }
 0xaf6   : > { %4995 = vmatmul.mubr.msk.f32.vlgmr.msra.gmra.mrb[20].mxu1 %vm772_vm6, %v3695_v26 }
 0xaf7   : > { %5185 = vmatpush3.bf16.msra.mxu1 %v5184_v14  ;;  %5005 = vmatprep.mubr.msk.f32.mxu1 %vm6174_vm1, %v7631_v47 }
 0xaf8   : > { %5186 = vmatprep.subr.bf16.mxu1 %v7632_v8 }
 0xafb   : > { %5188 = vmatpush3.bf16.msra.mxu1 %v5187_v25  ;;  %v4033_v25 = vld [vmem:[%s7643_s28] sm:$0xff] }
 0xafc   : > { %5201 = vmatprep.subr.bf16.mxu1 %v7632_v8 }
 0xafe   : > { %5006 = vmatmul.mubr.msk.f32.vlgmr.msra.gmra.mrb[20].mxu1 %vm772_vm6, %v3699_v9 }
 0xaff   : > { %5038 = vmatprep.mubr.msk.f32.mxu1 %vm6174_vm1, %v7631_v47  ;;  %v4118_v47 = vld [vmem:[#allocation42 + $0x8] sm:$0xff]  ;;  %vm4395_vm1 = vcmask 1041409  }
 0xb00   : > { %v5202_v63 = vpack.c.bf16 %v4118_v47, %v4117_v0  ;;  %v4546_v47 = vld [vmem:[#allocation27] ss:$0 sm:$0xff] }
 0xb01   : > { %v1289_v39 = vadd.f32 %v4546_v47, %v6797_v60 }
 0xb02   : > { %5203 = vmatpush3.bf16.msra.mxu1 %v5202_v63  ;;  %v4592_v63 = vld [vmem:[#allocation45] ss:$0 sm:$0xff] }
 0xb03   : > { %5204 = vmatprep.subr.bf16.mxu1 %v7632_v8 }
 0xb06   : > { %5206 = vmatpush3.bf16.msra.mxu1 %v5205_v15 }
 0xb32   : > { %v3967_v59 = vpop.permute.xlu1 %3966 }
 0xbc1   : > { %v7362_v22 = vpop.f32.mrb[18].mxu1 }
 0xbc2   : > { %v4974_v62 = vpop.f32.mrb[19].mxu1 }
 0xbc3   : > { %v5196_v62 = vpack.c.bf16 %v4034_v57, %v4033_v25 }
 0xbc5   : > { %5197 = vmatpush3.bf16.msra.mxu0 %v5196_v62 }
 0xbc6   : > { %5198 = vmatprep.subr.bf16.mxu0 %v7632_v8  ;;  %v4581_v8 = vld [vmem:[#allocation40] ss:$0 sm:$0xff] }
 0xbc7   : > { %v3654_v15 = vadd.f32 %v4581_v8, %v7317_v13 }
 0xbd1   : > { %v3860_v45 = vpop.f32.mrb[20].mxu1 }
 0xbd2   : > { %v5210_v44 = vadd.f32 %v4585_v40, %v3860_v45  ;;  %v5007_v43 = vpop.f32.mrb[21].mxu1 }
 0xbd3   : > { %v4035_v43 = vld [vmem:[%s7643_s28 + $0x10] sm:$0xff] }
 0xbd4   : > { %v3958_v52 = vadd.f32 %v5210_v44, %v3955_v1  ;;  %v7368_v1 = vld [vmem:[#allocation9] sm:$0x3] }
 0xbd5   : > { %5039 = vmatmul.mubr.msk.f32.vlgmr.msra.gmra.mrb[22].mxu1 %vm772_vm6, %v7368_v1 }
 0xbd6   : > { %v4589_v50 = vmul.f32 -1.442695, %v3958_v52  ;;  %v4036_v52 = vld [vmem:[%s7643_s28 + $0x18] sm:$0xff] }
 0xbd8   : > { %5389 = vpow2.f32 %v4589_v50  ;;  %v5199_v50 = vpack.c.bf16 %v4036_v52, %v4035_v43  ;;  %v3999_v52 = vmul.f32 %v7287_v48, %v3453_v61 }
 0xbda   : > { %5200 = vmatpush3.bf16.msra.mxu0 %v5199_v50 }
 0xbe2   : > { %v5390_v11 = vpop.eup %5389 }
 0xbe3   : > { %v3962_v51 = vadd.f32 1.0, %v5390_v11 }
 0xbe5   : > { %5391 = vrcp.f32 %v3962_v51 }
 0xbef   : > { %v5392_v28 = vpop.eup %5391 }
 0xbf0   : > { %v3969_v53 = vmul.f32 %v5392_v28, %v3967_v59  ;;  %v3976_v46 = vsub.f32 1.0, %v5392_v28 }
 0xbf2   : > { %3971 = vrot.lane.b32.xlu0 %v3969_v53, %s6180_s30  ;;  %v4540_v53 = vld [vmem:[#allocation24] ss:$0 sm:$0xff] }
 0xbf3   : > { %v1012_v49 = vadd.f32 %v4540_v53, %v6748_v3  ;;  %v4538_v3 = vld [vmem:[#allocation22] ss:$0 sm:$0xff] }
 0xbf6   : > { %3982 = vrot.lane.b32.xlu0 %v7297_v42, %s6181_s0 }
 0xc64   : > { %v3972_v38 = vpop.permute.xlu0 %3971 }
 0xc65   : > { %v3974_v41 = vadd.f32 %v5210_v44, %v3972_v38 }
 0xc67   : > { %5393 = vtanh.f32 %v3974_v41  ;;  %v5207_v41 = vadd.f32 %v4538_v3, %v6790_v54 }
 0xc68   : > { %v3983_v58 = vpop.permute.xlu0 %3982 }
 0xc69   : > { %v3985_v26 = vmul.f32 %v5392_v28, %v3983_v58  ;;  %v4580_v58 = vld [vmem:[#allocation39] ss:$0 sm:$0xff] }
 0xc71   : > { %v5394_v14 = vpop.eup %5393 }
 0xc72   : > { %3978 = vrot.lane.b32.xlu1 %v5394_v14, %s6182_s3  ;;  %v4544_v14 = vld [vmem:[#allocation25] ss:$0 sm:$0xff] }
 0xc73   : > { %v5208_v60 = vadd.f32 %v4544_v14, %v6792_v56  ;;  %v3998_v56 = vmul.f32 %v7285_v12, %v3452_v18 }
 0xc75   : > { %v1292_v13 = vadd.f32 %v5208_v60, %v1289_v39 }
 0xc77   : > { %v4548_v25 = vmul.f32 -1.442695, %v1292_v13 }
 0xca8   : > { %v4197_v9 = vpop.f32.mrb[22].mxu1 }
 0xca9   : > { %v5040_v45 = vpop.f32.mrb[23].mxu1  ;;  %v7390_v38 = vadd.f32 %v4592_v63, %v4197_v9 }
 0xce4   : > { %v3979_v42 = vpop.permute.xlu1 %3978 }
 0xce5   : > { %v3981_v21 = vmul.f32 %v3979_v42, %v3976_v46  ;;  %v1015_v46 = vadd.f32 %v5207_v41, %v1012_v49  ;;  %v3572_v42 = vadd.f32 %v4580_v58, %v7362_v22 }
 0xce7   : > { %v3986_v40 = vadd.f32 %v3985_v26, %v3981_v21  ;;  %v4542_v26 = vmul.f32 -1.442695, %v1015_v46  ;;  %v3657_v21 = vadd.f32 %v3654_v15, %v3572_v42 }
 0xce9   : > { %v3994_v44 = vrot.slane %v3986_v40, %v6685_v20  ;;  %5395 = vpow2.f32 %v4542_v26  ;;  %v4583_v57 = vmul.f32 -1.442695, %v3657_v21  ;;  %v4591_v26 = vld [vmem:[#allocation43] ss:$0 sm:$0xff] }
 0xcea   : > { %5397 = vpow2.f32 %v4548_v25 }
 0xceb   : > { %v3995_v11 = vcombine.high %v3994_v44, %v3994_v44  ;;  %v4000_v51 = vmul.f32 %v3994_v44, %v7304_v7  ;;  %5399 = vpow2.f32 %v4583_v57 }
 0xced   : > { %v4010_v59 = vrot.slane %v4000_v51, %v6685_v20  ;;  %v4001_v28 = vmul.f32 %v3995_v11, %v7308_v5 }
 0xcef   : > { %4018 = vrot.lane.b32.xlu1 %v4010_v59, %s6182_s3  ;;  %v4017_v0 = vrot.slane %v4001_v28, %v6685_v20 }
 0xcf1   : > { %4020 = vrot.lane.b32.xlu0 %v4017_v0, %s6182_s3 }
 0xcf3   : > { %1023 = vrot.lane.b32.xlu1 %v1012_v49, %s6180_s30  ;;  %v5396_v9 = vpop.eup %5395 }
 0xcf4   : > { %v5398_v62 = vpop.eup %5397  ;;  %v1019_v40 = vadd.f32 1.0, %v5396_v9 }
 0xcf5   : > { %1300 = vrot.lane.b32.xlu0 %v1289_v39, %s6180_s30  ;;  %v5400_v45 = vpop.eup %5399  ;;  %v1296_v54 = vadd.f32 1.0, %v5398_v62 }
 0xcf6   : > { %5401 = vrcp.f32 %v1019_v40  ;;  %v3661_v44 = vadd.f32 1.0, %v5400_v45  ;;  %v5438_v45 = vld [vmem:[#allocation4] sm:$0x3] }
 0xcf7   : > { %3665 = vrot.lane.b32.xlu1 %v3654_v15, %s6180_s30  ;;  %5403 = vrcp.f32 %v1296_v54 }
 0xcf8   : > { %5405 = vrcp.f32 %v3661_v44  ;;  %v5439_v44 = vld [vmem:[#allocation5] sm:$0x3] }
 0xcf9   : > { %4209 = vrot.lane.b32.xlu0 %v7390_v38, %s6180_s30 }
 0xd00   : > { %v7406_v59 = vpop.eup %5401 }
 0xd01   : > { %v7411_v7 = vpop.eup %5403 }
 0xd02   : > { %v7417_v61 = vpop.eup %5405 }
 0xd61   : > { %v4019_v22 = vpop.permute.xlu1 %4018 }
 0xd62   : > { %v4024_v43 = vadd.f32 %v4019_v22, %v3998_v56 }
 0xd63   : > { %v4021_v50 = vpop.permute.xlu0 %4020 }
 0xd64   : > { %v4026_v11 = vmul.f32 %v4024_v43, %v6664_v55  ;;  %4230 = vst.msk [vmem:[#allocation7] sm:$0x3] %vm501_vm0, %v4024_v43  ;;  %v4025_v51 = vadd.f32 %v4021_v50, %v3999_v52 }
 0xd65   : > { %v1024_v28 = vpop.permute.xlu1 %1023 }
 0xd66   : > { %v4027_v53 = vmul.f32 %v4025_v51, %v6670_v6  ;;  %4231 = vst.msk [vmem:[#allocation7 + $0x2] sm:$0x3] %vm501_vm0, %v4025_v51  ;;  %v1026_v12 = vmul.f32 %v7406_v59, %v1024_v28  ;;  %v4028_v48 = vsel %vm501_vm0, %v4026_v11, 0.0 }
 0xd67   : > { %v1301_v5 = vpop.permute.xlu0 %1300 }
 0xd68   : > { %v4029_v18 = vsel %vm501_vm0, %v4027_v53, 0.0  ;;  %v1303_v55 = vmul.f32 %v7411_v7, %v1301_v5  ;;  %1028 = vrot.lane.b32.xlu1 %v1026_v12, %s6180_s30 }
 0xd69   : > { %v4030_v0 = vadd.f32 %v4029_v18, %v4028_v48  ;;  %v3666_v47 = vpop.permute.xlu1 %3665 }
 0xd6a   : > { %v3668_v6 = vmul.f32 %v7417_v61, %v3666_v47  ;;  %1305 = vrot.lane.b32.xlu0 %v1303_v55, %s6180_s30 }
 0xd6b   : > { %5028 = vmatmul.mubr.msk.f32.vlgmr.msra.gmra.mrb[22].mxu0 %vm772_vm6, %v4030_v0  ;;  %v4210_v49 = vpop.permute.xlu0 %4209  ;;  %vm4397_vm6 = vcmask 1042434  }
 0xd6c   : > { %3670 = vrot.lane.b32.xlu1 %v3668_v6, %s6180_s30 }
 0xd70   : > { %1842 = vrot.lane.b32.xlu1 %v6995_v31, %s6183_s12 }
 0xd74   : > { %2362 = vrot.lane.b32.xlu1 %v6966_v33, %s6183_s12 }
 0xd78   : > { %1846 = vrot.lane.b32.xlu1 %v7000_v32, %s6183_s12 }
 0xd7c   : > { %1848 = vrot.lane.b32.xlu1 %v6991_v4, %s6183_s12 }
 0xd80   : > { %1850 = vrot.lane.b32.xlu1 %v7002_v36, %s6183_s12 }
 0xd84   : > { %1852 = vrot.lane.b32.xlu1 %v6993_v29, %s6183_s12 }
 0xd88   : > { %1854 = vrot.lane.b32.xlu1 %v7004_v23, %s6183_s12 }
 0xd8c   : > { %1856 = vrot.lane.b32.xlu1 %v6998_v35, %s6183_s12 }
 0xdda   : > { %v1029_v8 = vpop.permute.xlu1 %1028 }
 0xddb   : > { %v1031_v63 = vadd.f32 %v5207_v41, %v1029_v8 }
 0xddc   : > { %v1306_v39 = vpop.permute.xlu0 %1305 }
 0xddd   : > { %5407 = vtanh.f32 %v1031_v63  ;;  %v1308_v15 = vadd.f32 %v5208_v60, %v1306_v39 }
 0xdde   : > { %v3671_v3 = vpop.permute.xlu1 %3670 }
 0xddf   : > { %5409 = vtanh.f32 %v1308_v15  ;;  %v3673_v14 = vadd.f32 %v3671_v3, %v3572_v42 }
 0xde1   : > { %5411 = vtanh.f32 %v3673_v14 }
 0xde7   : > { %v5408_v58 = vpop.eup %5407 }
 0xde8   : > { %1035 = vrot.lane.b32.xlu1 %v5408_v58, %s6182_s3 }
 0xde9   : > { %v5410_v46 = vpop.eup %5409 }
 0xdeb   : > { %v5412_v13 = vpop.eup %5411 }
 0xdec   : > { %1312 = vrot.lane.b32.xlu1 %v5410_v46, %s6182_s3 }
 0xdf0   : > { %3677 = vrot.lane.b32.xlu1 %v5412_v13, %s6182_s3 }
 0xe3e   : > { %v4106_v21 = vpop.f32.mrb[22].mxu0 }
 0xe3f   : > { %v4116_v25 = vadd.f32 %v4591_v26, %v4106_v21  ;;  %v5029_v41 = vpop.f32.mrb[23].mxu0 }
 0xe41   : > { %v4201_v57 = vadd.f32 %v7390_v38, %v4116_v25  ;;  %v1843_v38 = vpop.permute.xlu1 %1842 }
 0xe42   : > { %v1866_v22 = vadd.f32 %v1843_v38, %v6995_v31 }
 0xe43   : > { %v4594_v60 = vmul.f32 -1.442695, %v4201_v57 }
 0xe45   : > { %5413 = vpow2.f32 %v4594_v60  ;;  %v2363_v54 = vpop.permute.xlu1 %2362 }
 0xe46   : > { %v2386_v56 = vadd.f32 %v2363_v54, %v6966_v33 }
 0xe48   : > { %v2394_v43 = vadd.f32 %v2386_v56, %v1866_v22  ;;  %v1310_v56 = vsub.f32 1.0, %v7411_v7 }
 0xe49   : > { %v1847_v50 = vpop.permute.xlu1 %1846 }
 0xe4a   : > { %v4287_v52 = vrot.slane %v2394_v43, %v6685_v20  ;;  %v1868_v8 = vadd.f32 %v1847_v50, %v7000_v32  ;;  %v3675_v50 = vsub.f32 1.0, %v7417_v61 }
 0xe4d   : > { %v1849_v28 = vpop.permute.xlu1 %1848 }
 0xe4e   : > { %v1869_v6 = vadd.f32 %v1849_v28, %v6991_v4 }
 0xe4f   : > { %v5414_v9 = vpop.eup %5413 }
 0xe50   : > { %v4205_v42 = vadd.f32 1.0, %v5414_v9 }
 0xe51   : > { %v1851_v33 = vpop.permute.xlu1 %1850 }
 0xe52   : > { %5415 = vrcp.f32 %v4205_v42 }
 0xe55   : > { %v1853_v48 = vpop.permute.xlu1 %1852 }
 0xe56   : > { %v1871_v58 = vadd.f32 %v1853_v48, %v6993_v29 }
 0xe59   : > { %v1855_v63 = vpop.permute.xlu1 %1854 }
 0xe5c   : > { %v7443_v62 = vpop.eup %5415 }
 0xe5d   : > { %v4212_v40 = vmul.f32 %v7443_v62, %v4210_v49  ;;  %v1857_v13 = vpop.permute.xlu1 %1856 }
 0xe5e   : > { %v1873_v29 = vadd.f32 %v1857_v13, %v6998_v35 }
 0xe5f   : > { %4214 = vrot.lane.b32.xlu0 %v4212_v40, %s6180_s30  ;;  %v1033_v40 = vsub.f32 1.0, %v7406_v59  ;;  %s4271_s30 = scalar_lea.vmem [#allocation52], %s6611_s7 }
 0xe61   : > { %v1036_v57 = vpop.permute.xlu1 %1035 }
 0xe63   : > { %1844 = vrot.lane.b32.xlu0 %v6989_v37, %s6183_s12 }
 0xe67   : > { %2364 = vrot.lane.b32.xlu0 %v6971_v17, %s6183_s12 }
 0xe6b   : > { %2366 = vrot.lane.b32.xlu0 %v6963_v16, %s6183_s12 }
 0xe6f   : > { %2368 = vrot.lane.b32.xlu0 %v6976_v10, %s6183_s12 }
 0xe73   : > { %2370 = vrot.lane.b32.xlu0 %v6979_v30, %s6183_s12 }
 0xe77   : > { %2372 = vrot.lane.b32.xlu0 %v6968_v19, %s6183_s12 }
 0xe7b   : > { %2374 = vrot.lane.b32.xlu0 %v6983_v2, %s6183_s12 }
 0xe7f   : > { %2376 = vrot.lane.b32.xlu0 %v6973_v27, %s6183_s12  ;;  %s6185_s12 = smov (%p528_p13), [#allocation52]  }
 0xe83   : > { %1039 = vrot.lane.b32.xlu0 %v5438_v45, %s6181_s0 }
 0xe87   : > { %1316 = vrot.lane.b32.xlu0 %v5439_v44, %s6181_s0 }
 0xe8b   : > { %3681 = vrot.lane.b32.xlu0 %v7280_v24, %s6181_s0 }
 0xe8f   : > { %4225 = vrot.lane.b32.xlu0 %v7368_v1, %s6181_s0  ;;  %v4595_v1 = vld [vmem:[%s539_s8] ss:$0 sm:$0xff]  ;;  %s4431_s8 = sshll.u32 (%p528_p13), %s6185_s12, 4  ;;  %s7529_s8 = int_to_ptr.vmem [resolvable:$true] %s4431_s8 }
 0xe93   : > { %4338 = vperm.xlu0 %5321, %v4287_v52  }
 0xed1   : > { %v4215_v11 = vpop.permute.xlu0 %4214 }
 0xed2   : > { %v4217_v51 = vadd.f32 %v4215_v11, %v4116_v25  ;;  %v1872_v25 = vadd.f32 %v1855_v63, %v7004_v23  ;;  %v1313_v23 = vpop.permute.xlu1 %1312 }
 0xed3   : > { %v1315_v43 = vmul.f32 %v1313_v23, %v1310_v56 }
 0xed4   : > { %5417 = vtanh.f32 %v4217_v51 }
 0xed5   : > { %v1845_v53 = vpop.permute.xlu0 %1844 }
 0xed6   : > { %v1867_v18 = vadd.f32 %v1845_v53, %v6989_v37 }
 0xed9   : > { %v2365_v12 = vpop.permute.xlu0 %2364 }
 0xeda   : > { %v2387_v31 = vadd.f32 %v2365_v12, %v6971_v17 }
 0xedc   : > { %v2395_v55 = vadd.f32 %v2387_v31, %v1867_v18 }
 0xedd   : > { %v2367_v5 = vpop.permute.xlu0 %2366 }
 0xede   : > { %v5418_v24 = vpop.eup %5417  ;;  %v2388_v0 = vadd.f32 %v2367_v5, %v6963_v16  ;;  %v4294_v15 = vrot.slane %v2395_v55, %v6685_v20  ;;  %v1870_v16 = vadd.f32 %v1851_v33, %v7002_v36 }
 0xedf   : > { %4221 = vrot.lane.b32.xlu1 %v5418_v24, %s6182_s3 }
 0xee0   : > { %v2396_v39 = vadd.f32 %v2388_v0, %v1868_v8 }
 0xee1   : > { %v2369_v47 = vpop.permute.xlu0 %2368 }
 0xee2   : > { %v2389_v49 = vadd.f32 %v2369_v47, %v6976_v10  ;;  %v4301_v10 = vrot.slane %v2396_v39, %v6685_v20 }
 0xee3   : > { %4242 = vrot.lane.b32.xlu1 %v4595_v1, %s6181_s0  ;;  %s6184_s0 = smov (%p528_p13), [#allocation51]  }
 0xee4   : > { %v2397_v17 = vadd.f32 %v2389_v49, %v1869_v6 }
 0xee5   : > { %v2371_v37 = vpop.permute.xlu0 %2370 }
 0xee6   : > { %v2390_v3 = vadd.f32 %v2371_v37, %v6979_v30  ;;  %v4308_v14 = vrot.slane %v2397_v17, %v6685_v20 }
 0xee7   : > { %4341 = vperm.xlu1 %5322, %v4294_v15  }
 0xee8   : > { %4347 = vperm.xlu0 %5321, %v4308_v14   ;;  %v2398_v4 = vadd.f32 %v2390_v3, %v1870_v16 }
 0xee9   : > { %v2373_v32 = vpop.permute.xlu0 %2372 }
 0xeea   : > { %v2391_v46 = vadd.f32 %v2373_v32, %v6968_v19  ;;  %v4315_v21 = vrot.slane %v2398_v4, %v6685_v20 }
 0xeeb   : > { %4344 = vperm.xlu1 %5322, %v4301_v10  }
 0xeec   : > { %v2399_v26 = vadd.f32 %v2391_v46, %v1871_v58 }
 0xeed   : > { %v2375_v30 = vpop.permute.xlu0 %2374 }
 0xeee   : > { %v2392_v36 = vadd.f32 %v2375_v30, %v6983_v2  ;;  %v4322_v41 = vrot.slane %v2399_v26, %v6685_v20  ;;  %v1038_v2 = vmul.f32 %v1036_v57, %v1033_v40 }
 0xeef   : > { %4350 = vperm.xlu1 %5322, %v4315_v21  }
 0xef0   : > { %v2400_v60 = vadd.f32 %v2392_v36, %v1872_v25  ;;  %4353 = vperm.xlu0 %5321, %v4322_v41  }
 0xef1   : > { %v2377_v9 = vpop.permute.xlu0 %2376 }
 0xef2   : > { %v4329_v19 = vrot.slane %v2400_v60, %v6685_v20  ;;  %v2393_v42 = vadd.f32 %v2377_v9, %v6973_v27  ;;  %v3678_v27 = vpop.permute.xlu1 %3677 }
 0xef3   : > { %v3680_v28 = vmul.f32 %v3678_v27, %v3675_v50 }
 0xef4   : > { %v2401_v38 = vadd.f32 %v2393_v42, %v1873_v29  ;;  %4356 = vperm.xlu1 %5322, %v4329_v19  }
 0xef5   : > { %v1040_v45 = vpop.permute.xlu0 %1039 }
 0xef6   : > { %v1042_v54 = vmul.f32 %v7406_v59, %v1040_v45  ;;  %v4336_v44 = vrot.slane %v2401_v38, %v6685_v20  ;;  %v4219_v59 = vsub.f32 1.0, %v7443_v62 }
 0xef8   : > { %v1043_v22 = vadd.f32 %v1042_v54, %v1038_v2  ;;  %4359 = vperm.xlu0 %5321, %v4336_v44  }
 0xef9   : > { %v1317_v35 = vpop.permute.xlu0 %1316 }
 0xefa   : > { %v1319_v52 = vmul.f32 %v7411_v7, %v1317_v35 }
 0xefc   : > { %v1320_v11 = vadd.f32 %v1319_v52, %v1315_v43 }
 0xefd   : > { %v3682_v51 = vpop.permute.xlu0 %3681 }
 0xefe   : > { %v3684_v53 = vmul.f32 %v7417_v61, %v3682_v51  ;;  %v7644_v61 = vlaneseq }
 0xf00   : > { %v3685_v33 = vadd.f32 %v3684_v53, %v3680_v28  ;;  %v4362_v1 = vand.u32 127, %v7644_v61 }
 0xf01   : > { %v4226_v12 = vpop.permute.xlu0 %4225 }
 0xf02   : > { %3689 = vrot.lane.b32.xlu1 %v3685_v33, %s6182_s3  ;;  %v4228_v7 = vmul.f32 %v7443_v62, %v4226_v12  ;;  %v4365_v47 = vsub.s32 %v4362_v1, %v6642_v34 }
 0xf12   : > { %v4339_v0 = vpop.permute.xlu0 %4338 }
 0xf13   : > { %v4366_v17 = vrot.slane %v4339_v0, %v4365_v47 }
 0xf51   : > { %v4222_v20 = vpop.permute.xlu1 %4221 }
 0xf52   : > { %v4224_v5 = vmul.f32 %v4222_v20, %v4219_v59 }
 0xf54   : > { %v4229_v18 = vadd.f32 %v4228_v7, %v4224_v5 }
 0xf55   : > { %v4243_v31 = vpop.permute.xlu1 %4242 }
 0xf56   : > { %v4245_v24 = vadd.f32 %v4243_v31, %v1043_v22  ;;  %v4252_v48 = vadd.f32 %v4243_v31, %v1320_v11 }
 0xf58   : > { %4254 = vrot.lane.b32.xlu0 %v4252_v48, %s6182_s3  ;;  %4247 = vrot.lane.b32.xlu1 %v4245_v24, %s6182_s3 }
 0xf5c   : > { %4260 = vrot.lane.b32.xlu1 %v1043_v22, %s6182_s3  ;;  %4233 = vrot.lane.b32.xlu0 %v4229_v18, %s6182_s3 }
 0xf60   : > { %4265 = vrot.lane.b32.xlu0 %v1320_v11, %s6182_s3  ;;  %s4419_s3 = sshll.u32 (%p528_p13), %s6184_s0, 4  ;;  %s4420_s3 = int_to_ptr.vmem [resolvable:$true] %s4419_s3 }
 0xf61   :  { %s6012_s2 = scalar_lea.vmem (%p528_p13), %s4420_s3, 256  ;;  %p6017_p1 = scmp.lt.s32.totalorder (%p528_p13), %s4420_s3, %s4420_s3 }
 0xf62   :  { %p6013_p0 = scmp.ne.s32.totalorder (%p528_p13), %s4420_s3, %s6012_s2  ;;  %p6018_p2 = scmp.lt.s32.totalorder (%p528_p13), %s6012_s2, %s6012_s2 }
 0xf64   :  { %p6019_p3 = por (%p528_p13), %p6018_p2, %p6017_p1 }
 0xf66   : > { %v4342_v55 = vpop.permute.xlu1 %4341  ;;  %p6020_p4 = pnand (%p528_p13), %p6019_p3, %p6013_p0 }
 0xf67   : > { %v4370_v49 = vrot.slane %v4342_v55, %v4365_v47  ;;  %v4348_v62 = vpop.permute.xlu0 %4347 }
 0xf68   : > { %v4378_v14 = vrot.slane %v4348_v62, %v4365_v47 }
 0xf69   : > { %v4396_v39 = vsel %vm4395_vm1, %v4370_v49, %v4366_v17 }
 0xf6a   : > { %v4345_v6 = vpop.permute.xlu1 %4344 }
 0xf6b   : > { %v4374_v8 = vrot.slane %v4345_v6, %v4365_v47 }
 0xf6d   : > { %v4398_v37 = vsel %vm4397_vm6, %v4374_v8, %v4396_v39 }
 0xf6e   : > { %v4351_v63 = vpop.permute.xlu1 %4350  ;;  %v4400_v34 = vsel %vm4399_vm10, %v4378_v14, %v4398_v37 }
 0xf6f   : > { %v4382_v15 = vrot.slane %v4351_v63, %v4365_v47  ;;  %v4354_v3 = vpop.permute.xlu0 %4353 }
 0xf70   : > { %v4386_v10 = vrot.slane %v4354_v3, %v4365_v47 }
 0xf71   : > { %v4402_v4 = vsel %vm4401_vm11, %v4382_v15, %v4400_v34 }
 0xf72   : > { %v4404_v13 = vsel %vm4403_vm12, %v4386_v10, %v4402_v4 }
 0xf73   : > { %v4357_v16 = vpop.permute.xlu1 %4356 }
 0xf74   : > { %v4390_v32 = vrot.slane %v4357_v16, %v4365_v47 }
 0xf76   : > { %v4406_v21 = vsel %vm4405_vm13, %v4390_v32, %v4404_v13 }
 0xf77   : > { %v3690_v58 = vpop.permute.xlu1 %3689  ;;  %v4360_v46 = vpop.permute.xlu0 %4359 }
 0xf78   : > { %3692 = vst.msk [vmem:[#allocation8] sm:$0x3] %vm501_vm0, %v3690_v58  ;;  %4270 = vst.msk [vmem:[%s4269_s10] sm:$0x3] %vm501_vm0, %v3690_v58  ;;  %v4394_v26 = vrot.slane %v4360_v46, %v4365_v47 }
 0xf7a   : > { %v4408_v30 = vsel %vm4407_vm14, %v4394_v26, %v4406_v21 }
 0xf7b   : > { %4413 = vst.msk [vmem:[%s4411_s9] sm:$0xff] %vm4412_vm15, %v4408_v30 }
 0xfca   : > { %v4248_v25 = vpop.permute.xlu1 %4247  ;;  %v4255_v36 = vpop.permute.xlu0 %4254 }
 0xfcb   : > { %4251 = vst.msk [vmem:[%s4250_s23] sm:$0x3] %vm501_vm0, %v4248_v25  ;;  %4258 = vst.msk [vmem:[%s4257_s26] sm:$0x3] %vm501_vm0, %v4255_v36 }
 0xfcd   :  { %530 = sbr.rel (!%p528_p13) target bundleno = 613 (0x265), region = 368 }
 0xfce   : > { %v4261_v41 = vpop.permute.xlu1 %4260  ;;  %v4234_v57 = vpop.permute.xlu0 %4233 }
 0xfcf   : > { %4263 = vst.msk [vmem:[#allocation4] sm:$0x3] %vm501_vm0, %v4261_v41  ;;  %4236 = vst.msk [vmem:[#allocation9] sm:$0x3] %vm501_vm0, %v4234_v57 }
 0xfd0   : > { %4272 = vst.msk [vmem:[%s4271_s30] sm:$0x3] %vm501_vm0, %v4234_v57 }
 0xfd2   : > { %v4266_v60 = vpop.permute.xlu0 %4265 }
 0xfd3   : > { %4268 = vst.msk [vmem:[#allocation5] sm:$0x3] %vm501_vm0, %v4266_v60 }
 0xfd4   :  { %6023 = shalt.err (!%p6020_p4)
}
 0xfd5   :  { %s6024_s7 = scalar_lea.hbm %s6404_s25, 256 }
 0xfd6   :  { %p6025_p5 = scmp.ne.s32.totalorder %s6404_s25, %s6024_s7  ;;  %p6028_p6 = scmp.lt.u32.totalorder %s6024_s7, %s6404_s25 }
 0xfd8   :  { %p6030_p7 = pnand %p6028_p6, %p6025_p5 }
 0xfda   :  { %6033 = shalt.err (!%p6030_p7)
}
 0xfdb   :  { %4425 = dma.vmem_to_hbm [thread:$0]  %s4420_s3, 256, %s6404_s25, [#allocation12], %s6142_s11, %s6142_s11, %s6143_s15  }
 0xfdc   :  { %s6034_s20 = scalar_lea.vmem %s7529_s8, 256  ;;  %p6039_p9 = scmp.lt.s32.totalorder %s7529_s8, %s7529_s8 }
 0xfdd   :  { %p6035_p8 = scmp.ne.s32.totalorder %s7529_s8, %s6034_s20  ;;  %p6040_p10 = scmp.lt.s32.totalorder %s6034_s20, %s6034_s20 }
 0xfdf   :  { %p6041_p11 = por %p6040_p10, %p6039_p9 }
 0xfe1   :  { %p6042_p12 = pnand %p6041_p11, %p6035_p8 }
 0xfe3   :  { %6045 = shalt.err (!%p6042_p12)
}
 0xfe4   :  { %s6046_s27 = scalar_lea.hbm %s6409_s24, 256 }
 0xfe5   :  { %p6047_p13 = scmp.ne.s32.totalorder %s6409_s24, %s6046_s27  ;;  %p6050_p0 = scmp.lt.u32.totalorder %s6046_s27, %s6409_s24 }
 0xfe7   :  { %p6052_p1 = pnand %p6050_p0, %p6047_p13 }
 0xfe9   :  { %6055 = shalt.err (!%p6052_p1)
}
 0xfea   :  { %4437 = dma.vmem_to_hbm [thread:$0]  %s7529_s8, 256, %s6409_s24, [#allocation53], %s6142_s11, %s6142_s11, %s6143_s15  }
 0xfeb   :  { %6088 = dma.done.wait [#allocation12], 256  }
 0xfec   :  { %6089 = vsyncadd [#allocation12], 4294967040 }
 0xfed   :  { %6090 = dma.done.wait [#allocation53], 256  }
 0xfee   :  { %6091 = vsyncadd [#allocation53], 4294967040 }
 0xfef   :  { %4448 = vsyncpa [#allocation11], 1 }
 0xff0   :  { %4449 = vsyncpa [#allocation14], 1 }
 0xff1   :  { %4450 = vsyncpa [#allocation17], 1 }
 0xff2   :  { %4451 = vsyncpa [#allocation20], 1 }
 0xff3   :  { %4452 = vsyncpa [#allocation23], 1 }
 0xff4   :  { %4453 = vsyncpa [#allocation26], 1 }
 0xff5   :  { %4454 = vsyncpa [#allocation29], 1 }
 0xff6   :  { %4455 = vsyncpa [#allocation32], 1 }
 0xff7   :  { %4456 = vsyncpa [#allocation35], 1 }
 0xff8   :  { %4457 = vsyncpa [#allocation38], 1 }
 0xff9   :  { %4458 = vsyncpa [#allocation41], 1 }
 0xffa   :  { %4459 = vsyncpa [#allocation44], 1 }
 0xffb   :  { %4460 = vsyncpa [#allocation47], 1 }
 0xffc   :  { %4461 = vsyncpa [#allocation50], 1 }
 0xffd   :  { %4462 = vsyncpa [#allocation12], 1 }
 0xffe   :  { %4463 = vsyncpa [#allocation53], 1 }

</bundles_post_ra>
